<compile_context>
chip_gen: v6e
topology: v6e:2x2x1
jax: 0.10.0
libtpu: 0.0.40
codegen_flags: <defaults>
</compile_context>

<pallas_src>
import functools

import jax
import jax.numpy as jnp
from jax.experimental import pallas as pl
from jax.experimental.pallas import tpu as pltpu

LANE = 128  # TPU lane width; channel padding target for dense stores / full MXU


def _round_up(n, m):
    return ((n + m - 1) // m) * m


# ----------------------------------------------------------------------------
# Fused BasicBlock kernel: one image per grid step
# ----------------------------------------------------------------------------
def _basic_block_kernel(x_ref, w1_ref, b1_ref, w2_ref, b2_ref, o_ref, y1_ref, *, H, W):
    """Refs (per grid step):
      x_ref : (H+2, W+2, Cp)  halo-padded, channel-padded input
      w1_ref: (9, Cp, Pp)     conv1 taps (kh*3+kw, cin, cout), BN1 scale folded in
      b1_ref: (1, Pp)         folded BN1 bias (f32)
      w2_ref: (9, Pp, Pp)     conv2 taps, BN2 scale folded in
      b2_ref: (1, Pp)         folded BN2 bias (f32)
      o_ref : (H, W, Pp)      output (lane-dense last dim)
      y1_ref: (H+2, W+2, Pp)  VMEM scratch for the intermediate activation
    """
    Cp = x_ref.shape[-1]
    Pp = o_ref.shape[-1]

    # ---- conv1 (3x3, pad=1) with folded BN1 scale, + bias, ReLU ----
    acc = jnp.zeros((H * W, Pp), jnp.float32)
    for kh in range(3):
        for kw in range(3):
            win = x_ref[kh:kh + H, kw:kw + W, :].reshape(H * W, Cp)
            acc = acc + jnp.dot(win, w1_ref[kh * 3 + kw],
                                preferred_element_type=jnp.float32)
    y1 = jnp.maximum(acc + b1_ref[...], 0.0)

    # Stage y1 with a zero halo in VMEM only (no HBM round-trip for intermediates).
    y1_ref[...] = jnp.zeros_like(y1_ref)
    y1_ref[1:H + 1, 1:W + 1, :] = y1.reshape(H, W, Pp).astype(y1_ref.dtype)

    # ---- conv2 (3x3, pad=1) with folded BN2 scale, + bias + residual, ReLU ----
    acc2 = jnp.zeros((H * W, Pp), jnp.float32)
    for kh in range(3):
        for kw in range(3):
            win = y1_ref[kh:kh + H, kw:kw + W, :].reshape(H * W, Pp)
            acc2 = acc2 + jnp.dot(win, w2_ref[kh * 3 + kw],
                                  preferred_element_type=jnp.float32)
    res = x_ref[1:H + 1, 1:W + 1, :].reshape(H * W, Cp).astype(jnp.float32)
    out = jnp.maximum(acc2 + b2_ref[...] + res, 0.0)
    o_ref[...] = out.reshape(H, W, Pp).astype(o_ref.dtype)


# ----------------------------------------------------------------------------
# Wrapper: layout conversion, BN folding, channel/halo padding
# ----------------------------------------------------------------------------
def fold_bn(gamma, beta, mean, var, eps=1e-5):
    scale = gamma / jnp.sqrt(var + eps)
    bias = beta - mean * scale
    return scale, bias


def basic_block_forward(x_nchw, params, eps=1e-5, act_dtype=jnp.float32):
    """Pallas implementation of BasicBlock.forward (stride=1, downsample=None).

    act_dtype: activation/weight dtype fed to the MXU. float32 here (to match the
    verification tolerance); on v6e/v7x use jnp.bfloat16 to halve HBM traffic and
    hit MXU bf16 peak — accumulation stays f32 either way.
    """
    N, Cin, H, W = x_nchw.shape
    planes = params["w1"].shape[0]
    if Cin != planes:
        raise ValueError("downsample=None residual path requires inplanes == planes")
    # TODO(synk): stride>1 / downsample path not implemented (module defaults are
    #             stride=1, downsample=None).
    # TODO(synk): per-image tiles assume one (H+2, W+2, Cp) slab fits VMEM; very
    #             large images would need an additional row-tiled grid axis.

    Cp = _round_up(max(Cin, LANE), LANE)   # lane-dense channel width (>=128)
    Pp = Cp                                # Cin == planes

    s1, t1 = fold_bn(params["g1"], params["b1"], params["m1"], params["v1"], eps)
    s2, t2 = fold_bn(params["g2"], params["b2"], params["m2"], params["v2"], eps)

    def prep_w(w_oihw, scale, cin, cout):
        # OIHW -> (kh, kw, cin, cout); fold BN scale into output channels;
        # zero-pad channels to lane width; flatten the 9 taps.
        w = jnp.transpose(w_oihw, (2, 3, 1, 0)) * scale[None, None, None, :]
        w = jnp.pad(w, ((0, 0), (0, 0), (0, Cp - cin), (0, Pp - cout)))
        return w.reshape(9, Cp, Pp).astype(act_dtype)

    w1 = prep_w(params["w1"], s1, Cin, planes)
    w2 = prep_w(params["w2"], s2, planes, planes)
    b1 = jnp.pad(t1, (0, Pp - planes)).reshape(1, Pp).astype(jnp.float32)
    b2 = jnp.pad(t2, (0, Pp - planes)).reshape(1, Pp).astype(jnp.float32)

    # NCHW -> NHWC, +1 spatial halo (zeros, matches padding=1), channel pad.
    x_nhwc = jnp.transpose(x_nchw, (0, 2, 3, 1))
    x_pad = jnp.pad(x_nhwc, ((0, 0), (1, 1), (1, 1), (0, Cp - Cin))).astype(act_dtype)
    Hp, Wp = H + 2, W + 2

    kernel = functools.partial(_basic_block_kernel, H=H, W=W)
    out = pl.pallas_call(
        kernel,
        out_shape=jax.ShapeDtypeStruct((N, H, W, Pp), jnp.float32),
        grid_spec=pltpu.PrefetchScalarGridSpec(
            num_scalar_prefetch=0,
            grid=(N,),
            in_specs=[
                pl.BlockSpec((None, Hp, Wp, Cp), lambda n: (n, 0, 0, 0)),  # x (haloed)
                pl.BlockSpec((9, Cp, Pp), lambda n: (0, 0, 0)),            # w1 (invariant)
                pl.BlockSpec((1, Pp), lambda n: (0, 0)),                   # b1
                pl.BlockSpec((9, Pp, Pp), lambda n: (0, 0, 0)),            # w2 (invariant)
                pl.BlockSpec((1, Pp), lambda n: (0, 0)),                   # b2
            ],
            out_specs=pl.BlockSpec((None, H, W, Pp), lambda n: (n, 0, 0, 0)),
            scratch_shapes=[pltpu.VMEM((Hp, Wp, Pp), act_dtype)],          # y1 halo buffer
        ),
        compiler_params=pltpu.CompilerParams(
            dimension_semantics=("parallel",),
            vmem_limit_bytes=32 * 1024 * 1024,  # explicit; safe on v5e/v6e/v7x
        ),
    )(x_pad, w1, b1, w2, b2)

    out = out[..., :planes]                      # drop channel padding
    return jnp.transpose(out, (0, 3, 1, 2))      # NHWC -> NCHW


# ----------------------------------------------------------------------------
# Pure-JAX reference (lax.conv) for verification
# ----------------------------------------------------------------------------
def basic_block_reference(x_nchw, params, eps=1e-5):
    def conv(x, w):
        return jax.lax.conv_general_dilated(
            x, w, window_strides=(1, 1), padding=[(1, 1), (1, 1)],
            dimension_numbers=("NCHW", "OIHW", "NCHW"))

    def bn(x, g, b, m, v):
        s = g / jnp.sqrt(v + eps)
        return x * s.reshape(1, -1, 1, 1) + (b - m * s).reshape(1, -1, 1, 1)

    out = jnp.maximum(
        bn(conv(x_nchw, params["w1"]),
           params["g1"], params["b1"], params["m1"], params["v1"]), 0.0)
    out = bn(conv(out, params["w2"]),
             params["g2"], params["b2"], params["m2"], params["v2"])
    return jnp.maximum(out + x_nchw, 0.0)


# ----------------------------------------------------------------------------
if __name__ == "__main__":
    key = jax.random.PRNGKey(0)
    N, H, W = 2, 16, 16
    planes = 4
    inplanes = planes  # BasicBlock (expansion=1), downsample=None => inplanes == planes

    ks = jax.random.split(key, 11)
    params = {
        # conv weights in PyTorch OIHW layout (bias=False)
        "w1": 0.2 * jax.random.normal(ks[0], (planes, inplanes, 3, 3), jnp.float32),
        "w2": 0.2 * jax.random.normal(ks[1], (planes, planes, 3, 3), jnp.float32),
        # BN1 (inference-mode running stats)
        "g1": 1.0 + 0.1 * jax.random.normal(ks[2], (planes,), jnp.float32),
        "b1": 0.1 * jax.random.normal(ks[3], (planes,), jnp.float32),
        "m1": 0.1 * jax.random.normal(ks[4], (planes,), jnp.float32),
        "v1": 1.0 + 0.1 * jnp.abs(jax.random.normal(ks[5], (planes,), jnp.float32)),
        # BN2
        "g2": 1.0 + 0.1 * jax.random.normal(ks[6], (planes,), jnp.float32),
        "b2": 0.1 * jax.random.normal(ks[7], (planes,), jnp.float32),
        "m2": 0.1 * jax.random.normal(ks[8], (planes,), jnp.float32),
        "v2": 1.0 + 0.1 * jnp.abs(jax.random.normal(ks[9], (planes,), jnp.float32)),
    }
    x = jax.random.normal(ks[10], (N, inplanes, H, W), jnp.float32)

    out = jax.block_until_ready(jax.jit(basic_block_forward)(x, params))
    ref = jax.block_until_ready(basic_block_reference(x, params))

    assert out.shape == (N, planes, H, W)
    assert jnp.allclose(out, ref, rtol=1e-2, atol=1e-2), "mismatch vs reference"
    print("KERNEL_OK")
</pallas_src>

<mosaic_0001>
module attributes {stable_mosaic.version = 11 : i64} {
  func.func @_basic_block_kernel(%arg0: i32, %arg1: memref<1x18x18x128xf32, #tpu.memory_space<vmem>>, %arg2: memref<9x128x128xf32, #tpu.memory_space<vmem>>, %arg3: memref<1x128xf32, #tpu.memory_space<vmem>>, %arg4: memref<9x128x128xf32, #tpu.memory_space<vmem>>, %arg5: memref<1x128xf32, #tpu.memory_space<vmem>>, %arg6: memref<1x16x16x128xf32, #tpu.memory_space<vmem>>, %arg7: memref<18x18x128xf32, #tpu.memory_space<vmem>>) attributes {dimension_semantics = [#tpu.dimension_semantics<parallel>], iteration_bounds = array<i64: 2>, scalar_prefetch = 0 : i64, scratch_operands = 1 : i64, tpu.core_type = #tpu.core_type<tc>, window_params = [{transform_indices = @transform_0, window_bounds = array<i64: 1, 18, 18, 128>}, {pipeline_mode = #tpu.pipeline_mode<synchronous>, transform_indices = @transform_1, window_bounds = array<i64: 9, 128, 128>}, {pipeline_mode = #tpu.pipeline_mode<synchronous>, transform_indices = @transform_2, window_bounds = array<i64: 1, 128>}, {pipeline_mode = #tpu.pipeline_mode<synchronous>, transform_indices = @transform_3, window_bounds = array<i64: 9, 128, 128>}, {pipeline_mode = #tpu.pipeline_mode<synchronous>, transform_indices = @transform_4, window_bounds = array<i64: 1, 128>}, {transform_indices = @transform_5, window_bounds = array<i64: 1, 16, 16, 128>}]} {
    %cst = arith.constant 0.000000e+00 : f32
    %0 = vector.broadcast %cst : f32 to vector<256x128xf32>
    %c0 = arith.constant 0 : index
    %c0_0 = arith.constant 0 : index
    %c0_1 = arith.constant 0 : index
    %c0_2 = arith.constant 0 : index
    %1 = vector.load %arg1[%c0, %c0_0, %c0_1, %c0_2] : memref<1x18x18x128xf32, #tpu.memory_space<vmem>>, vector<1x16x16x128xf32>
    %2 = vector.shape_cast %1 : vector<1x16x16x128xf32> to vector<16x16x128xf32>
    %3 = vector.shape_cast %2 : vector<16x16x128xf32> to vector<256x128xf32>
    %c0_3 = arith.constant 0 : index
    %c0_4 = arith.constant 0 : index
    %c0_5 = arith.constant 0 : index
    %4 = vector.load %arg2[%c0_3, %c0_4, %c0_5] : memref<9x128x128xf32, #tpu.memory_space<vmem>>, vector<1x128x128xf32>
    %5 = vector.shape_cast %4 : vector<1x128x128xf32> to vector<128x128xf32>
    %cst_6 = arith.constant dense<0.000000e+00> : vector<256x128xf32>
    %6 = tpu.matmul %3, %5, %cst_6 {dimension_numbers = #tpu.dot_dimension_numbers<[1], [0], [0], [1], [0, 0, 1, 1], [], []>} : vector<256x128xf32>, vector<128x128xf32>, vector<256x128xf32> -> vector<256x128xf32>
    %7 = arith.addf %0, %6 : vector<256x128xf32>
    %c0_7 = arith.constant 0 : index
    %c0_8 = arith.constant 0 : index
    %c1 = arith.constant 1 : index
    %c0_9 = arith.constant 0 : index
    %8 = vector.load %arg1[%c0_7, %c0_8, %c1, %c0_9] : memref<1x18x18x128xf32, #tpu.memory_space<vmem>>, vector<1x16x16x128xf32>
    %9 = vector.shape_cast %8 : vector<1x16x16x128xf32> to vector<16x16x128xf32>
    %10 = vector.shape_cast %9 : vector<16x16x128xf32> to vector<256x128xf32>
    %c1_10 = arith.constant 1 : index
    %c0_11 = arith.constant 0 : index
    %c0_12 = arith.constant 0 : index
    %11 = vector.load %arg2[%c1_10, %c0_11, %c0_12] : memref<9x128x128xf32, #tpu.memory_space<vmem>>, vector<1x128x128xf32>
    %12 = vector.shape_cast %11 : vector<1x128x128xf32> to vector<128x128xf32>
    %cst_13 = arith.constant dense<0.000000e+00> : vector<256x128xf32>
    %13 = tpu.matmul %10, %12, %cst_13 {dimension_numbers = #tpu.dot_dimension_numbers<[1], [0], [0], [1], [0, 0, 1, 1], [], []>} : vector<256x128xf32>, vector<128x128xf32>, vector<256x128xf32> -> vector<256x128xf32>
    %14 = arith.addf %7, %13 : vector<256x128xf32>
    %c0_14 = arith.constant 0 : index
    %c0_15 = arith.constant 0 : index
    %c2 = arith.constant 2 : index
    %c0_16 = arith.constant 0 : index
    %15 = vector.load %arg1[%c0_14, %c0_15, %c2, %c0_16] : memref<1x18x18x128xf32, #tpu.memory_space<vmem>>, vector<1x16x16x128xf32>
    %16 = vector.shape_cast %15 : vector<1x16x16x128xf32> to vector<16x16x128xf32>
    %17 = vector.shape_cast %16 : vector<16x16x128xf32> to vector<256x128xf32>
    %c2_17 = arith.constant 2 : index
    %c0_18 = arith.constant 0 : index
    %c0_19 = arith.constant 0 : index
    %18 = vector.load %arg2[%c2_17, %c0_18, %c0_19] : memref<9x128x128xf32, #tpu.memory_space<vmem>>, vector<1x128x128xf32>
    %19 = vector.shape_cast %18 : vector<1x128x128xf32> to vector<128x128xf32>
    %cst_20 = arith.constant dense<0.000000e+00> : vector<256x128xf32>
    %20 = tpu.matmul %17, %19, %cst_20 {dimension_numbers = #tpu.dot_dimension_numbers<[1], [0], [0], [1], [0, 0, 1, 1], [], []>} : vector<256x128xf32>, vector<128x128xf32>, vector<256x128xf32> -> vector<256x128xf32>
    %21 = arith.addf %14, %20 : vector<256x128xf32>
    %c0_21 = arith.constant 0 : index
    %c1_22 = arith.constant 1 : index
    %c0_23 = arith.constant 0 : index
    %c0_24 = arith.constant 0 : index
    %22 = vector.load %arg1[%c0_21, %c1_22, %c0_23, %c0_24] : memref<1x18x18x128xf32, #tpu.memory_space<vmem>>, vector<1x16x16x128xf32>
    %23 = vector.shape_cast %22 : vector<1x16x16x128xf32> to vector<16x16x128xf32>
    %24 = vector.shape_cast %23 : vector<16x16x128xf32> to vector<256x128xf32>
    %c3 = arith.constant 3 : index
    %c0_25 = arith.constant 0 : index
    %c0_26 = arith.constant 0 : index
    %25 = vector.load %arg2[%c3, %c0_25, %c0_26] : memref<9x128x128xf32, #tpu.memory_space<vmem>>, vector<1x128x128xf32>
    %26 = vector.shape_cast %25 : vector<1x128x128xf32> to vector<128x128xf32>
    %cst_27 = arith.constant dense<0.000000e+00> : vector<256x128xf32>
    %27 = tpu.matmul %24, %26, %cst_27 {dimension_numbers = #tpu.dot_dimension_numbers<[1], [0], [0], [1], [0, 0, 1, 1], [], []>} : vector<256x128xf32>, vector<128x128xf32>, vector<256x128xf32> -> vector<256x128xf32>
    %28 = arith.addf %21, %27 : vector<256x128xf32>
    %c0_28 = arith.constant 0 : index
    %c1_29 = arith.constant 1 : index
    %c1_30 = arith.constant 1 : index
    %c0_31 = arith.constant 0 : index
    %29 = vector.load %arg1[%c0_28, %c1_29, %c1_30, %c0_31] : memref<1x18x18x128xf32, #tpu.memory_space<vmem>>, vector<1x16x16x128xf32>
    %30 = vector.shape_cast %29 : vector<1x16x16x128xf32> to vector<16x16x128xf32>
    %31 = vector.shape_cast %30 : vector<16x16x128xf32> to vector<256x128xf32>
    %c4 = arith.constant 4 : index
    %c0_32 = arith.constant 0 : index
    %c0_33 = arith.constant 0 : index
    %32 = vector.load %arg2[%c4, %c0_32, %c0_33] : memref<9x128x128xf32, #tpu.memory_space<vmem>>, vector<1x128x128xf32>
    %33 = vector.shape_cast %32 : vector<1x128x128xf32> to vector<128x128xf32>
    %cst_34 = arith.constant dense<0.000000e+00> : vector<256x128xf32>
    %34 = tpu.matmul %31, %33, %cst_34 {dimension_numbers = #tpu.dot_dimension_numbers<[1], [0], [0], [1], [0, 0, 1, 1], [], []>} : vector<256x128xf32>, vector<128x128xf32>, vector<256x128xf32> -> vector<256x128xf32>
    %35 = arith.addf %28, %34 : vector<256x128xf32>
    %c0_35 = arith.constant 0 : index
    %c1_36 = arith.constant 1 : index
    %c2_37 = arith.constant 2 : index
    %c0_38 = arith.constant 0 : index
    %36 = vector.load %arg1[%c0_35, %c1_36, %c2_37, %c0_38] : memref<1x18x18x128xf32, #tpu.memory_space<vmem>>, vector<1x16x16x128xf32>
    %37 = vector.shape_cast %36 : vector<1x16x16x128xf32> to vector<16x16x128xf32>
    %38 = vector.shape_cast %37 : vector<16x16x128xf32> to vector<256x128xf32>
    %c5 = arith.constant 5 : index
    %c0_39 = arith.constant 0 : index
    %c0_40 = arith.constant 0 : index
    %39 = vector.load %arg2[%c5, %c0_39, %c0_40] : memref<9x128x128xf32, #tpu.memory_space<vmem>>, vector<1x128x128xf32>
    %40 = vector.shape_cast %39 : vector<1x128x128xf32> to vector<128x128xf32>
    %cst_41 = arith.constant dense<0.000000e+00> : vector<256x128xf32>
    %41 = tpu.matmul %38, %40, %cst_41 {dimension_numbers = #tpu.dot_dimension_numbers<[1], [0], [0], [1], [0, 0, 1, 1], [], []>} : vector<256x128xf32>, vector<128x128xf32>, vector<256x128xf32> -> vector<256x128xf32>
    %42 = arith.addf %35, %41 : vector<256x128xf32>
    %c0_42 = arith.constant 0 : index
    %c2_43 = arith.constant 2 : index
    %c0_44 = arith.constant 0 : index
    %c0_45 = arith.constant 0 : index
    %43 = vector.load %arg1[%c0_42, %c2_43, %c0_44, %c0_45] : memref<1x18x18x128xf32, #tpu.memory_space<vmem>>, vector<1x16x16x128xf32>
    %44 = vector.shape_cast %43 : vector<1x16x16x128xf32> to vector<16x16x128xf32>
    %45 = vector.shape_cast %44 : vector<16x16x128xf32> to vector<256x128xf32>
    %c6 = arith.constant 6 : index
    %c0_46 = arith.constant 0 : index
    %c0_47 = arith.constant 0 : index
    %46 = vector.load %arg2[%c6, %c0_46, %c0_47] : memref<9x128x128xf32, #tpu.memory_space<vmem>>, vector<1x128x128xf32>
    %47 = vector.shape_cast %46 : vector<1x128x128xf32> to vector<128x128xf32>
    %cst_48 = arith.constant dense<0.000000e+00> : vector<256x128xf32>
    %48 = tpu.matmul %45, %47, %cst_48 {dimension_numbers = #tpu.dot_dimension_numbers<[1], [0], [0], [1], [0, 0, 1, 1], [], []>} : vector<256x128xf32>, vector<128x128xf32>, vector<256x128xf32> -> vector<256x128xf32>
    %49 = arith.addf %42, %48 : vector<256x128xf32>
    %c0_49 = arith.constant 0 : index
    %c2_50 = arith.constant 2 : index
    %c1_51 = arith.constant 1 : index
    %c0_52 = arith.constant 0 : index
    %50 = vector.load %arg1[%c0_49, %c2_50, %c1_51, %c0_52] : memref<1x18x18x128xf32, #tpu.memory_space<vmem>>, vector<1x16x16x128xf32>
    %51 = vector.shape_cast %50 : vector<1x16x16x128xf32> to vector<16x16x128xf32>
    %52 = vector.shape_cast %51 : vector<16x16x128xf32> to vector<256x128xf32>
    %c7 = arith.constant 7 : index
    %c0_53 = arith.constant 0 : index
    %c0_54 = arith.constant 0 : index
    %53 = vector.load %arg2[%c7, %c0_53, %c0_54] : memref<9x128x128xf32, #tpu.memory_space<vmem>>, vector<1x128x128xf32>
    %54 = vector.shape_cast %53 : vector<1x128x128xf32> to vector<128x128xf32>
    %cst_55 = arith.constant dense<0.000000e+00> : vector<256x128xf32>
    %55 = tpu.matmul %52, %54, %cst_55 {dimension_numbers = #tpu.dot_dimension_numbers<[1], [0], [0], [1], [0, 0, 1, 1], [], []>} : vector<256x128xf32>, vector<128x128xf32>, vector<256x128xf32> -> vector<256x128xf32>
    %56 = arith.addf %49, %55 : vector<256x128xf32>
    %c0_56 = arith.constant 0 : index
    %c2_57 = arith.constant 2 : index
    %c2_58 = arith.constant 2 : index
    %c0_59 = arith.constant 0 : index
    %57 = vector.load %arg1[%c0_56, %c2_57, %c2_58, %c0_59] : memref<1x18x18x128xf32, #tpu.memory_space<vmem>>, vector<1x16x16x128xf32>
    %58 = vector.shape_cast %57 : vector<1x16x16x128xf32> to vector<16x16x128xf32>
    %59 = vector.shape_cast %58 : vector<16x16x128xf32> to vector<256x128xf32>
    %c8 = arith.constant 8 : index
    %c0_60 = arith.constant 0 : index
    %c0_61 = arith.constant 0 : index
    %60 = vector.load %arg2[%c8, %c0_60, %c0_61] : memref<9x128x128xf32, #tpu.memory_space<vmem>>, vector<1x128x128xf32>
    %61 = vector.shape_cast %60 : vector<1x128x128xf32> to vector<128x128xf32>
    %cst_62 = arith.constant dense<0.000000e+00> : vector<256x128xf32>
    %62 = tpu.matmul %59, %61, %cst_62 {dimension_numbers = #tpu.dot_dimension_numbers<[1], [0], [0], [1], [0, 0, 1, 1], [], []>} : vector<256x128xf32>, vector<128x128xf32>, vector<256x128xf32> -> vector<256x128xf32>
    %63 = arith.addf %56, %62 : vector<256x128xf32>
    %c0_63 = arith.constant 0 : index
    %c0_64 = arith.constant 0 : index
    %64 = vector.load %arg3[%c0_63, %c0_64] : memref<1x128xf32, #tpu.memory_space<vmem>>, vector<1x128xf32>
    %65 = vector.broadcast %64 : vector<1x128xf32> to vector<256x128xf32>
    %66 = arith.addf %63, %65 : vector<256x128xf32>
    %cst_65 = arith.constant 0.000000e+00 : f32
    %67 = vector.broadcast %cst_65 : f32 to vector<256x128xf32>
    %68 = arith.maximumf %66, %67 : vector<256x128xf32>
    %cst_66 = arith.constant 0.000000e+00 : f32
    %69 = vector.broadcast %cst_66 : f32 to vector<18x18x128xf32>
    %c0_67 = arith.constant 0 : index
    %c0_68 = arith.constant 0 : index
    %c0_69 = arith.constant 0 : index
    %70 = vector.load %arg7[%c0_67, %c0_68, %c0_69] : memref<18x18x128xf32, #tpu.memory_space<vmem>>, vector<18x18x128xf32>
    tpu.vector_store %arg7[%c0_67, %c0_68, %c0_69], %69 {strides = array<i32>} : memref<18x18x128xf32, #tpu.memory_space<vmem>>, vector<18x18x128xf32>,
    %71 = vector.shape_cast %68 : vector<256x128xf32> to vector<16x16x128xf32>
    %c1_70 = arith.constant 1 : index
    %c1_71 = arith.constant 1 : index
    %c0_72 = arith.constant 0 : index
    %72 = vector.load %arg7[%c1_70, %c1_71, %c0_72] : memref<18x18x128xf32, #tpu.memory_space<vmem>>, vector<16x16x128xf32>
    tpu.vector_store %arg7[%c1_70, %c1_71, %c0_72], %71 {strides = array<i32>} : memref<18x18x128xf32, #tpu.memory_space<vmem>>, vector<16x16x128xf32>,
    %cst_73 = arith.constant 0.000000e+00 : f32
    %73 = vector.broadcast %cst_73 : f32 to vector<256x128xf32>
    %c0_74 = arith.constant 0 : index
    %c0_75 = arith.constant 0 : index
    %c0_76 = arith.constant 0 : index
    %74 = vector.load %arg7[%c0_74, %c0_75, %c0_76] : memref<18x18x128xf32, #tpu.memory_space<vmem>>, vector<16x16x128xf32>
    %75 = vector.shape_cast %74 : vector<16x16x128xf32> to vector<256x128xf32>
    %c0_77 = arith.constant 0 : index
    %c0_78 = arith.constant 0 : index
    %c0_79 = arith.constant 0 : index
    %76 = vector.load %arg4[%c0_77, %c0_78, %c0_79] : memref<9x128x128xf32, #tpu.memory_space<vmem>>, vector<1x128x128xf32>
    %77 = vector.shape_cast %76 : vector<1x128x128xf32> to vector<128x128xf32>
    %cst_80 = arith.constant dense<0.000000e+00> : vector<256x128xf32>
    %78 = tpu.matmul %75, %77, %cst_80 {dimension_numbers = #tpu.dot_dimension_numbers<[1], [0], [0], [1], [0, 0, 1, 1], [], []>} : vector<256x128xf32>, vector<128x128xf32>, vector<256x128xf32> -> vector<256x128xf32>
    %79 = arith.addf %73, %78 : vector<256x128xf32>
    %c0_81 = arith.constant 0 : index
    %c1_82 = arith.constant 1 : index
    %c0_83 = arith.constant 0 : index
    %80 = vector.load %arg7[%c0_81, %c1_82, %c0_83] : memref<18x18x128xf32, #tpu.memory_space<vmem>>, vector<16x16x128xf32>
    %81 = vector.shape_cast %80 : vector<16x16x128xf32> to vector<256x128xf32>
    %c1_84 = arith.constant 1 : index
    %c0_85 = arith.constant 0 : index
    %c0_86 = arith.constant 0 : index
    %82 = vector.load %arg4[%c1_84, %c0_85, %c0_86] : memref<9x128x128xf32, #tpu.memory_space<vmem>>, vector<1x128x128xf32>
    %83 = vector.shape_cast %82 : vector<1x128x128xf32> to vector<128x128xf32>
    %cst_87 = arith.constant dense<0.000000e+00> : vector<256x128xf32>
    %84 = tpu.matmul %81, %83, %cst_87 {dimension_numbers = #tpu.dot_dimension_numbers<[1], [0], [0], [1], [0, 0, 1, 1], [], []>} : vector<256x128xf32>, vector<128x128xf32>, vector<256x128xf32> -> vector<256x128xf32>
    %85 = arith.addf %79, %84 : vector<256x128xf32>
    %c0_88 = arith.constant 0 : index
    %c2_89 = arith.constant 2 : index
    %c0_90 = arith.constant 0 : index
    %86 = vector.load %arg7[%c0_88, %c2_89, %c0_90] : memref<18x18x128xf32, #tpu.memory_space<vmem>>, vector<16x16x128xf32>
    %87 = vector.shape_cast %86 : vector<16x16x128xf32> to vector<256x128xf32>
    %c2_91 = arith.constant 2 : index
    %c0_92 = arith.constant 0 : index
    %c0_93 = arith.constant 0 : index
    %88 = vector.load %arg4[%c2_91, %c0_92, %c0_93] : memref<9x128x128xf32, #tpu.memory_space<vmem>>, vector<1x128x128xf32>
    %89 = vector.shape_cast %88 : vector<1x128x128xf32> to vector<128x128xf32>
    %cst_94 = arith.constant dense<0.000000e+00> : vector<256x128xf32>
    %90 = tpu.matmul %87, %89, %cst_94 {dimension_numbers = #tpu.dot_dimension_numbers<[1], [0], [0], [1], [0, 0, 1, 1], [], []>} : vector<256x128xf32>, vector<128x128xf32>, vector<256x128xf32> -> vector<256x128xf32>
    %91 = arith.addf %85, %90 : vector<256x128xf32>
    %c1_95 = arith.constant 1 : index
    %c0_96 = arith.constant 0 : index
    %c0_97 = arith.constant 0 : index
    %92 = vector.load %arg7[%c1_95, %c0_96, %c0_97] : memref<18x18x128xf32, #tpu.memory_space<vmem>>, vector<16x16x128xf32>
    %93 = vector.shape_cast %92 : vector<16x16x128xf32> to vector<256x128xf32>
    %c3_98 = arith.constant 3 : index
    %c0_99 = arith.constant 0 : index
    %c0_100 = arith.constant 0 : index
    %94 = vector.load %arg4[%c3_98, %c0_99, %c0_100] : memref<9x128x128xf32, #tpu.memory_space<vmem>>, vector<1x128x128xf32>
    %95 = vector.shape_cast %94 : vector<1x128x128xf32> to vector<128x128xf32>
    %cst_101 = arith.constant dense<0.000000e+00> : vector<256x128xf32>
    %96 = tpu.matmul %93, %95, %cst_101 {dimension_numbers = #tpu.dot_dimension_numbers<[1], [0], [0], [1], [0, 0, 1, 1], [], []>} : vector<256x128xf32>, vector<128x128xf32>, vector<256x128xf32> -> vector<256x128xf32>
    %97 = arith.addf %91, %96 : vector<256x128xf32>
    %c1_102 = arith.constant 1 : index
    %c1_103 = arith.constant 1 : index
    %c0_104 = arith.constant 0 : index
    %98 = vector.load %arg7[%c1_102, %c1_103, %c0_104] : memref<18x18x128xf32, #tpu.memory_space<vmem>>, vector<16x16x128xf32>
    %99 = vector.shape_cast %98 : vector<16x16x128xf32> to vector<256x128xf32>
    %c4_105 = arith.constant 4 : index
    %c0_106 = arith.constant 0 : index
    %c0_107 = arith.constant 0 : index
    %100 = vector.load %arg4[%c4_105, %c0_106, %c0_107] : memref<9x128x128xf32, #tpu.memory_space<vmem>>, vector<1x128x128xf32>
    %101 = vector.shape_cast %100 : vector<1x128x128xf32> to vector<128x128xf32>
    %cst_108 = arith.constant dense<0.000000e+00> : vector<256x128xf32>
    %102 = tpu.matmul %99, %101, %cst_108 {dimension_numbers = #tpu.dot_dimension_numbers<[1], [0], [0], [1], [0, 0, 1, 1], [], []>} : vector<256x128xf32>, vector<128x128xf32>, vector<256x128xf32> -> vector<256x128xf32>
    %103 = arith.addf %97, %102 : vector<256x128xf32>
    %c1_109 = arith.constant 1 : index
    %c2_110 = arith.constant 2 : index
    %c0_111 = arith.constant 0 : index
    %104 = vector.load %arg7[%c1_109, %c2_110, %c0_111] : memref<18x18x128xf32, #tpu.memory_space<vmem>>, vector<16x16x128xf32>
    %105 = vector.shape_cast %104 : vector<16x16x128xf32> to vector<256x128xf32>
    %c5_112 = arith.constant 5 : index
    %c0_113 = arith.constant 0 : index
    %c0_114 = arith.constant 0 : index
    %106 = vector.load %arg4[%c5_112, %c0_113, %c0_114] : memref<9x128x128xf32, #tpu.memory_space<vmem>>, vector<1x128x128xf32>
    %107 = vector.shape_cast %106 : vector<1x128x128xf32> to vector<128x128xf32>
    %cst_115 = arith.constant dense<0.000000e+00> : vector<256x128xf32>
    %108 = tpu.matmul %105, %107, %cst_115 {dimension_numbers = #tpu.dot_dimension_numbers<[1], [0], [0], [1], [0, 0, 1, 1], [], []>} : vector<256x128xf32>, vector<128x128xf32>, vector<256x128xf32> -> vector<256x128xf32>
    %109 = arith.addf %103, %108 : vector<256x128xf32>
    %c2_116 = arith.constant 2 : index
    %c0_117 = arith.constant 0 : index
    %c0_118 = arith.constant 0 : index
    %110 = vector.load %arg7[%c2_116, %c0_117, %c0_118] : memref<18x18x128xf32, #tpu.memory_space<vmem>>, vector<16x16x128xf32>
    %111 = vector.shape_cast %110 : vector<16x16x128xf32> to vector<256x128xf32>
    %c6_119 = arith.constant 6 : index
    %c0_120 = arith.constant 0 : index
    %c0_121 = arith.constant 0 : index
    %112 = vector.load %arg4[%c6_119, %c0_120, %c0_121] : memref<9x128x128xf32, #tpu.memory_space<vmem>>, vector<1x128x128xf32>
    %113 = vector.shape_cast %112 : vector<1x128x128xf32> to vector<128x128xf32>
    %cst_122 = arith.constant dense<0.000000e+00> : vector<256x128xf32>
    %114 = tpu.matmul %111, %113, %cst_122 {dimension_numbers = #tpu.dot_dimension_numbers<[1], [0], [0], [1], [0, 0, 1, 1], [], []>} : vector<256x128xf32>, vector<128x128xf32>, vector<256x128xf32> -> vector<256x128xf32>
    %115 = arith.addf %109, %114 : vector<256x128xf32>
    %c2_123 = arith.constant 2 : index
    %c1_124 = arith.constant 1 : index
    %c0_125 = arith.constant 0 : index
    %116 = vector.load %arg7[%c2_123, %c1_124, %c0_125] : memref<18x18x128xf32, #tpu.memory_space<vmem>>, vector<16x16x128xf32>
    %117 = vector.shape_cast %116 : vector<16x16x128xf32> to vector<256x128xf32>
    %c7_126 = arith.constant 7 : index
    %c0_127 = arith.constant 0 : index
    %c0_128 = arith.constant 0 : index
    %118 = vector.load %arg4[%c7_126, %c0_127, %c0_128] : memref<9x128x128xf32, #tpu.memory_space<vmem>>, vector<1x128x128xf32>
    %119 = vector.shape_cast %118 : vector<1x128x128xf32> to vector<128x128xf32>
    %cst_129 = arith.constant dense<0.000000e+00> : vector<256x128xf32>
    %120 = tpu.matmul %117, %119, %cst_129 {dimension_numbers = #tpu.dot_dimension_numbers<[1], [0], [0], [1], [0, 0, 1, 1], [], []>} : vector<256x128xf32>, vector<128x128xf32>, vector<256x128xf32> -> vector<256x128xf32>
    %121 = arith.addf %115, %120 : vector<256x128xf32>
    %c2_130 = arith.constant 2 : index
    %c2_131 = arith.constant 2 : index
    %c0_132 = arith.constant 0 : index
    %122 = vector.load %arg7[%c2_130, %c2_131, %c0_132] : memref<18x18x128xf32, #tpu.memory_space<vmem>>, vector<16x16x128xf32>
    %123 = vector.shape_cast %122 : vector<16x16x128xf32> to vector<256x128xf32>
    %c8_133 = arith.constant 8 : index
    %c0_134 = arith.constant 0 : index
    %c0_135 = arith.constant 0 : index
    %124 = vector.load %arg4[%c8_133, %c0_134, %c0_135] : memref<9x128x128xf32, #tpu.memory_space<vmem>>, vector<1x128x128xf32>
    %125 = vector.shape_cast %124 : vector<1x128x128xf32> to vector<128x128xf32>
    %cst_136 = arith.constant dense<0.000000e+00> : vector<256x128xf32>
    %126 = tpu.matmul %123, %125, %cst_136 {dimension_numbers = #tpu.dot_dimension_numbers<[1], [0], [0], [1], [0, 0, 1, 1], [], []>} : vector<256x128xf32>, vector<128x128xf32>, vector<256x128xf32> -> vector<256x128xf32>
    %127 = arith.addf %121, %126 : vector<256x128xf32>
    %c0_137 = arith.constant 0 : index
    %c1_138 = arith.constant 1 : index
    %c1_139 = arith.constant 1 : index
    %c0_140 = arith.constant 0 : index
    %128 = vector.load %arg1[%c0_137, %c1_138, %c1_139, %c0_140] : memref<1x18x18x128xf32, #tpu.memory_space<vmem>>, vector<1x16x16x128xf32>
    %129 = vector.shape_cast %128 : vector<1x16x16x128xf32> to vector<16x16x128xf32>
    %130 = vector.shape_cast %129 : vector<16x16x128xf32> to vector<256x128xf32>
    %c0_141 = arith.constant 0 : index
    %c0_142 = arith.constant 0 : index
    %131 = vector.load %arg5[%c0_141, %c0_142] : memref<1x128xf32, #tpu.memory_space<vmem>>, vector<1x128xf32>
    %132 = vector.broadcast %131 : vector<1x128xf32> to vector<256x128xf32>
    %133 = arith.addf %127, %132 : vector<256x128xf32>
    %134 = arith.addf %133, %130 : vector<256x128xf32>
    %cst_143 = arith.constant 0.000000e+00 : f32
    %135 = vector.broadcast %cst_143 : f32 to vector<256x128xf32>
    %136 = arith.maximumf %134, %135 : vector<256x128xf32>
    %137 = vector.shape_cast %136 : vector<256x128xf32> to vector<16x16x128xf32>
    %c0_144 = arith.constant 0 : index
    %c0_145 = arith.constant 0 : index
    %c0_146 = arith.constant 0 : index
    %c0_147 = arith.constant 0 : index
    %138 = vector.load %arg6[%c0_144, %c0_145, %c0_146, %c0_147] : memref<1x16x16x128xf32, #tpu.memory_space<vmem>>, vector<1x16x16x128xf32>
    %139 = vector.shape_cast %138 : vector<1x16x16x128xf32> to vector<16x16x128xf32>
    %140 = vector.shape_cast %137 : vector<16x16x128xf32> to vector<1x16x16x128xf32>
    tpu.vector_store %arg6[%c0_144, %c0_145, %c0_146, %c0_147], %140 {strides = array<i32>} : memref<1x16x16x128xf32, #tpu.memory_space<vmem>>, vector<1x16x16x128xf32>,
    return
  }
  func.func @transform_0(%arg0: i32) -> (i32, i32, i32, i32) {
    %c0_i32 = arith.constant 0 : i32
    %c0_i32_0 = arith.constant 0 : i32
    %c0_i32_1 = arith.constant 0 : i32
    %c0_i32_2 = arith.constant 0 : i32
    return %arg0, %c0_i32, %c0_i32_0, %c0_i32_1 : i32, i32, i32, i32
  }
  func.func @transform_1(%arg0: i32) -> (i32, i32, i32) {
    %c0_i32 = arith.constant 0 : i32
    %c0_i32_0 = arith.constant 0 : i32
    %c0_i32_1 = arith.constant 0 : i32
    %c0_i32_2 = arith.constant 0 : i32
    return %c0_i32, %c0_i32_0, %c0_i32_1 : i32, i32, i32
  }
  func.func @transform_2(%arg0: i32) -> (i32, i32) {
    %c0_i32 = arith.constant 0 : i32
    %c0_i32_0 = arith.constant 0 : i32
    %c0_i32_1 = arith.constant 0 : i32
    return %c0_i32, %c0_i32_0 : i32, i32
  }
  func.func @transform_3(%arg0: i32) -> (i32, i32, i32) {
    %c0_i32 = arith.constant 0 : i32
    %c0_i32_0 = arith.constant 0 : i32
    %c0_i32_1 = arith.constant 0 : i32
    %c0_i32_2 = arith.constant 0 : i32
    return %c0_i32, %c0_i32_0, %c0_i32_1 : i32, i32, i32
  }
  func.func @transform_4(%arg0: i32) -> (i32, i32) {
    %c0_i32 = arith.constant 0 : i32
    %c0_i32_0 = arith.constant 0 : i32
    %c0_i32_1 = arith.constant 0 : i32
    return %c0_i32, %c0_i32_0 : i32, i32
  }
  func.func @transform_5(%arg0: i32) -> (i32, i32, i32, i32) {
    %c0_i32 = arith.constant 0 : i32
    %c0_i32_0 = arith.constant 0 : i32
    %c0_i32_1 = arith.constant 0 : i32
    %c0_i32_2 = arith.constant 0 : i32
    return %arg0, %c0_i32, %c0_i32_0, %c0_i32_1 : i32, i32, i32, i32
  }
}

</mosaic_0001>

<bundles_post_ra>
// kernel: basic_block_forward.1
= control target key start
LH: loop header
LB: loop body
LE: loop exit
PB: predicated region body
PF: predicated region fallthrough
CT: control target
= control target key end

     0   :  { %s8833_s18 = smov 0   ;;  %s12107_s0 = inlined_call_operand.vmem [shape: f32[2,18,18,128], index: 0, kind: input, shape index: {}]   ;;  %s12108_s1 = inlined_call_operand.vmem [shape: f32[9,128,128], index: 1, kind: input, shape index: {}]   ;;  %s12109_s2 = inlined_call_operand.vmem [shape: f32[1,128], index: 2, kind: input, shape index: {}]   ;;  %s12110_s3 = inlined_call_operand.vmem [shape: f32[9,128,128], index: 3, kind: input, shape index: {}]   ;;  %s12111_s4 = inlined_call_operand.vmem [shape: f32[1,128], index: 4, kind: input, shape index: {}]   ;;  %s12112_s5 = inlined_call_operand.vmem [shape: f32[2,16,16,128], index: 5, kind: output, shape index: {}]  }
   0x1 LB: > { %s5986_s19 = sadd.s32 4294967295, %s8800_s18   ;;  %p5990_p0 = scmp.ge.s32.totalorder %s8800_s18, 1  ;;  %s8800_s18 = sphi %s8833_s18, %s15_s18  }
   0x2   : > { %p187_p1 = scmp.lt.s32.totalorder %s8800_s18, 3 }
   0x4   : > { %p188_p2 = pnand %p5990_p0, %p187_p1 }
   0x6   : > { %191 = sbr.rel (%p188_p2) target bundleno = 1044 (0x414), region = 40 }
   0xb   : > { %v6009_v0 = vld [vmem:[%s12108_s1 + $0xf8] sm:$0xff]  ;;  %v6008_v2 = vld [vmem:[%s12108_s1 + $0xf0] sm:$0xff]  ;;  %v6007_v4 = vld [vmem:[%s12108_s1 + $0xe8] sm:$0xff]  ;;  %p215_p3 = scmp.lt.s32.totalorder %s5986_s19, 1 }
   0xc   : > { %v272_v1 = vld [vmem:[%s12108_s1 + $0x78] sm:$0xff]  ;;  %7343 = vmatprep.subr.mxu0 %v6009_v0  ;;  %v271_v3 = vld [vmem:[%s12108_s1 + $0x70] sm:$0xff]  ;;  %v270_v5 = vld [vmem:[%s12108_s1 + $0x68] sm:$0xff] }
   0xd   : > { %7423 = vmatprep.subr.mxu1 %v272_v1  ;;  %7344 = vmatpush3.msra.mxu0 %v6009_v0  ;;  %v6006_v6 = vld [vmem:[%s12108_s1 + $0xe0] sm:$0xff]  ;;  %v6005_v8 = vld [vmem:[%s12108_s1 + $0xd8] sm:$0xff]  ;;  %v6004_v10 = vld [vmem:[%s12108_s1 + $0xd0] sm:$0xff]  ;;  %s12442_s19 = smov (!%p215_p3, %s5986_s19), 1 }
   0xe   : > { %7424 = vmatpush3.msra.mxu1 %v272_v1  ;;  %7345 = vmatprep.subr.mxu0 %v6008_v2  ;;  %v269_v7 = vld [vmem:[%s12108_s1 + $0x60] sm:$0xff]  ;;  %v268_v9 = vld [vmem:[%s12108_s1 + $0x58] sm:$0xff]  ;;  %v267_v11 = vld [vmem:[%s12108_s1 + $0x50] sm:$0xff]  ;;  %s8783_s26 = smul.u32 432, %s12442_s19  ;;  %s6478_s29 = sshll.u32 %s12442_s19, 8 }
   0xf   : > { %7425 = vmatprep.subr.mxu1 %v271_v3  ;;  %7346 = vmatpush3.msra.mxu0 %v6008_v2  ;;  %v6003_v12 = vld [vmem:[%s12108_s1 + $0xc8] sm:$0xff]  ;;  %v6002_v14 = vld [vmem:[%s12108_s1 + $0xc0] sm:$0xff]  ;;  %v6001_v16 = vld [vmem:[%s12108_s1 + $0xb8] sm:$0xff]  ;;  %s11896_s6 = scalar_lea.vmem %s12112_s5, %s6478_s29 }
  0x10   : > { %7426 = vmatpush3.msra.mxu1 %v271_v3  ;;  %7347 = vmatprep.subr.mxu0 %v6007_v4  ;;  %v266_v13 = vld [vmem:[%s12108_s1 + $0x48] sm:$0xff]  ;;  %v265_v15 = vld [vmem:[%s12108_s1 + $0x40] sm:$0xff]  ;;  %v264_v17 = vld [vmem:[%s12108_s1 + $0x38] sm:$0xff]  ;;  %s8941_s12 = scalar_lea.vmem %s12107_s0, %s8783_s26 }
  0x11   : > { %7427 = vmatprep.subr.mxu1 %v270_v5  ;;  %7348 = vmatpush3.msra.mxu0 %v6007_v4  ;;  %v6000_v18 = vld [vmem:[%s12108_s1 + $0xb0] sm:$0xff]  ;;  %v5999_v20 = vld [vmem:[%s12108_s1 + $0xa8] sm:$0xff]  ;;  %v5998_v22 = vld [vmem:[%s12108_s1 + $0xa0] sm:$0xff] }
  0x12   : > { %7428 = vmatpush3.msra.mxu1 %v270_v5  ;;  %7349 = vmatprep.subr.mxu0 %v6006_v6  ;;  %v263_v19 = vld [vmem:[%s12108_s1 + $0x30] sm:$0xff]  ;;  %v262_v21 = vld [vmem:[%s12108_s1 + $0x28] sm:$0xff]  ;;  %v261_v23 = vld [vmem:[%s12108_s1 + $0x20] sm:$0xff] }
  0x13   : > { %7429 = vmatprep.subr.mxu1 %v269_v7  ;;  %7350 = vmatpush3.msra.mxu0 %v6006_v6  ;;  %v5997_v24 = vld [vmem:[%s12108_s1 + $0x98] sm:$0xff]  ;;  %v5996_v26 = vld [vmem:[%s12108_s1 + $0x90] sm:$0xff]  ;;  %v5995_v28 = vld [vmem:[%s12108_s1 + $0x88] sm:$0xff] }
  0x14   : > { %7430 = vmatpush3.msra.mxu1 %v269_v7  ;;  %7351 = vmatprep.subr.mxu0 %v6005_v8  ;;  %v260_v25 = vld [vmem:[%s12108_s1 + $0x18] sm:$0xff]  ;;  %v259_v27 = vld [vmem:[%s12108_s1 + $0x10] sm:$0xff]  ;;  %v258_v29 = vld [vmem:[%s12108_s1 + $0x8] sm:$0xff] }
  0x15   : > { %7431 = vmatprep.subr.mxu1 %v268_v9  ;;  %7352 = vmatpush3.msra.mxu0 %v6005_v8  ;;  %v5994_v30 = vld [vmem:[%s12108_s1 + $0x80] sm:$0xff]  ;;  %v274_v34 = vld [vmem:[%s8941_s12 + $0x9] sm:$0xff]  ;;  %v6025_v36 = vld [vmem:[%s12108_s1 + $0x178] sm:$0xff] }
  0x16   : > { %7432 = vmatpush3.msra.mxu1 %v268_v9  ;;  %7353 = vmatprep.subr.mxu0 %v6004_v10  ;;  %v257_v31 = vld [vmem:[%s12108_s1] sm:$0xff]  ;;  %v226_v35 = vld [vmem:[%s8941_s12 + $0x8] sm:$0xff]  ;;  %v8960_v38 = vld [vmem:[%s8941_s12 + $0x18] sm:$0xff] }
  0x17   : > { %7433 = vmatprep.subr.mxu1 %v267_v11  ;;  %7354 = vmatpush3.msra.mxu0 %v6004_v10  ;;  %v273_v32 = vld [vmem:[%s8941_s12 + $0x1] sm:$0xff]  ;;  %v8957_v37 = vld [vmem:[%s8941_s12 + $0x19] sm:$0xff]  ;;  %v6024_v39 = vld [vmem:[%s12108_s1 + $0x170] sm:$0xff] }
  0x18   : > { %7434 = vmatpush3.msra.mxu1 %v267_v11  ;;  %7355 = vmatprep.subr.mxu0 %v6003_v12  ;;  %v225_v33 = vld [vmem:[%s8941_s12] sm:$0xff]  ;;  %v6073_v40 = vld [vmem:[%s12108_s1 + $0x1f8] sm:$0xff]  ;;  %v8980_v44 = vld [vmem:[%s8941_s12 + $0x30] sm:$0xff] }
  0x19   : > { %7435 = vmatprep.subr.mxu1 %v266_v13  ;;  %7356 = vmatpush3.msra.mxu0 %v6003_v12  ;;  %v8970_v41 = vld [vmem:[%s8941_s12 + $0x21] sm:$0xff]  ;;  %v8977_v43 = vld [vmem:[%s8941_s12 + $0x31] sm:$0xff]  ;;  %v8989_v46 = vld [vmem:[%s8941_s12 + $0x39] sm:$0xff] }
  0x1a   : > { %7436 = vmatpush3.msra.mxu1 %v266_v13  ;;  %7357 = vmatprep.subr.mxu0 %v6002_v14  ;;  %v8973_v42 = vld [vmem:[%s8941_s12 + $0x20] sm:$0xff]  ;;  %v6023_v45 = vld [vmem:[%s12108_s1 + $0x168] sm:$0xff]  ;;  %v8992_v47 = vld [vmem:[%s8941_s12 + $0x38] sm:$0xff] }
  0x1b   : > { %7437 = vmatprep.subr.mxu1 %v265_v15  ;;  %7358 = vmatpush3.msra.mxu0 %v6002_v14  ;;  %v8996_v48 = vld [vmem:[%s8941_s12 + $0x49] sm:$0xff]  ;;  %v6022_v50 = vld [vmem:[%s12108_s1 + $0x160] sm:$0xff]  ;;  %v9012_v52 = vld [vmem:[%s8941_s12 + $0x51] sm:$0xff] }
  0x1c   : > { %7438 = vmatpush3.msra.mxu1 %v265_v15  ;;  %7359 = vmatprep.subr.mxu0 %v6001_v16  ;;  %v8999_v49 = vld [vmem:[%s8941_s12 + $0x48] sm:$0xff]  ;;  %v6072_v51 = vld [vmem:[%s12108_s1 + $0x1f0] sm:$0xff]  ;;  %v9021_v55 = vld [vmem:[%s8941_s12 + $0x60] sm:$0xff] }
  0x1d   : > { %7439 = vmatprep.subr.mxu1 %v264_v17  ;;  %7360 = vmatpush3.msra.mxu0 %v6001_v16  ;;  %v9015_v53 = vld [vmem:[%s8941_s12 + $0x50] sm:$0xff]  ;;  %v9018_v54 = vld [vmem:[%s8941_s12 + $0x61] sm:$0xff]  ;;  %v6021_v56 = vld [vmem:[%s12108_s1 + $0x158] sm:$0xff] }
  0x1e   : > { %7440 = vmatpush3.msra.mxu1 %v264_v17  ;;  %7361 = vmatprep.subr.mxu0 %v6000_v18  ;;  %v6071_v57 = vld [vmem:[%s12108_s1 + $0x1e8] sm:$0xff]  ;;  %v9040_v60 = vld [vmem:[%s8941_s12 + $0x79] sm:$0xff]  ;;  %v6020_v62 = vld [vmem:[%s12108_s1 + $0x150] sm:$0xff] }
  0x1f   : > { %7441 = vmatprep.subr.mxu1 %v263_v19  ;;  %7362 = vmatpush3.msra.mxu0 %v6000_v18  ;;  %v9034_v58 = vld [vmem:[%s8941_s12 + $0x69] sm:$0xff]  ;;  %v9043_v61 = vld [vmem:[%s8941_s12 + $0x78] sm:$0xff]  ;;  %v6070_v63 = vld [vmem:[%s12108_s1 + $0x1e0] sm:$0xff] }
  0x20   : > { %7442 = vmatpush3.msra.mxu1 %v263_v19  ;;  %7363 = vmatprep.subr.mxu0 %v5999_v20  ;;  %v9037_v59 = vld [vmem:[%s8941_s12 + $0x68] sm:$0xff]  ;;  %v9059_v1 = vld [vmem:[%s8941_s12 + $0x80] sm:$0xff]  ;;  %v9062_v2 = vld [vmem:[%s8941_s12 + $0x91] sm:$0xff] }
  0x21   : > { %7443 = vmatprep.subr.mxu1 %v262_v21  ;;  %7364 = vmatpush3.msra.mxu0 %v5999_v20  ;;  %v9056_v0 = vld [vmem:[%s8941_s12 + $0x81] sm:$0xff]  ;;  %v9065_v3 = vld [vmem:[%s8941_s12 + $0x90] sm:$0xff]  ;;  %v6069_v5 = vld [vmem:[%s12108_s1 + $0x1d8] sm:$0xff] }
  0x22   : > { %7444 = vmatpush3.msra.mxu1 %v262_v21  ;;  %7365 = vmatprep.subr.mxu0 %v5998_v22  ;;  %v6019_v4 = vld [vmem:[%s12108_s1 + $0x148] sm:$0xff]  ;;  %v9078_v6 = vld [vmem:[%s8941_s12 + $0x99] sm:$0xff]  ;;  %v6068_v11 = vld [vmem:[%s12108_s1 + $0x1d0] sm:$0xff] }
  0x23   : > { %7445 = vmatprep.subr.mxu1 %v261_v23  ;;  %7366 = vmatpush3.msra.mxu0 %v5998_v22  ;;  %v9081_v7 = vld [vmem:[%s8941_s12 + $0x98] sm:$0xff]  ;;  %v9084_v8 = vld [vmem:[%s8941_s12 + $0xa9] sm:$0xff]  ;;  %v6018_v10 = vld [vmem:[%s12108_s1 + $0x140] sm:$0xff] }
  0x24   : > { %7446 = vmatpush3.msra.mxu1 %v261_v23  ;;  %7367 = vmatprep.subr.mxu0 %v5997_v24  ;;  %v9087_v9 = vld [vmem:[%s8941_s12 + $0xa8] sm:$0xff]  ;;  %v9100_v12 = vld [vmem:[%s8941_s12 + $0xb1] sm:$0xff]  ;;  %v9109_v15 = vld [vmem:[%s8941_s12 + $0xc0] sm:$0xff] }
  0x25   : > { %7447 = vmatprep.subr.mxu1 %v260_v25  ;;  %7368 = vmatpush3.msra.mxu0 %v5997_v24  ;;  %v9103_v13 = vld [vmem:[%s8941_s12 + $0xb0] sm:$0xff]  ;;  %v9106_v14 = vld [vmem:[%s8941_s12 + $0xc1] sm:$0xff]  ;;  %v6017_v16 = vld [vmem:[%s12108_s1 + $0x138] sm:$0xff] }
  0x26   : > { %7448 = vmatpush3.msra.mxu1 %v260_v25  ;;  %7369 = vmatprep.subr.mxu0 %v5996_v26  ;;  %v6067_v17 = vld [vmem:[%s12108_s1 + $0x1c8] sm:$0xff]  ;;  %v9128_v20 = vld [vmem:[%s8941_s12 + $0xd9] sm:$0xff]  ;;  %v6016_v22 = vld [vmem:[%s12108_s1 + $0x130] sm:$0xff] }
  0x27   : > { %7449 = vmatprep.subr.mxu1 %v259_v27  ;;  %7370 = vmatpush3.msra.mxu0 %v5996_v26  ;;  %v9122_v18 = vld [vmem:[%s8941_s12 + $0xc9] sm:$0xff]  ;;  %v9131_v21 = vld [vmem:[%s8941_s12 + $0xd8] sm:$0xff]  ;;  %v6066_v23 = vld [vmem:[%s12108_s1 + $0x1c0] sm:$0xff] }
  0x28   : > { %7450 = vmatpush3.msra.mxu1 %v259_v27  ;;  %7371 = vmatprep.subr.mxu0 %v5995_v28  ;;  %v9125_v19 = vld [vmem:[%s8941_s12 + $0xc8] sm:$0xff]  ;;  %v9147_v25 = vld [vmem:[%s8941_s12 + $0xe0] sm:$0xff]  ;;  %v9150_v26 = vld [vmem:[%s8941_s12 + $0xf1] sm:$0xff] }
  0x29   : > { %7451 = vmatprep.subr.mxu1 %v258_v29  ;;  %7372 = vmatpush3.msra.mxu0 %v5995_v28  ;;  %v9144_v24 = vld [vmem:[%s8941_s12 + $0xe1] sm:$0xff]  ;;  %v9153_v27 = vld [vmem:[%s8941_s12 + $0xf0] sm:$0xff] }
  0x2a   : > { %7452 = vmatpush3.msra.mxu1 %v258_v29  ;;  %7373 = vmatprep.subr.mxu0 %v5994_v30  ;;  %v6015_v28 = vld [vmem:[%s12108_s1 + $0x128] sm:$0xff]  ;;  %v6065_v29 = vld [vmem:[%s12108_s1 + $0x1b8] sm:$0xff] }
  0x2b   : > { %7453 = vmatprep.subr.mxu1 %v257_v31  ;;  %7374 = vmatpush3.msra.mxu0 %v5994_v30  ;;  %v9166_v30 = vld [vmem:[%s8941_s12 + $0xf9] sm:$0xff] }
  0x2c   : > { %7375 = vmatprep.mubr.f32.mxu0 %v273_v32  ;;  %7454 = vmatpush3.msra.mxu1 %v257_v31  ;;  %v9169_v31 = vld [vmem:[%s8941_s12 + $0xf8] sm:$0xff]  ;;  %v9172_v32 = vld [vmem:[%s8941_s12 + $0x109] sm:$0xff] }
  0x2d   : > { %7455 = vmatprep.mubr.f32.mxu1 %v225_v33  ;;  %7376 = vmatmul.mubr.f32.vlgmr.msra.gmra.mxu0 %v274_v34  ;;  %v9175_v33 = vld [vmem:[%s8941_s12 + $0x108] sm:$0xff]  ;;  %v6014_v34 = vld [vmem:[%s12108_s1 + $0x120] sm:$0xff] }
  0x2e   : > { %7456 = vmatmul.mubr.f32.vlgmr.msra.gmra.mxu1 %v226_v35  ;;  %7503 = vmatprep.subr.mxu0 %v6025_v36  ;;  %v6064_v35 = vld [vmem:[%s12108_s1 + $0x1b0] sm:$0xff] }
  0x2f   : > { %7378 = vmatprep.mubr.f32.mxu0 %v8957_v37  ;;  %7504 = vmatpush3.msra.mxu0 %v6025_v36  ;;  %v9188_v36 = vld [vmem:[%s8941_s12 + $0x111] sm:$0xff] }
  0x30   : > { %7458 = vmatprep.mubr.f32.mxu1 %v8960_v38  ;;  %7505 = vmatprep.subr.mxu0 %v6024_v39 }
  0x31   : > { %7583 = vmatprep.subr.mxu1 %v6073_v40  ;;  %7379 = vmatmul.mubr.f32.gmra.mxu0 %v8970_v41 }
  0x32   : > { %7459 = vmatmul.mubr.f32.gmra.mxu1 %v8973_v42  ;;  %7506 = vmatpush3.msra.mxu0 %v6024_v39  ;;  %v9191_v39 = vld [vmem:[%s8941_s12 + $0x110] sm:$0xff] }
  0x33   : > { %7381 = vmatprep.mubr.f32.mxu0 %v8977_v43  ;;  %7461 = vmatprep.mubr.f32.mxu1 %v8980_v44 }
  0x34   : > { %7507 = vmatprep.subr.mxu0 %v6023_v45  ;;  %7584 = vmatpush3.msra.mxu1 %v6073_v40  ;;  %v9194_v40 = vld [vmem:[%s8941_s12 + $0x121] sm:$0xff] }
  0x35   : > { %7508 = vmatpush3.msra.mxu0 %v6023_v45  ;;  %7585 = vmatprep.subr.mxu1 %v6072_v51  ;;  %v9197_v45 = vld [vmem:[%s8941_s12 + $0x120] sm:$0xff] }
  0x36   : > { %7382 = vmatmul.mubr.f32.gmra.mxu0 %v8989_v46  ;;  %7462 = vmatmul.mubr.f32.gmra.mxu1 %v8992_v47 }
  0x37   : > { %7384 = vmatprep.mubr.f32.mxu0 %v8996_v48  ;;  %7464 = vmatprep.mubr.f32.mxu1 %v8999_v49 }
  0x38   : > { %7509 = vmatprep.subr.mxu0 %v6022_v50  ;;  %7586 = vmatpush3.msra.mxu1 %v6072_v51  ;;  %v6063_v51 = vld [vmem:[%s12108_s1 + $0x1a8] sm:$0xff] }
  0x39   : > { %7510 = vmatpush3.msra.mxu0 %v6022_v50  ;;  %7587 = vmatprep.subr.mxu1 %v6071_v57  ;;  %v6013_v50 = vld [vmem:[%s12108_s1 + $0x118] sm:$0xff] }
  0x3a   : > { %7385 = vmatmul.mubr.f32.gmra.mxu0 %v9012_v52  ;;  %7465 = vmatmul.mubr.f32.gmra.mxu1 %v9015_v53 }
  0x3b   : > { %7387 = vmatprep.mubr.f32.mxu0 %v9018_v54  ;;  %7467 = vmatprep.mubr.f32.mxu1 %v9021_v55 }
  0x3c   : > { %7511 = vmatprep.subr.mxu0 %v6021_v56  ;;  %7588 = vmatpush3.msra.mxu1 %v6071_v57  ;;  %v9213_v57 = vld [vmem:[%s8941_s12 + $0x128] sm:$0xff] }
  0x3d   : > { %7512 = vmatpush3.msra.mxu0 %v6021_v56  ;;  %7589 = vmatprep.subr.mxu1 %v6070_v63  ;;  %v9210_v56 = vld [vmem:[%s8941_s12 + $0x129] sm:$0xff] }
  0x3e   : > { %7388 = vmatmul.mubr.f32.gmra.mxu0 %v9034_v58  ;;  %7468 = vmatmul.mubr.f32.gmra.mxu1 %v9037_v59 }
  0x3f   : > { %7390 = vmatprep.mubr.f32.mxu0 %v9040_v60  ;;  %7470 = vmatprep.mubr.f32.mxu1 %v9043_v61 }
  0x40   : > { %7513 = vmatprep.subr.mxu0 %v6020_v62  ;;  %7590 = vmatpush3.msra.mxu1 %v6070_v63  ;;  %v9219_v63 = vld [vmem:[%s8941_s12 + $0x138] sm:$0xff] }
  0x41   : > { %7514 = vmatpush3.msra.mxu0 %v6020_v62  ;;  %7591 = vmatprep.subr.mxu1 %v6069_v5  ;;  %v9216_v62 = vld [vmem:[%s8941_s12 + $0x139] sm:$0xff] }
  0x42   : > { %7391 = vmatmul.mubr.f32.gmra.mxu0 %v9056_v0  ;;  %7471 = vmatmul.mubr.f32.gmra.mxu1 %v9059_v1 }
  0x43   : > { %7393 = vmatprep.mubr.f32.mxu0 %v9062_v2  ;;  %7473 = vmatprep.mubr.f32.mxu1 %v9065_v3 }
  0x44   : > { %7515 = vmatprep.subr.mxu0 %v6019_v4  ;;  %7592 = vmatpush3.msra.mxu1 %v6069_v5  ;;  %v6062_v5 = vld [vmem:[%s12108_s1 + $0x1a0] sm:$0xff] }
  0x45   : > { %7516 = vmatpush3.msra.mxu0 %v6019_v4  ;;  %7593 = vmatprep.subr.mxu1 %v6068_v11  ;;  %v6012_v4 = vld [vmem:[%s12108_s1 + $0x110] sm:$0xff] }
  0x46   : > { %7394 = vmatmul.mubr.f32.gmra.mxu0 %v9078_v6  ;;  %7474 = vmatmul.mubr.f32.gmra.mxu1 %v9081_v7 }
  0x47   : > { %7396 = vmatprep.mubr.f32.mxu0 %v9084_v8  ;;  %7476 = vmatprep.mubr.f32.mxu1 %v9087_v9 }
  0x48   : > { %7517 = vmatprep.subr.mxu0 %v6018_v10  ;;  %7594 = vmatpush3.msra.mxu1 %v6068_v11  ;;  %v9235_v11 = vld [vmem:[%s8941_s12 + $0x140] sm:$0xff] }
  0x49   : > { %7518 = vmatpush3.msra.mxu0 %v6018_v10  ;;  %7595 = vmatprep.subr.mxu1 %v6067_v17  ;;  %v9232_v10 = vld [vmem:[%s8941_s12 + $0x141] sm:$0xff] }
  0x4a   : > { %7397 = vmatmul.mubr.f32.gmra.mxu0 %v9100_v12  ;;  %7477 = vmatmul.mubr.f32.gmra.mxu1 %v9103_v13 }
  0x4b   : > { %7399 = vmatprep.mubr.f32.mxu0 %v9106_v14  ;;  %7479 = vmatprep.mubr.f32.mxu1 %v9109_v15 }
  0x4c   : > { %7519 = vmatprep.subr.mxu0 %v6017_v16  ;;  %7596 = vmatpush3.msra.mxu1 %v6067_v17  ;;  %v9241_v17 = vld [vmem:[%s8941_s12 + $0x150] sm:$0xff] }
  0x4d   : > { %7520 = vmatpush3.msra.mxu0 %v6017_v16  ;;  %7597 = vmatprep.subr.mxu1 %v6066_v23  ;;  %v9238_v16 = vld [vmem:[%s8941_s12 + $0x151] sm:$0xff] }
  0x4e   : > { %7400 = vmatmul.mubr.f32.gmra.mxu0 %v9122_v18  ;;  %7480 = vmatmul.mubr.f32.gmra.mxu1 %v9125_v19  ;;  %12120 = vst [vmem:[#allocation3_spill] sm:$0xff] %v9238_v16 }
  0x4f   : > { %7402 = vmatprep.mubr.f32.mxu0 %v9128_v20  ;;  %7482 = vmatprep.mubr.f32.mxu1 %v9131_v21 }
  0x50   : > { %7521 = vmatprep.subr.mxu0 %v6016_v22  ;;  %7598 = vmatpush3.msra.mxu1 %v6066_v23  ;;  %v6061_v23 = vld [vmem:[%s12108_s1 + $0x198] sm:$0xff] }
  0x51   : > { %7522 = vmatpush3.msra.mxu0 %v6016_v22  ;;  %7599 = vmatprep.subr.mxu1 %v6065_v29  ;;  %v6011_v22 = vld [vmem:[%s12108_s1 + $0x108] sm:$0xff] }
  0x52   : > { %7403 = vmatmul.mubr.f32.gmra.mxu0 %v9144_v24  ;;  %7483 = vmatmul.mubr.f32.gmra.mxu1 %v9147_v25 }
  0x53   : > { %7405 = vmatprep.mubr.f32.mxu0 %v9150_v26  ;;  %7485 = vmatprep.mubr.f32.mxu1 %v9153_v27 }
  0x54   : > { %7523 = vmatprep.subr.mxu0 %v6015_v28  ;;  %7600 = vmatpush3.msra.mxu1 %v6065_v29  ;;  %v9257_v29 = vld [vmem:[%s8941_s12 + $0x158] sm:$0xff] }
  0x55   : > { %7524 = vmatpush3.msra.mxu0 %v6015_v28  ;;  %7601 = vmatprep.subr.mxu1 %v6064_v35  ;;  %v9254_v28 = vld [vmem:[%s8941_s12 + $0x159] sm:$0xff] }
  0x56   : > { %7406 = vmatmul.mubr.f32.gmra.mxu0 %v9166_v30  ;;  %7486 = vmatmul.mubr.f32.gmra.mxu1 %v9169_v31  ;;  %12121 = vst [vmem:[#allocation4_spill] sm:$0xff] %v9254_v28 }
  0x57   : > { %7408 = vmatprep.mubr.f32.mxu0 %v9172_v32  ;;  %7488 = vmatprep.mubr.f32.mxu1 %v9175_v33 }
  0x58   : > { %7525 = vmatprep.subr.mxu0 %v6014_v34  ;;  %7602 = vmatpush3.msra.mxu1 %v6064_v35  ;;  %v9263_v35 = vld [vmem:[%s8941_s12 + $0x168] sm:$0xff] }
  0x59   : > { %7526 = vmatpush3.msra.mxu0 %v6014_v34  ;;  %7603 = vmatprep.subr.mxu1 %v6063_v51  ;;  %v9260_v34 = vld [vmem:[%s8941_s12 + $0x169] sm:$0xff] }
  0x5a   : > { %7409 = vmatmul.mubr.f32.gmra.mxu0 %v9188_v36  ;;  %7489 = vmatmul.mubr.f32.gmra.mxu1 %v9191_v39  ;;  %12122 = vst [vmem:[#allocation5_spill] sm:$0xff] %v9260_v34 }
  0x5b   : > { %7411 = vmatprep.mubr.f32.mxu0 %v9194_v40  ;;  %7491 = vmatprep.mubr.f32.mxu1 %v9197_v45 }
  0x5c   : > { %7527 = vmatprep.subr.mxu0 %v6013_v50  ;;  %7604 = vmatpush3.msra.mxu1 %v6063_v51  ;;  %v6060_v51 = vld [vmem:[%s12108_s1 + $0x190] sm:$0xff] }
  0x5d   : > { %7528 = vmatpush3.msra.mxu0 %v6013_v50  ;;  %7605 = vmatprep.subr.mxu1 %v6062_v5  ;;  %v6010_v50 = vld [vmem:[%s12108_s1 + $0x100] sm:$0xff] }
  0x5e   : > { %7412 = vmatmul.mubr.f32.gmra.mxu0 %v9210_v56  ;;  %7492 = vmatmul.mubr.f32.gmra.mxu1 %v9213_v57 }
  0x5f   : > { %7414 = vmatprep.mubr.f32.mxu0 %v9216_v62  ;;  %7494 = vmatprep.mubr.f32.mxu1 %v9219_v63 }
  0x60   : > { %7529 = vmatprep.subr.mxu0 %v6012_v4  ;;  %7606 = vmatpush3.msra.mxu1 %v6062_v5  ;;  %v9279_v5 = vld [vmem:[%s8941_s12 + $0x170] sm:$0xff] }
  0x61   : > { %7530 = vmatpush3.msra.mxu0 %v6012_v4  ;;  %7607 = vmatprep.subr.mxu1 %v6061_v23  ;;  %v9276_v4 = vld [vmem:[%s8941_s12 + $0x171] sm:$0xff] }
  0x62   : > { %7415 = vmatmul.mubr.f32.gmra.mxu0 %v9232_v10  ;;  %7495 = vmatmul.mubr.f32.gmra.mxu1 %v9235_v11 }
  0x63   : > { %7417 = vmatprep.mubr.f32.mxu0 %v9238_v16  ;;  %7497 = vmatprep.mubr.f32.mxu1 %v9241_v17  ;;  %v773_v16 = vld [vmem:[%s8941_s12 + $0xa] sm:$0xff] }
  0x64   : > { %7531 = vmatprep.subr.mxu0 %v6011_v22  ;;  %7608 = vmatpush3.msra.mxu1 %v6061_v23  ;;  %v772_v23 = vld [vmem:[%s8941_s12 + $0x2] sm:$0xff] }
  0x65   : > { %7532 = vmatpush3.msra.mxu0 %v6011_v22  ;;  %7609 = vmatprep.subr.mxu1 %v6060_v51  ;;  %v6059_v22 = vld [vmem:[%s12108_s1 + $0x188] sm:$0xff] }
  0x66   : > { %7418 = vmatmul.mubr.f32.gmra.mxu0 %v9254_v28  ;;  %7498 = vmatmul.mubr.f32.gmra.mxu1 %v9257_v29  ;;  %v6058_v28 = vld [vmem:[%s12108_s1 + $0x180] sm:$0xff] }
  0x67   : > { %7420 = vmatprep.mubr.f32.mxu0 %v9260_v34  ;;  %7500 = vmatprep.mubr.f32.mxu1 %v9263_v35  ;;  %v6121_v34 = vld [vmem:[%s12108_s1 + $0x278] sm:$0xff] }
  0x68   : > { %7533 = vmatprep.subr.mxu0 %v6010_v50  ;;  %7610 = vmatpush3.msra.mxu1 %v6060_v51  ;;  %v6120_v51 = vld [vmem:[%s12108_s1 + $0x270] sm:$0xff] }
  0x69   : > { %7534 = vmatpush3.msra.mxu0 %v6010_v50  ;;  %7611 = vmatprep.subr.mxu1 %v6059_v22  ;;  %v9296_v50 = vld [vmem:[%s8941_s12 + $0x1a] sm:$0xff] }
  0x6a   : > { %7421 = vmatmul.mubr.f32.gmra.mxu0 %v9276_v4  ;;  %7501 = vmatmul.mubr.f32.gmra.mxu1 %v9279_v5 }
  0x6b   : > { %7535 = vmatprep.mubr.f32.mxu0 %v772_v23  ;;  %7612 = vmatpush3.msra.mxu1 %v6059_v22  ;;  %v9303_v23 = vld [vmem:[%s8941_s12 + $0x22] sm:$0xff] }
  0x6c   : > { %7663 = vmatprep.subr.mxu0 %v6121_v34  ;;  %7613 = vmatprep.subr.mxu1 %v6058_v28  ;;  %v6119_v22 = vld [vmem:[%s12108_s1 + $0x268] sm:$0xff] }
  0x6d   : > { %7615 = vmatprep.mubr.f32.mxu1 %v8960_v38  ;;  %7614 = vmatpush3.msra.mxu1 %v6058_v28  ;;  %v9310_v38 = vld [vmem:[%s8941_s12 + $0x32] sm:$0xff]  ;;  %v9323_v28 = vld [vmem:[%s8941_s12 + $0x3a] sm:$0xff] }
  0x6e   : > { %7536 = vmatmul.mubr.f32.vlgmr.msra.gmra.mxu0 %v773_v16  ;;  %7616 = vmatmul.mubr.f32.vlgmr.msra.gmra.mxu1 %v8973_v42  ;;  %v6118_v42 = vld [vmem:[%s12108_s1 + $0x260] sm:$0xff]  ;;  %v6169_v16 = vld [vmem:[%s12108_s1 + $0x2f8] sm:$0xff] }
  0x6f   : > { %7664 = vmatpush3.msra.mxu0 %v6121_v34  ;;  %7538 = vmatprep.mubr.f32.mxu0 %v9296_v50  ;;  %v6117_v34 = vld [vmem:[%s12108_s1 + $0x258] sm:$0xff] }
  0x70   : > { %7665 = vmatprep.subr.mxu0 %v6120_v51  ;;  %7618 = vmatprep.mubr.f32.mxu1 %v8980_v44  ;;  %v9327_v44 = vld [vmem:[%s8941_s12 + $0x4a] sm:$0xff] }
  0x71   : > { %7666 = vmatpush3.msra.mxu0 %v6120_v51  ;;  %7743 = vmatprep.subr.mxu1 %v6169_v16  ;;  %v9343_v51 = vld [vmem:[%s8941_s12 + $0x62] sm:$0xff] }
  0x72   : > { %7539 = vmatmul.mubr.f32.gmra.mxu0 %v9303_v23  ;;  %7667 = vmatprep.subr.mxu0 %v6119_v22 }
  0x73   : > { %7619 = vmatmul.mubr.f32.gmra.mxu1 %v8992_v47  ;;  %7541 = vmatprep.mubr.f32.mxu0 %v9310_v38  ;;  %v6168_v47 = vld [vmem:[%s12108_s1 + $0x2f0] sm:$0xff] }
  0x74   : > { %7621 = vmatprep.mubr.f32.mxu1 %v8999_v49  ;;  %7668 = vmatpush3.msra.mxu0 %v6119_v22  ;;  %v9339_v49 = vld [vmem:[%s8941_s12 + $0x52] sm:$0xff] }
  0x75   : > { %7669 = vmatprep.subr.mxu0 %v6118_v42  ;;  %7744 = vmatpush3.msra.mxu1 %v6169_v16  ;;  %v6116_v22 = vld [vmem:[%s12108_s1 + $0x250] sm:$0xff]  ;;  %v6115_v16 = vld [vmem:[%s12108_s1 + $0x248] sm:$0xff] }
  0x76   : > { %7542 = vmatmul.mubr.f32.gmra.mxu0 %v9323_v28  ;;  %7745 = vmatprep.subr.mxu1 %v6168_v47 }
  0x77   : > { %7622 = vmatmul.mubr.f32.gmra.mxu1 %v9015_v53  ;;  %7544 = vmatprep.mubr.f32.mxu0 %v9327_v44  ;;  %v6167_v53 = vld [vmem:[%s12108_s1 + $0x2e8] sm:$0xff] }
  0x78   : > { %7624 = vmatprep.mubr.f32.mxu1 %v9021_v55  ;;  %7670 = vmatpush3.msra.mxu0 %v6118_v42  ;;  %v9355_v55 = vld [vmem:[%s8941_s12 + $0x6a] sm:$0xff]  ;;  %v9359_v42 = vld [vmem:[%s8941_s12 + $0x7a] sm:$0xff] }
  0x79   : > { %7671 = vmatprep.subr.mxu0 %v6117_v34  ;;  %7746 = vmatpush3.msra.mxu1 %v6168_v47  ;;  %v6114_v47 = vld [vmem:[%s12108_s1 + $0x240] sm:$0xff] }
  0x7a   : > { %7545 = vmatmul.mubr.f32.gmra.mxu0 %v9339_v49  ;;  %7747 = vmatprep.subr.mxu1 %v6167_v53 }
  0x7b   : > { %7625 = vmatmul.mubr.f32.gmra.mxu1 %v9037_v59  ;;  %7547 = vmatprep.mubr.f32.mxu0 %v9343_v51  ;;  %v6166_v59 = vld [vmem:[%s12108_s1 + $0x2e0] sm:$0xff] }
  0x7c   : > { %7627 = vmatprep.mubr.f32.mxu1 %v9043_v61  ;;  %7672 = vmatpush3.msra.mxu0 %v6117_v34  ;;  %v9371_v61 = vld [vmem:[%s8941_s12 + $0x82] sm:$0xff]  ;;  %v9375_v34 = vld [vmem:[%s8941_s12 + $0x92] sm:$0xff] }
  0x7d   : > { %7673 = vmatprep.subr.mxu0 %v6116_v22  ;;  %7748 = vmatpush3.msra.mxu1 %v6167_v53  ;;  %v6113_v53 = vld [vmem:[%s12108_s1 + $0x238] sm:$0xff] }
  0x7e   : > { %7548 = vmatmul.mubr.f32.gmra.mxu0 %v9355_v55  ;;  %7749 = vmatprep.subr.mxu1 %v6166_v59 }
  0x7f   : > { %7628 = vmatmul.mubr.f32.gmra.mxu1 %v9059_v1  ;;  %7550 = vmatprep.mubr.f32.mxu0 %v9359_v42  ;;  %v6165_v1 = vld [vmem:[%s12108_s1 + $0x2d8] sm:$0xff] }
  0x80   : > { %7630 = vmatprep.mubr.f32.mxu1 %v9065_v3  ;;  %7674 = vmatpush3.msra.mxu0 %v6116_v22  ;;  %v9387_v3 = vld [vmem:[%s8941_s12 + $0x9a] sm:$0xff]  ;;  %v9391_v22 = vld [vmem:[%s8941_s12 + $0xaa] sm:$0xff] }
  0x81   : > { %7675 = vmatprep.subr.mxu0 %v6115_v16  ;;  %7750 = vmatpush3.msra.mxu1 %v6166_v59  ;;  %v6112_v59 = vld [vmem:[%s12108_s1 + $0x230] sm:$0xff] }
  0x82   : > { %7551 = vmatmul.mubr.f32.gmra.mxu0 %v9371_v61  ;;  %7751 = vmatprep.subr.mxu1 %v6165_v1 }
  0x83   : > { %7631 = vmatmul.mubr.f32.gmra.mxu1 %v9081_v7  ;;  %7553 = vmatprep.mubr.f32.mxu0 %v9375_v34  ;;  %v6164_v7 = vld [vmem:[%s12108_s1 + $0x2d0] sm:$0xff] }
  0x84   : > { %7633 = vmatprep.mubr.f32.mxu1 %v9087_v9  ;;  %7676 = vmatpush3.msra.mxu0 %v6115_v16  ;;  %v9403_v9 = vld [vmem:[%s8941_s12 + $0xb2] sm:$0xff]  ;;  %v9407_v16 = vld [vmem:[%s8941_s12 + $0xc2] sm:$0xff] }
  0x85   : > { %7677 = vmatprep.subr.mxu0 %v6114_v47  ;;  %7752 = vmatpush3.msra.mxu1 %v6165_v1  ;;  %v6111_v1 = vld [vmem:[%s12108_s1 + $0x228] sm:$0xff] }
  0x86   : > { %7554 = vmatmul.mubr.f32.gmra.mxu0 %v9387_v3  ;;  %7753 = vmatprep.subr.mxu1 %v6164_v7 }
  0x87   : > { %7634 = vmatmul.mubr.f32.gmra.mxu1 %v9103_v13  ;;  %7556 = vmatprep.mubr.f32.mxu0 %v9391_v22  ;;  %v6163_v13 = vld [vmem:[%s12108_s1 + $0x2c8] sm:$0xff] }
  0x88   : > { %7636 = vmatprep.mubr.f32.mxu1 %v9109_v15  ;;  %7678 = vmatpush3.msra.mxu0 %v6114_v47  ;;  %v9419_v15 = vld [vmem:[%s8941_s12 + $0xca] sm:$0xff]  ;;  %v9423_v47 = vld [vmem:[%s8941_s12 + $0xda] sm:$0xff] }
  0x89   : > { %7679 = vmatprep.subr.mxu0 %v6113_v53  ;;  %7754 = vmatpush3.msra.mxu1 %v6164_v7  ;;  %v6110_v7 = vld [vmem:[%s12108_s1 + $0x220] sm:$0xff] }
  0x8a   : > { %7557 = vmatmul.mubr.f32.gmra.mxu0 %v9403_v9  ;;  %7755 = vmatprep.subr.mxu1 %v6163_v13 }
  0x8b   : > { %7637 = vmatmul.mubr.f32.gmra.mxu1 %v9125_v19  ;;  %7559 = vmatprep.mubr.f32.mxu0 %v9407_v16  ;;  %v6162_v19 = vld [vmem:[%s12108_s1 + $0x2c0] sm:$0xff] }
  0x8c   : > { %7639 = vmatprep.mubr.f32.mxu1 %v9131_v21  ;;  %7680 = vmatpush3.msra.mxu0 %v6113_v53  ;;  %v9435_v21 = vld [vmem:[%s8941_s12 + $0xe2] sm:$0xff]  ;;  %v9439_v53 = vld [vmem:[%s8941_s12 + $0xf2] sm:$0xff] }
  0x8d   : > { %7681 = vmatprep.subr.mxu0 %v6112_v59  ;;  %7756 = vmatpush3.msra.mxu1 %v6163_v13  ;;  %v6109_v13 = vld [vmem:[%s12108_s1 + $0x218] sm:$0xff] }
  0x8e   : > { %7560 = vmatmul.mubr.f32.gmra.mxu0 %v9419_v15  ;;  %7757 = vmatprep.subr.mxu1 %v6162_v19 }
  0x8f   : > { %7640 = vmatmul.mubr.f32.gmra.mxu1 %v9147_v25  ;;  %7562 = vmatprep.mubr.f32.mxu0 %v9423_v47  ;;  %v6161_v25 = vld [vmem:[%s12108_s1 + $0x2b8] sm:$0xff] }
  0x90   : > { %7642 = vmatprep.mubr.f32.mxu1 %v9153_v27  ;;  %7682 = vmatpush3.msra.mxu0 %v6112_v59  ;;  %v9451_v27 = vld [vmem:[%s8941_s12 + $0xfa] sm:$0xff]  ;;  %v9455_v59 = vld [vmem:[%s8941_s12 + $0x10a] sm:$0xff] }
  0x91   : > { %7683 = vmatprep.subr.mxu0 %v6111_v1  ;;  %7758 = vmatpush3.msra.mxu1 %v6162_v19  ;;  %v6108_v19 = vld [vmem:[%s12108_s1 + $0x210] sm:$0xff] }
  0x92   : > { %7563 = vmatmul.mubr.f32.gmra.mxu0 %v9435_v21  ;;  %7759 = vmatprep.subr.mxu1 %v6161_v25 }
  0x93   : > { %7643 = vmatmul.mubr.f32.gmra.mxu1 %v9169_v31  ;;  %7565 = vmatprep.mubr.f32.mxu0 %v9439_v53  ;;  %v6160_v31 = vld [vmem:[%s12108_s1 + $0x2b0] sm:$0xff] }
  0x94   : > { %7645 = vmatprep.mubr.f32.mxu1 %v9175_v33  ;;  %7684 = vmatpush3.msra.mxu0 %v6111_v1  ;;  %v9467_v33 = vld [vmem:[%s8941_s12 + $0x112] sm:$0xff]  ;;  %v9471_v1 = vld [vmem:[%s8941_s12 + $0x122] sm:$0xff] }
  0x95   : > { %7685 = vmatprep.subr.mxu0 %v6110_v7  ;;  %7760 = vmatpush3.msra.mxu1 %v6161_v25  ;;  %v6107_v25 = vld [vmem:[%s12108_s1 + $0x208] sm:$0xff] }
  0x96   : > { %7566 = vmatmul.mubr.f32.gmra.mxu0 %v9451_v27  ;;  %7761 = vmatprep.subr.mxu1 %v6160_v31 }
  0x97   : > { %7646 = vmatmul.mubr.f32.gmra.mxu1 %v9191_v39  ;;  %7568 = vmatprep.mubr.f32.mxu0 %v9455_v59  ;;  %v6159_v39 = vld [vmem:[%s12108_s1 + $0x2a8] sm:$0xff] }
  0x98   : > { %7648 = vmatprep.mubr.f32.mxu1 %v9197_v45  ;;  %7686 = vmatpush3.msra.mxu0 %v6110_v7  ;;  %v9483_v45 = vld [vmem:[%s8941_s12 + $0x12a] sm:$0xff]  ;;  %v9487_v7 = vld [vmem:[%s8941_s12 + $0x13a] sm:$0xff] }
  0x99   : > { %7687 = vmatprep.subr.mxu0 %v6109_v13  ;;  %7762 = vmatpush3.msra.mxu1 %v6160_v31  ;;  %v6106_v31 = vld [vmem:[%s12108_s1 + $0x200] sm:$0xff] }
  0x9a   : > { %7569 = vmatmul.mubr.f32.gmra.mxu0 %v9467_v33  ;;  %7763 = vmatprep.subr.mxu1 %v6159_v39 }
  0x9b   : > { %7649 = vmatmul.mubr.f32.gmra.mxu1 %v9213_v57  ;;  %7571 = vmatprep.mubr.f32.mxu0 %v9471_v1  ;;  %v6158_v57 = vld [vmem:[%s12108_s1 + $0x2a0] sm:$0xff] }
  0x9c   : > { %7651 = vmatprep.mubr.f32.mxu1 %v9219_v63  ;;  %7688 = vmatpush3.msra.mxu0 %v6109_v13  ;;  %v9499_v63 = vld [vmem:[%s8941_s12 + $0x142] sm:$0xff]  ;;  %v9503_v13 = vld [vmem:[%s8941_s12 + $0x152] sm:$0xff] }
  0x9d   : > { %7689 = vmatprep.subr.mxu0 %v6108_v19  ;;  %7764 = vmatpush3.msra.mxu1 %v6159_v39  ;;  %v6156_v39 = vld [vmem:[%s12108_s1 + $0x290] sm:$0xff] }
  0x9e   : > { %7572 = vmatmul.mubr.f32.gmra.mxu0 %v9483_v45  ;;  %7765 = vmatprep.subr.mxu1 %v6158_v57 }
  0x9f   : > { %7652 = vmatmul.mubr.f32.gmra.mxu1 %v9235_v11  ;;  %7574 = vmatprep.mubr.f32.mxu0 %v9487_v7  ;;  %v6157_v11 = vld [vmem:[%s12108_s1 + $0x298] sm:$0xff] }
  0xa0   : > { %7654 = vmatprep.mubr.f32.mxu1 %v9241_v17  ;;  %7690 = vmatpush3.msra.mxu0 %v6108_v19  ;;  %v9515_v17 = vld [vmem:[%s8941_s12 + $0x15a] sm:$0xff]  ;;  %v9519_v19 = vld [vmem:[%s8941_s12 + $0x16a] sm:$0xff] }
  0xa1   : > { %7691 = vmatprep.subr.mxu0 %v6107_v25  ;;  %7766 = vmatpush3.msra.mxu1 %v6158_v57  ;;  %v9525_v57 = vld [vmem:[%s8941_s12 + $0x180] sm:$0xff] }
  0xa2   : > { %7575 = vmatmul.mubr.f32.gmra.mxu0 %v9499_v63  ;;  %7767 = vmatprep.subr.mxu1 %v6157_v11 }
  0xa3   : > { %7655 = vmatmul.mubr.f32.gmra.mxu1 %v9257_v29  ;;  %7577 = vmatprep.mubr.f32.mxu0 %v9503_v13  ;;  %v9531_v29 = vld [vmem:[%s8941_s12 + $0x172] sm:$0xff] }
  0xa4   : > { %7657 = vmatprep.mubr.f32.mxu1 %v9263_v35  ;;  %7692 = vmatpush3.msra.mxu0 %v6107_v25  ;;  %v6155_v35 = vld [vmem:[%s12108_s1 + $0x288] sm:$0xff] }
  0xa5   : > { %7693 = vmatprep.subr.mxu0 %v6106_v31  ;;  %7768 = vmatpush3.msra.mxu1 %v6157_v11  ;;  %v9538_v25 = vld [vmem:[%s8941_s12 + $0x188] sm:$0xff]  ;;  %v6217_v11 = vld [vmem:[%s12108_s1 + $0x378] sm:$0xff] }
  0xa6   : > { %7578 = vmatmul.mubr.f32.gmra.mxu0 %v9515_v17  ;;  %7769 = vmatprep.subr.mxu1 %v6156_v39 }
  0xa7   : > { %7658 = vmatmul.mubr.f32.gmra.mxu1 %v9279_v5  ;;  %7580 = vmatprep.mubr.f32.mxu0 %v9519_v19  ;;  %v6154_v5 = vld [vmem:[%s12108_s1 + $0x280] sm:$0xff] }
  0xa8   : > { %7660 = vmatprep.mubr.f32.mxu1 %v9525_v57  ;;  %7694 = vmatpush3.msra.mxu0 %v6106_v31  ;;  %v6216_v31 = vld [vmem:[%s12108_s1 + $0x370] sm:$0xff] }
  0xa9   : > { %7770 = vmatpush3.msra.mxu1 %v6156_v39  ;;  %7823 = vmatprep.subr.mxu0 %v6217_v11  ;;  %v6215_v39 = vld [vmem:[%s12108_s1 + $0x368] sm:$0xff] }
  0xaa   : > { %7581 = vmatmul.mubr.f32.gmra.mxu0 %v9531_v29  ;;  %7771 = vmatprep.subr.mxu1 %v6155_v35 }
  0xab   : > { %7661 = vmatmul.mubr.f32.gmra.mxu1 %v9538_v25  ;;  %7695 = vmatprep.mubr.f32.mxu0 %v8957_v37  ;;  %v6214_v37 = vld [vmem:[%s12108_s1 + $0x360] sm:$0xff] }
  0xac   : > { %7772 = vmatpush3.msra.mxu1 %v6155_v35  ;;  %7775 = vmatprep.mubr.f32.mxu1 %v9296_v50  ;;  %v6253_v50 = vld [vmem:[%s12108_s1 + $0x398] sm:$0xff]  ;;  %v6310_v35 = vld [vmem:[%s12108_s1 + $0x460] sm:$0xff] }
  0xad   : > { %7773 = vmatprep.subr.mxu1 %v6154_v5 }
  0xae   : > { %7696 = vmatmul.mubr.f32.vlgmr.msra.gmra.mxu0 %v8970_v41  ;;  %7774 = vmatpush3.msra.mxu1 %v6154_v5  ;;  %v6265_v41 = vld [vmem:[%s12108_s1 + $0x3f8] sm:$0xff]  ;;  %v6175_v5 = vld [vmem:[%s8941_s12 + $0x68] sm:$0xff] }
  0xaf   : > { %7824 = vmatpush3.msra.mxu0 %v6217_v11  ;;  %7776 = vmatmul.mubr.f32.vlgmr.msra.gmra.mxu1 %v9303_v23  ;;  %v6202_v23 = vld [vmem:[%s12108_s1 + $0x300] sm:$0xff] }
  0xb0   : > { %7698 = vmatprep.mubr.f32.mxu0 %v8977_v43  ;;  %7825 = vmatprep.subr.mxu0 %v6216_v31  ;;  %v6213_v43 = vld [vmem:[%s12108_s1 + $0x358] sm:$0xff] }
  0xb1   : > { %7778 = vmatprep.mubr.f32.mxu1 %v9310_v38  ;;  %7826 = vmatpush3.msra.mxu0 %v6216_v31  ;;  %v12125_v38 = vld [vmem:[#allocation5_spill] sm:$0xff] }
  0xb2   : > { %7699 = vmatmul.mubr.f32.gmra.mxu0 %v8989_v46  ;;  %7827 = vmatprep.subr.mxu0 %v6215_v39  ;;  %v6264_v46 = vld [vmem:[%s12108_s1 + $0x3f0] sm:$0xff] }
  0xb3   : > { %7779 = vmatmul.mubr.f32.gmra.mxu1 %v9323_v28  ;;  %7701 = vmatprep.mubr.f32.mxu0 %v8996_v48  ;;  %v6212_v48 = vld [vmem:[%s12108_s1 + $0x350] sm:$0xff]  ;;  %v9691_v28 = vld [vmem:[%s8941_s12 + $0x181] sm:$0xff] }
  0xb4   : > { %7781 = vmatprep.mubr.f32.mxu1 %v9327_v44  ;;  %7828 = vmatpush3.msra.mxu0 %v6215_v39  ;;  %v6252_v44 = vld [vmem:[%s12108_s1 + $0x390] sm:$0xff] }
  0xb5   : > { %7829 = vmatprep.subr.mxu0 %v6214_v37  ;;  %7903 = vmatprep.subr.mxu1 %v6265_v41 }
  0xb6   : > { %7702 = vmatmul.mubr.f32.gmra.mxu0 %v9012_v52  ;;  %7904 = vmatpush3.msra.mxu1 %v6265_v41  ;;  %v6263_v52 = vld [vmem:[%s12108_s1 + $0x3e8] sm:$0xff]  ;;  %v6176_v41 = vld [vmem:[%s8941_s12 + $0x78] sm:$0xff] }
  0xb7   : > { %7782 = vmatmul.mubr.f32.gmra.mxu1 %v9339_v49  ;;  %7704 = vmatprep.mubr.f32.mxu0 %v9018_v54  ;;  %v6211_v54 = vld [vmem:[%s12108_s1 + $0x348] sm:$0xff] }
  0xb8   : > { %7784 = vmatprep.mubr.f32.mxu1 %v9343_v51  ;;  %7830 = vmatpush3.msra.mxu0 %v6214_v37  ;;  %v9697_v49 = vld [vmem:[%s8941_s12 + $0x182] sm:$0xff] }
  0xb9   : > { %7831 = vmatprep.subr.mxu0 %v6213_v43  ;;  %7905 = vmatprep.subr.mxu1 %v6264_v46  ;;  %v9703_v51 = vld [vmem:[%s8941_s12 + $0x189] sm:$0xff] }
  0xba   : > { %7705 = vmatmul.mubr.f32.gmra.mxu0 %v9034_v58  ;;  %7906 = vmatpush3.msra.mxu1 %v6264_v46  ;;  %v6262_v58 = vld [vmem:[%s12108_s1 + $0x3e0] sm:$0xff]  ;;  %v6223_v37 = vld [vmem:[%s8941_s12 + $0x69] sm:$0xff] }
  0xbb   : > { %7785 = vmatmul.mubr.f32.gmra.mxu1 %v9355_v55  ;;  %7707 = vmatprep.mubr.f32.mxu0 %v9040_v60  ;;  %v6210_v60 = vld [vmem:[%s12108_s1 + $0x340] sm:$0xff]  ;;  %v6251_v55 = vld [vmem:[%s12108_s1 + $0x388] sm:$0xff] }
  0xbc   : > { %7787 = vmatprep.mubr.f32.mxu1 %v9359_v42  ;;  %7832 = vmatpush3.msra.mxu0 %v6213_v43  ;;  %v9710_v42 = vld [vmem:[%s8941_s12 + $0x18a] sm:$0xff]  ;;  %v6224_v46 = vld [vmem:[%s8941_s12 + $0x79] sm:$0xff] }
  0xbd   : > { %7833 = vmatprep.subr.mxu0 %v6212_v48  ;;  %7907 = vmatprep.subr.mxu1 %v6263_v52 }
  0xbe   : > { %7708 = vmatmul.mubr.f32.gmra.mxu0 %v9056_v0  ;;  %7908 = vmatpush3.msra.mxu1 %v6263_v52  ;;  %v6261_v0 = vld [vmem:[%s12108_s1 + $0x3d8] sm:$0xff] }
  0xbf   : > { %7788 = vmatmul.mubr.f32.gmra.mxu1 %v9371_v61  ;;  %7710 = vmatprep.mubr.f32.mxu0 %v9062_v2  ;;  %v6209_v2 = vld [vmem:[%s12108_s1 + $0x338] sm:$0xff] }
  0xc0   : > { %7790 = vmatprep.mubr.f32.mxu1 %v9375_v34  ;;  %7834 = vmatpush3.msra.mxu0 %v6212_v48  ;;  %v6313_v61 = vld [vmem:[%s12108_s1 + $0x478] sm:$0xff]  ;;  %v6250_v34 = vld [vmem:[%s12108_s1 + $0x380] sm:$0xff] }
  0xc1   : > { %7835 = vmatprep.subr.mxu0 %v6211_v54  ;;  %7909 = vmatprep.subr.mxu1 %v6262_v58 }
  0xc2   : > { %7711 = vmatmul.mubr.f32.gmra.mxu0 %v9078_v6  ;;  %7910 = vmatpush3.msra.mxu1 %v6262_v58  ;;  %v6260_v6 = vld [vmem:[%s12108_s1 + $0x3d0] sm:$0xff] }
  0xc3   : > { %7791 = vmatmul.mubr.f32.gmra.mxu1 %v9387_v3  ;;  %7713 = vmatprep.mubr.f32.mxu0 %v9084_v8  ;;  %v6208_v8 = vld [vmem:[%s12108_s1 + $0x330] sm:$0xff] }
  0xc4   : > { %7793 = vmatprep.mubr.f32.mxu1 %v9391_v22  ;;  %7836 = vmatpush3.msra.mxu0 %v6211_v54  ;;  %v6218_v3 = vld [vmem:[%s8941_s12 + $0x31] sm:$0xff] }
  0xc5   : > { %7837 = vmatprep.subr.mxu0 %v6210_v60  ;;  %7911 = vmatprep.subr.mxu1 %v6261_v0  ;;  %v6171_v22 = vld [vmem:[%s8941_s12 + $0x38] sm:$0xff] }
  0xc6   : > { %7714 = vmatmul.mubr.f32.gmra.mxu0 %v9100_v12  ;;  %7912 = vmatpush3.msra.mxu1 %v6261_v0  ;;  %v6259_v12 = vld [vmem:[%s12108_s1 + $0x3c8] sm:$0xff]  ;;  %v6309_v54 = vld [vmem:[%s12108_s1 + $0x458] sm:$0xff] }
  0xc7   : > { %7794 = vmatmul.mubr.f32.gmra.mxu1 %v9403_v9  ;;  %7716 = vmatprep.mubr.f32.mxu0 %v9106_v14  ;;  %v6207_v14 = vld [vmem:[%s12108_s1 + $0x328] sm:$0xff]  ;;  %v6219_v9 = vld [vmem:[%s8941_s12 + $0x39] sm:$0xff] }
  0xc8   : > { %7796 = vmatprep.mubr.f32.mxu1 %v9407_v16  ;;  %7838 = vmatpush3.msra.mxu0 %v6210_v60  ;;  %v6172_v16 = vld [vmem:[%s8941_s12 + $0x48] sm:$0xff]  ;;  %v6177_v60 = vld [vmem:[%s8941_s12 + $0x80] sm:$0xff] }
  0xc9   : > { %7839 = vmatprep.subr.mxu0 %v6209_v2  ;;  %7913 = vmatprep.subr.mxu1 %v6260_v6 }
  0xca   : > { %7717 = vmatmul.mubr.f32.gmra.mxu0 %v9122_v18  ;;  %7914 = vmatpush3.msra.mxu1 %v6260_v6  ;;  %v6258_v18 = vld [vmem:[%s12108_s1 + $0x3c0] sm:$0xff] }
  0xcb   : > { %7797 = vmatmul.mubr.f32.gmra.mxu1 %v9419_v15  ;;  %7719 = vmatprep.mubr.f32.mxu0 %v9128_v20  ;;  %v6206_v20 = vld [vmem:[%s12108_s1 + $0x320] sm:$0xff]  ;;  %v6312_v15 = vld [vmem:[%s12108_s1 + $0x470] sm:$0xff] }
  0xcc   : > { %7799 = vmatprep.mubr.f32.mxu1 %v9423_v47  ;;  %7840 = vmatpush3.msra.mxu0 %v6209_v2  ;;  %v6225_v6 = vld [vmem:[%s8941_s12 + $0x81] sm:$0xff] }
  0xcd   : > { %7841 = vmatprep.subr.mxu0 %v6208_v8  ;;  %7915 = vmatprep.subr.mxu1 %v6259_v12 }
  0xce   : > { %7720 = vmatmul.mubr.f32.gmra.mxu0 %v9144_v24  ;;  %7916 = vmatpush3.msra.mxu1 %v6259_v12  ;;  %v6257_v24 = vld [vmem:[%s12108_s1 + $0x3b8] sm:$0xff] }
  0xcf   : > { %7800 = vmatmul.mubr.f32.gmra.mxu1 %v9435_v21  ;;  %7722 = vmatprep.mubr.f32.mxu0 %v9150_v26  ;;  %v6205_v26 = vld [vmem:[%s12108_s1 + $0x318] sm:$0xff] }
  0xd0   : > { %7802 = vmatprep.mubr.f32.mxu1 %v9439_v53  ;;  %7842 = vmatpush3.msra.mxu0 %v6208_v8  ;;  %v6220_v53 = vld [vmem:[%s8941_s12 + $0x49] sm:$0xff] }
  0xd1   : > { %7843 = vmatprep.subr.mxu0 %v6207_v14  ;;  %7917 = vmatprep.subr.mxu1 %v6258_v18  ;;  %v6178_v8 = vld [vmem:[%s8941_s12 + $0x90] sm:$0xff] }
  0xd2   : > { %7723 = vmatmul.mubr.f32.gmra.mxu0 %v9166_v30  ;;  %7918 = vmatpush3.msra.mxu1 %v6258_v18  ;;  %v6256_v30 = vld [vmem:[%s12108_s1 + $0x3b0] sm:$0xff] }
  0xd3   : > { %7803 = vmatmul.mubr.f32.gmra.mxu1 %v9451_v27  ;;  %7725 = vmatprep.mubr.f32.mxu0 %v9172_v32  ;;  %v6204_v32 = vld [vmem:[%s12108_s1 + $0x310] sm:$0xff] }
  0xd4   : > { %7805 = vmatprep.mubr.f32.mxu1 %v9455_v59  ;;  %7844 = vmatpush3.msra.mxu0 %v6207_v14  ;;  %v6173_v59 = vld [vmem:[%s8941_s12 + $0x50] sm:$0xff] }
  0xd5   : > { %7845 = vmatprep.subr.mxu0 %v6206_v20  ;;  %7919 = vmatprep.subr.mxu1 %v6257_v24  ;;  %v6226_v14 = vld [vmem:[%s8941_s12 + $0x91] sm:$0xff] }
  0xd6   : > { %7726 = vmatmul.mubr.f32.gmra.mxu0 %v9188_v36  ;;  %7920 = vmatpush3.msra.mxu1 %v6257_v24  ;;  %v6255_v36 = vld [vmem:[%s12108_s1 + $0x3a8] sm:$0xff]  ;;  %v6308_v24 = vld [vmem:[%s12108_s1 + $0x450] sm:$0xff] }
  0xd7   : > { %7806 = vmatmul.mubr.f32.gmra.mxu1 %v9467_v33  ;;  %7728 = vmatprep.mubr.f32.mxu0 %v9194_v40  ;;  %v6203_v40 = vld [vmem:[%s12108_s1 + $0x308] sm:$0xff] }
  0xd8   : > { %7808 = vmatprep.mubr.f32.mxu1 %v9471_v1  ;;  %7846 = vmatpush3.msra.mxu0 %v6206_v20  ;;  %v6311_v33 = vld [vmem:[%s12108_s1 + $0x468] sm:$0xff] }
  0xd9   : > { %7847 = vmatprep.subr.mxu0 %v6205_v26  ;;  %7921 = vmatprep.subr.mxu1 %v6256_v30 }
  0xda   : > { %7729 = vmatmul.mubr.f32.gmra.mxu0 %v9210_v56  ;;  %7922 = vmatpush3.msra.mxu1 %v6256_v30  ;;  %v6254_v56 = vld [vmem:[%s12108_s1 + $0x3a0] sm:$0xff]  ;;  %v6179_v30 = vld [vmem:[%s8941_s12 + $0x98] sm:$0xff] }
  0xdb   : > { %7809 = vmatmul.mubr.f32.gmra.mxu1 %v9483_v45  ;;  %7731 = vmatprep.mubr.f32.mxu0 %v9216_v62  ;;  %v12123_v62 = vld [vmem:[#allocation3_spill] sm:$0xff] }
  0xdc   : > { %7811 = vmatprep.mubr.f32.mxu1 %v9487_v7  ;;  %7848 = vmatpush3.msra.mxu0 %v6205_v26  ;;  %v6221_v7 = vld [vmem:[%s8941_s12 + $0x51] sm:$0xff] }
  0xdd   : > { %7849 = vmatprep.subr.mxu0 %v6204_v32  ;;  %7923 = vmatprep.subr.mxu1 %v6255_v36 }
  0xde   : > { %7732 = vmatmul.mubr.f32.gmra.mxu0 %v9232_v10  ;;  %7924 = vmatpush3.msra.mxu1 %v6255_v36  ;;  %v12124_v10 = vld [vmem:[#allocation4_spill] sm:$0xff] }
  0xdf   : > { %7812 = vmatmul.mubr.f32.gmra.mxu1 %v9499_v63  ;;  %7734 = vmatprep.mubr.f32.mxu0 %v12123_v62  ;;  %v6174_v63 = vld [vmem:[%s8941_s12 + $0x60] sm:$0xff] }
  0xe0   : > { %7814 = vmatprep.mubr.f32.mxu1 %v9503_v13  ;;  %7850 = vmatpush3.msra.mxu0 %v6204_v32 }
  0xe1   : > { %7851 = vmatprep.subr.mxu0 %v6203_v40  ;;  %7925 = vmatprep.subr.mxu1 %v6254_v56 }
  0xe2   : > { %7735 = vmatmul.mubr.f32.gmra.mxu0 %v12124_v10  ;;  %7926 = vmatpush3.msra.mxu1 %v6254_v56  ;;  %v6180_v56 = vld [vmem:[%s8941_s12 + $0xa8] sm:$0xff] }
  0xe3   : > { %7815 = vmatmul.mubr.f32.gmra.mxu1 %v9515_v17  ;;  %7737 = vmatprep.mubr.f32.mxu0 %v12125_v38  ;;  %v6222_v17 = vld [vmem:[%s8941_s12 + $0x61] sm:$0xff]  ;;  %v6228_v10 = vld [vmem:[%s8941_s12 + $0xa9] sm:$0xff] }
  0xe4   : > { %7817 = vmatprep.mubr.f32.mxu1 %v9519_v19  ;;  %7852 = vmatpush3.msra.mxu0 %v6203_v40  ;;  %v6227_v40 = vld [vmem:[%s8941_s12 + $0x99] sm:$0xff]  ;;  %v6307_v38 = vld [vmem:[%s12108_s1 + $0x448] sm:$0xff] }
  0xe5   : > { %7927 = vmatprep.subr.mxu1 %v6253_v50  ;;  %7853 = vmatprep.subr.mxu0 %v6202_v23 }
  0xe6   : > { %7738 = vmatmul.mubr.f32.gmra.mxu0 %v9276_v4  ;;  %7928 = vmatpush3.msra.mxu1 %v6253_v50  ;;  %v6170_v4 = vld [vmem:[%s8941_s12 + $0x30] sm:$0xff] }
  0xe7   : > { %7818 = vmatmul.mubr.f32.gmra.mxu1 %v9531_v29  ;;  %7740 = vmatprep.mubr.f32.mxu0 %v9691_v28 }
  0xe8   : > { %7929 = vmatprep.subr.mxu1 %v6252_v44  ;;  %7820 = vmatprep.mubr.f32.mxu1 %v9697_v49 }
  0xe9   : > { %7854 = vmatpush3.msra.mxu0 %v6202_v23  ;;  %7930 = vmatpush3.msra.mxu1 %v6252_v44 }
  0xea   : > { %7741 = vmatmul.mubr.f32.gmra.mxu0 %v9703_v51  ;;  %7931 = vmatprep.subr.mxu1 %v6251_v55 }
  0xeb   : > { %7821 = vmatmul.mubr.f32.gmra.mxu1 %v9710_v42  ;;  %7855 = vmatprep.mubr.f32.mxu0 %v6170_v4 }
  0xec   : > { %7932 = vmatpush3.msra.mxu1 %v6251_v55  ;;  %7983 = vmatprep.subr.mxu0 %v6313_v61  ;;  %v6181_v55 = vld [vmem:[%s8941_s12 + $0xb0] sm:$0xff] }
  0xed   : > { %7933 = vmatprep.subr.mxu1 %v6250_v34  ;;  %7935 = vmatprep.mubr.f32.mxu1 %v6218_v3  ;;  %v7377_v47 = vpop.f32.mrf.mxu0  ;;  %v6182_v3 = vld [vmem:[%s8941_s12 + $0xc0] sm:$0xff] }
  0xee   : > { %v7457_v21 = vpop.f32.mrf.mxu1  ;;  %7856 = vmatmul.mubr.f32.vlgmr.msra.gmra.mxu0 %v6171_v22  ;;  %7934 = vmatpush3.msra.mxu1 %v6250_v34  ;;  %v6229_v34 = vld [vmem:[%s8941_s12 + $0xb1] sm:$0xff] }
  0xef   : > { %v9729_v27 = vadd.f32 %v7457_v21, %v7377_v47  ;;  %7984 = vmatpush3.msra.mxu0 %v6313_v61  ;;  %7936 = vmatmul.mubr.f32.vlgmr.msra.gmra.mxu1 %v6219_v9  ;;  %v388_v1 = vpop.f32.mrf.mxu0  ;;  %v6230_v9 = vld [vmem:[%s8941_s12 + $0xc1] sm:$0xff] }
  0xf0   : > { %v613_v45 = vpop.f32.mrf.mxu1  ;;  %7858 = vmatprep.mubr.f32.mxu0 %v6172_v16  ;;  %7985 = vmatprep.subr.mxu0 %v6312_v15  ;;  %v6306_v47 = vld [vmem:[%s12108_s1 + $0x440] sm:$0xff] }
  0xf1   : > { %v9737_v13 = vadd.f32 %v613_v45, %v388_v1  ;;  %7938 = vmatprep.mubr.f32.mxu1 %v6220_v53  ;;  %7986 = vmatpush3.msra.mxu0 %v6312_v15  ;;  %v7380_v19 = vpop.f32.mrf.mxu0  ;;  %v6183_v53 = vld [vmem:[%s8941_s12 + $0xc8] sm:$0xff]  ;;  %v6184_v45 = vld [vmem:[%s8941_s12 + $0xd8] sm:$0xff] }
  0xf2   : > { %v7460_v29 = vpop.f32.mrf.mxu1  ;;  %7859 = vmatmul.mubr.f32.gmra.mxu0 %v6173_v59  ;;  %7987 = vmatprep.subr.mxu0 %v6311_v33  ;;  %v6231_v1 = vld [vmem:[%s8941_s12 + $0xc9] sm:$0xff] }
  0xf3   : > { %v9743_v11 = vadd.f32 %v7460_v29, %v7380_v19  ;;  %7939 = vmatmul.mubr.f32.gmra.mxu1 %v6221_v7  ;;  %7861 = vmatprep.mubr.f32.mxu0 %v6174_v63  ;;  %v398_v31 = vpop.f32.mrf.mxu0  ;;  %v6232_v63 = vld [vmem:[%s8941_s12 + $0xd9] sm:$0xff] }
  0xf4   : > { %v623_v39 = vpop.f32.mrf.mxu1  ;;  %7941 = vmatprep.mubr.f32.mxu1 %v6222_v17  ;;  %7988 = vmatpush3.msra.mxu0 %v6311_v33  ;;  %v6305_v29 = vld [vmem:[%s12108_s1 + $0x438] sm:$0xff] }
  0xf5   : > { %v9748_v43 = vadd.f32 %v623_v39, %v398_v31  ;;  %7989 = vmatprep.subr.mxu0 %v6310_v35 }
  0xf6   : > { %v7383_v48 = vpop.f32.mrf.mxu0  ;;  %v7463_v52 = vpop.f32.mrf.mxu1  ;;  %7862 = vmatmul.mubr.f32.gmra.mxu0 %v6175_v5  ;;  %v6185_v5 = vld [vmem:[%s8941_s12 + $0xe0] sm:$0xff] }
  0xf7   : > { %v9754_v58 = vadd.f32 %v7463_v52, %v7383_v48  ;;  %7942 = vmatmul.mubr.f32.gmra.mxu1 %v6223_v37  ;;  %7864 = vmatprep.mubr.f32.mxu0 %v6176_v41  ;;  %v6233_v37 = vld [vmem:[%s8941_s12 + $0xe1] sm:$0xff]  ;;  %v6186_v41 = vld [vmem:[%s8941_s12 + $0xf0] sm:$0xff] }
  0xf8   : > { %v408_v0 = vpop.f32.mrf.mxu0  ;;  %v633_v2 = vpop.f32.mrf.mxu1  ;;  %7944 = vmatprep.mubr.f32.mxu1 %v6224_v46  ;;  %7990 = vmatpush3.msra.mxu0 %v6310_v35  ;;  %v6234_v48 = vld [vmem:[%s8941_s12 + $0xf1] sm:$0xff] }
  0xf9   : > { %v9759_v12 = vadd.f32 %v633_v2, %v408_v0  ;;  %7991 = vmatprep.subr.mxu0 %v6309_v54  ;;  %v6187_v2 = vld [vmem:[%s8941_s12 + $0xf8] sm:$0xff] }
  0xfa   : > { %v7386_v18 = vpop.f32.mrf.mxu0  ;;  %v7466_v20 = vpop.f32.mrf.mxu1  ;;  %7865 = vmatmul.mubr.f32.gmra.mxu0 %v6177_v60  ;;  %v6304_v60 = vld [vmem:[%s12108_s1 + $0x430] sm:$0xff] }
  0xfb   : > { %v9765_v26 = vadd.f32 %v7466_v20, %v7386_v18  ;;  %7945 = vmatmul.mubr.f32.gmra.mxu1 %v6225_v6  ;;  %7867 = vmatprep.mubr.f32.mxu0 %v6178_v8  ;;  %v6188_v18 = vld [vmem:[%s8941_s12 + $0x108] sm:$0xff] }
  0xfc   : > { %v418_v32 = vpop.f32.mrf.mxu0  ;;  %v643_v36 = vpop.f32.mrf.mxu1  ;;  %7947 = vmatprep.mubr.f32.mxu1 %v6226_v14  ;;  %7992 = vmatpush3.msra.mxu0 %v6309_v54  ;;  %v6235_v14 = vld [vmem:[%s8941_s12 + $0xf9] sm:$0xff] }
  0xfd   : > { %v9770_v62 = vadd.f32 %v643_v36, %v418_v32  ;;  %7993 = vmatprep.subr.mxu0 %v6308_v24  ;;  %v6303_v36 = vld [vmem:[%s12108_s1 + $0x428] sm:$0xff] }
  0xfe   : > { %v7389_v50 = vpop.f32.mrf.mxu0  ;;  %v7469_v23 = vpop.f32.mrf.mxu1  ;;  %7868 = vmatmul.mubr.f32.gmra.mxu0 %v6179_v30 }
  0xff   : > { %v9776_v44 = vadd.f32 %v7469_v23, %v7389_v50  ;;  %7948 = vmatmul.mubr.f32.gmra.mxu1 %v6227_v40  ;;  %7870 = vmatprep.mubr.f32.mxu0 %v6180_v56  ;;  %v6189_v56 = vld [vmem:[%s8941_s12 + $0x110] sm:$0xff] }
 0x100   : > { %v428_v4 = vpop.f32.mrf.mxu0  ;;  %v653_v61 = vpop.f32.mrf.mxu1  ;;  %7950 = vmatprep.mubr.f32.mxu1 %v6228_v10  ;;  %7994 = vmatpush3.msra.mxu0 %v6308_v24  ;;  %v6236_v24 = vld [vmem:[%s8941_s12 + $0x109] sm:$0xff]  ;;  %v6237_v23 = vld [vmem:[%s8941_s12 + $0x111] sm:$0xff] }
 0x101   : > { %v9781_v22 = vadd.f32 %v653_v61, %v428_v4  ;;  %7995 = vmatprep.subr.mxu0 %v6307_v38 }
 0x102   : > { %v7392_v16 = vpop.f32.mrf.mxu0  ;;  %v7472_v15 = vpop.f32.mrf.mxu1  ;;  %7871 = vmatmul.mubr.f32.gmra.mxu0 %v6181_v55  ;;  %v6238_v55 = vld [vmem:[%s8941_s12 + $0x121] sm:$0xff] }
 0x103   : > { %v9787_v21 = vadd.f32 %v7472_v15, %v7392_v16  ;;  %7951 = vmatmul.mubr.f32.gmra.mxu1 %v6229_v34  ;;  %7873 = vmatprep.mubr.f32.mxu0 %v6182_v3  ;;  %v6302_v34 = vld [vmem:[%s12108_s1 + $0x420] sm:$0xff] }
 0x104   : > { %v438_v59 = vpop.f32.mrf.mxu0  ;;  %v663_v33 = vpop.f32.mrf.mxu1  ;;  %7953 = vmatprep.mubr.f32.mxu1 %v6230_v9  ;;  %7996 = vmatpush3.msra.mxu0 %v6307_v38  ;;  %v6190_v38 = vld [vmem:[%s8941_s12 + $0x120] sm:$0xff]  ;;  %v6191_v9 = vld [vmem:[%s8941_s12 + $0x128] sm:$0xff] }
 0x105   : > { %v9792_v7 = vadd.f32 %v663_v33, %v438_v59  ;;  %7997 = vmatprep.subr.mxu0 %v6306_v47  ;;  %v6240_v59 = vld [vmem:[%s8941_s12 + $0x139] sm:$0xff] }
 0x106   : > { %v7395_v17 = vpop.f32.mrf.mxu0  ;;  %v7475_v19 = vpop.f32.mrf.mxu1  ;;  %7874 = vmatmul.mubr.f32.gmra.mxu0 %v6183_v53  ;;  %v6192_v53 = vld [vmem:[%s8941_s12 + $0x138] sm:$0xff] }
 0x107   : > { %v9798_v35 = vadd.f32 %v7475_v19, %v7395_v17  ;;  %7954 = vmatmul.mubr.f32.gmra.mxu1 %v6231_v1  ;;  %7876 = vmatprep.mubr.f32.mxu0 %v6184_v45  ;;  %v6301_v45 = vld [vmem:[%s12108_s1 + $0x418] sm:$0xff]  ;;  %v6193_v17 = vld [vmem:[%s8941_s12 + $0x140] sm:$0xff] }
 0x108   : > { %v448_v31 = vpop.f32.mrf.mxu0  ;;  %v673_v39 = vpop.f32.mrf.mxu1  ;;  %7956 = vmatprep.mubr.f32.mxu1 %v6232_v63  ;;  %7998 = vmatpush3.msra.mxu0 %v6306_v47  ;;  %v6239_v47 = vld [vmem:[%s8941_s12 + $0x129] sm:$0xff] }
 0x109   : > { %v9803_v46 = vadd.f32 %v673_v39, %v448_v31  ;;  %7999 = vmatprep.subr.mxu0 %v6305_v29  ;;  %v6194_v31 = vld [vmem:[%s8941_s12 + $0x150] sm:$0xff] }
 0x10a   : > { %v7398_v52 = vpop.f32.mrf.mxu0  ;;  %v7478_v54 = vpop.f32.mrf.mxu1  ;;  %7877 = vmatmul.mubr.f32.gmra.mxu0 %v6185_v5  ;;  %v6241_v5 = vld [vmem:[%s8941_s12 + $0x141] sm:$0xff]  ;;  %v6242_v39 = vld [vmem:[%s8941_s12 + $0x151] sm:$0xff] }
 0x10b   : > { %v9809_v0 = vadd.f32 %v7478_v54, %v7398_v52  ;;  %7957 = vmatmul.mubr.f32.gmra.mxu1 %v6233_v37  ;;  %7879 = vmatprep.mubr.f32.mxu0 %v6186_v41  ;;  %v6195_v54 = vld [vmem:[%s8941_s12 + $0x158] sm:$0xff] }
 0x10c   : > { %v458_v6 = vpop.f32.mrf.mxu0  ;;  %v683_v8 = vpop.f32.mrf.mxu1  ;;  %7959 = vmatprep.mubr.f32.mxu1 %v6234_v48  ;;  %8000 = vmatpush3.msra.mxu0 %v6305_v29  ;;  %v6300_v48 = vld [vmem:[%s12108_s1 + $0x410] sm:$0xff] }
 0x10d   : > { %v9814_v20 = vadd.f32 %v683_v8, %v458_v6  ;;  %8001 = vmatprep.subr.mxu0 %v6304_v60  ;;  %v6243_v6 = vld [vmem:[%s8941_s12 + $0x159] sm:$0xff]  ;;  %v6196_v8 = vld [vmem:[%s8941_s12 + $0x168] sm:$0xff] }
 0x10e   : > { %v7401_v30 = vpop.f32.mrf.mxu0  ;;  %v7481_v32 = vpop.f32.mrf.mxu1  ;;  %7880 = vmatmul.mubr.f32.gmra.mxu0 %v6187_v2 }
 0x10f   : > { %v9820_v40 = vadd.f32 %v7481_v32, %v7401_v30  ;;  %7960 = vmatmul.mubr.f32.gmra.mxu1 %v6235_v14  ;;  %7882 = vmatprep.mubr.f32.mxu0 %v6188_v18  ;;  %v6244_v14 = vld [vmem:[%s8941_s12 + $0x169] sm:$0xff] }
 0x110   : > { %v9823_v10 = vpop.f32.mrf.mxu0  ;;  %v9825_v50 = vpop.f32.mrf.mxu1  ;;  %7962 = vmatprep.mubr.f32.mxu1 %v6236_v24  ;;  %8002 = vmatpush3.msra.mxu0 %v6304_v60  ;;  %v6299_v30 = vld [vmem:[%s12108_s1 + $0x408] sm:$0xff] }
 0x111   : > { %8003 = vmatprep.subr.mxu0 %v6303_v36 }
 0x112   : > { %v7404_v4 = vpop.f32.mrf.mxu0  ;;  %v7484_v61 = vpop.f32.mrf.mxu1  ;;  %7883 = vmatmul.mubr.f32.gmra.mxu0 %v6189_v56 }
 0x113   : > { %v9833_v3 = vadd.f32 %v7484_v61, %v7404_v4  ;;  %7963 = vmatmul.mubr.f32.gmra.mxu1 %v6237_v23  ;;  %7885 = vmatprep.mubr.f32.mxu0 %v6190_v38  ;;  %v6245_v38 = vld [vmem:[%s8941_s12 + $0x171] sm:$0xff]  ;;  %v6298_v61 = vld [vmem:[%s12108_s1 + $0x400] sm:$0xff] }
 0x114   : > { %v9836_v16 = vpop.f32.mrf.mxu0  ;;  %v9838_v15 = vpop.f32.mrf.mxu1  ;;  %7965 = vmatprep.mubr.f32.mxu1 %v6238_v55  ;;  %8004 = vmatpush3.msra.mxu0 %v6303_v36  ;;  %v6197_v36 = vld [vmem:[%s8941_s12 + $0x170] sm:$0xff] }
 0x115   : > { %8005 = vmatprep.subr.mxu0 %v6302_v34 }
 0x116   : > { %v7407_v33 = vpop.f32.mrf.mxu0  ;;  %v7487_v1 = vpop.f32.mrf.mxu1  ;;  %7886 = vmatmul.mubr.f32.gmra.mxu0 %v6191_v9 }
 0x117   : > { %v9846_v63 = vadd.f32 %v7487_v1, %v7407_v33  ;;  %7966 = vmatmul.mubr.f32.gmra.mxu1 %v6239_v47  ;;  %7888 = vmatprep.mubr.f32.mxu0 %v6192_v53  ;;  %v6200_v53 = vld [vmem:[%s8941_s12 + $0x198] sm:$0xff] }
 0x118   : > { %v9849_v19 = vpop.f32.mrf.mxu0  ;;  %v9851_v29 = vpop.f32.mrf.mxu1  ;;  %7968 = vmatprep.mubr.f32.mxu1 %v6240_v59  ;;  %8006 = vmatpush3.msra.mxu0 %v6302_v34  ;;  %v6248_v59 = vld [vmem:[%s8941_s12 + $0x199] sm:$0xff] }
 0x119   : > { %8007 = vmatprep.subr.mxu0 %v6301_v45 }
 0x11a   : > { %v7410_v37 = vpop.f32.mrf.mxu0  ;;  %v7490_v41 = vpop.f32.mrf.mxu1  ;;  %7889 = vmatmul.mubr.f32.gmra.mxu0 %v6193_v17 }
 0x11b   : > { %v9859_v52 = vadd.f32 %v7490_v41, %v7410_v37  ;;  %7969 = vmatmul.mubr.f32.gmra.mxu1 %v6241_v5  ;;  %7891 = vmatprep.mubr.f32.mxu0 %v6194_v31  ;;  %v6249_v5 = vld [vmem:[%s8941_s12 + $0x1a1] sm:$0xff]  ;;  %v6266_v31 = vld [vmem:[%s8941_s12 + $0x32] sm:$0xff] }
 0x11c   : > { %v9862_v60 = vpop.f32.mrf.mxu0  ;;  %v9864_v2 = vpop.f32.mrf.mxu1  ;;  %7971 = vmatprep.mubr.f32.mxu1 %v6242_v39  ;;  %8008 = vmatpush3.msra.mxu0 %v6301_v45 }
 0x11d   : > { %8009 = vmatprep.subr.mxu0 %v6300_v48 }
 0x11e   : > { %v7413_v18 = vpop.f32.mrf.mxu0  ;;  %v7493_v24 = vpop.f32.mrf.mxu1  ;;  %7892 = vmatmul.mubr.f32.gmra.mxu0 %v6195_v54 }
 0x11f   : > { %v9872_v32 = vadd.f32 %v7493_v24, %v7413_v18  ;;  %7972 = vmatmul.mubr.f32.gmra.mxu1 %v6243_v6  ;;  %7894 = vmatprep.mubr.f32.mxu0 %v6196_v8  ;;  %v6269_v18 = vld [vmem:[%s8941_s12 + $0x52] sm:$0xff] }
 0x120   : > { %v9875_v56 = vpop.f32.mrf.mxu0  ;;  %v9877_v23 = vpop.f32.mrf.mxu1  ;;  %7974 = vmatprep.mubr.f32.mxu1 %v6244_v14  ;;  %8010 = vmatpush3.msra.mxu0 %v6300_v48  ;;  %v6268_v48 = vld [vmem:[%s8941_s12 + $0x4a] sm:$0xff] }
 0x121   : > { %8011 = vmatprep.subr.mxu0 %v6299_v30 }
 0x122   : > { %v7416_v55 = vpop.f32.mrf.mxu0  ;;  %v7496_v4 = vpop.f32.mrf.mxu1  ;;  %7895 = vmatmul.mubr.f32.gmra.mxu0 %v6197_v36 }
 0x123   : > { %v9883_v34 = vadd.f32 %v7496_v4, %v7416_v55  ;;  %7975 = vmatmul.mubr.f32.gmra.mxu1 %v6245_v38  ;;  %7897 = vmatprep.mubr.f32.mxu0 %v9525_v57  ;;  %v6201_v57 = vld [vmem:[%s8941_s12 + $0x1a0] sm:$0xff] }
 0x124   : > { %v9886_v9 = vpop.f32.mrf.mxu0  ;;  %v9888_v47 = vpop.f32.mrf.mxu1  ;;  %7977 = vmatprep.mubr.f32.mxu1 %v9691_v28  ;;  %8012 = vmatpush3.msra.mxu0 %v6299_v30  ;;  %v6270_v30 = vld [vmem:[%s8941_s12 + $0x62] sm:$0xff] }
 0x125   : > { %12126 = vst [vmem:[#allocation3_spill] sm:$0xff] %v9886_v9  ;;  %12127 = vst [vmem:[#allocation4_spill] sm:$0xff] %v9888_v47  ;;  %8013 = vmatprep.subr.mxu0 %v6298_v61 }
 0x126   : > { %v7419_v33 = vpop.f32.mrf.mxu0  ;;  %v7499_v1 = vpop.f32.mrf.mxu1  ;;  %7898 = vmatmul.mubr.f32.gmra.mxu0 %v9538_v25 }
 0x127   : > { %v9894_v45 = vadd.f32 %v7499_v1, %v7419_v33  ;;  %7978 = vmatmul.mubr.f32.gmra.mxu1 %v9703_v51  ;;  %7900 = vmatprep.mubr.f32.mxu0 %v6200_v53  ;;  %v6267_v51 = vld [vmem:[%s8941_s12 + $0x3a] sm:$0xff]  ;;  %v6271_v53 = vld [vmem:[%s8941_s12 + $0x6a] sm:$0xff] }
 0x128   : > { %v9898_v17 = vpop.f32.mrf.mxu0  ;;  %v9900_v28 = vpop.f32.mrf.mxu1  ;;  %7980 = vmatprep.mubr.f32.mxu1 %v6248_v59  ;;  %8014 = vmatpush3.msra.mxu0 %v6298_v61  ;;  %v6272_v33 = vld [vmem:[%s8941_s12 + $0x7a] sm:$0xff] }
 0x129   : > { %12128 = vst [vmem:[#allocation5_spill] sm:$0xff] %v9898_v17  ;;  %12129 = vst [vmem:[#allocation6_spill] sm:$0xff] %v9900_v28 }
 0x12a   : > { %v7422_v39 = vpop.f32.mrf.mxu0  ;;  %v7502_v37 = vpop.f32.mrf.mxu1  ;;  %7901 = vmatmul.mubr.f32.gmra.mxu0 %v6201_v57 }
 0x12b   : > { %v9904_v25 = vadd.f32 %v7502_v37, %v7422_v39  ;;  %7981 = vmatmul.mubr.f32.gmra.mxu1 %v6249_v5  ;;  %8015 = vmatprep.mubr.f32.mxu0 %v6266_v31  ;;  %v6273_v39 = vld [vmem:[%s8941_s12 + $0x82] sm:$0xff] }
 0x12c   : > { %v9907_v41 = vpop.f32.mrf.mxu0  ;;  %v9910_v54 = vpop.f32.mrf.mxu1 }
 0x12d   : > { %12130 = vst [vmem:[#allocation7_spill] sm:$0xff] %v9907_v41  ;;  %12131 = vst [vmem:[#allocation8_spill] sm:$0xff] %v9910_v54 }
 0x12e   : > { %v7537_v6 = vpop.f32.mrf.mxu0  ;;  %8016 = vmatmul.mubr.f32.vlgmr.msra.gmra.mxu0 %v6267_v51  ;;  %v7617_v14 = vpop.f32.mrf.mxu1  ;;  %v6274_v51 = vld [vmem:[%s8941_s12 + $0x92] sm:$0xff] }
 0x12f   : > { %v1047_v8 = vadd.f32 %v7537_v6, %v9729_v27  ;;  %8018 = vmatprep.mubr.f32.mxu0 %v6268_v48 }
 0x130   : > { %v887_v24 = vpop.f32.mrf.mxu0  ;;  %v9920_v55 = vpop.f32.mrf.mxu1 }
 0x131   : > { %v9916_v36 = vadd.f32 %v887_v24, %v9737_v13  ;;  %v9918_v38 = vadd.f32 %v7617_v14, %v1047_v8 }
 0x132   : > { %v7540_v4 = vpop.f32.mrf.mxu0  ;;  %8019 = vmatmul.mubr.f32.gmra.mxu0 %v6269_v18 }
 0x133   : > { %v1049_v61 = vadd.f32 %v7540_v4, %v9743_v11  ;;  %v7620_v27 = vpop.f32.mrf.mxu1  ;;  %8021 = vmatprep.mubr.f32.mxu0 %v6270_v30  ;;  %v6276_v30 = vld [vmem:[%s8941_s12 + $0xaa] sm:$0xff] }
 0x134   : > { %v897_v59 = vpop.f32.mrf.mxu0 }
 0x135   : > { %v9926_v1 = vadd.f32 %v897_v59, %v9748_v43  ;;  %v9928_v13 = vadd.f32 %v7620_v27, %v1049_v61  ;;  %v9930_v57 = vpop.f32.mrf.mxu1  ;;  %v6330_v27 = vld [vmem:[%s12110_s3 + $0xf8] sm:$0xff] }
 0x136   : > { %v7543_v5 = vpop.f32.mrf.mxu0  ;;  %8022 = vmatmul.mubr.f32.gmra.mxu0 %v6271_v53  ;;  %8063 = vmatprep.subr.mxu1 %v6330_v27 }
 0x137   : > { %v1051_v31 = vadd.f32 %v7543_v5, %v9754_v58  ;;  %v7623_v11 = vpop.f32.mrf.mxu1  ;;  %8024 = vmatprep.mubr.f32.mxu0 %v6272_v33  ;;  %v6275_v58 = vld [vmem:[%s8941_s12 + $0x9a] sm:$0xff]  ;;  %v6277_v33 = vld [vmem:[%s8941_s12 + $0xb2] sm:$0xff]  ;;  %8064 = vmatpush3.msra.mxu1 %v6330_v27  ;;  %v6278_v5 = vld [vmem:[%s8941_s12 + $0xc2] sm:$0xff] }
 0x138   : > { %v907_v37 = vpop.f32.mrf.mxu0  ;;  %v6328_v27 = vld [vmem:[%s12110_s3 + $0xe8] sm:$0xff] }
 0x139   : > { %v9936_v48 = vadd.f32 %v907_v37, %v9759_v12  ;;  %v9938_v43 = vadd.f32 %v7623_v11, %v1051_v31  ;;  %v9940_v6 = vpop.f32.mrf.mxu1  ;;  %v6329_v37 = vld [vmem:[%s12110_s3 + $0xf0] sm:$0xff] }
 0x13a   : > { %v7546_v8 = vpop.f32.mrf.mxu0  ;;  %8025 = vmatmul.mubr.f32.gmra.mxu0 %v6273_v39  ;;  %8065 = vmatprep.subr.mxu1 %v6329_v37 }
 0x13b   : > { %v1053_v14 = vadd.f32 %v7546_v8, %v9765_v26  ;;  %v7626_v18 = vpop.f32.mrf.mxu1  ;;  %8027 = vmatprep.mubr.f32.mxu0 %v6274_v51  ;;  %8066 = vmatpush3.msra.mxu1 %v6329_v37 }
 0x13c   : > { %v917_v24 = vpop.f32.mrf.mxu0  ;;  %8067 = vmatprep.subr.mxu1 %v6328_v27 }
 0x13d   : > { %v9946_v4 = vadd.f32 %v917_v24, %v9770_v62  ;;  %v9948_v12 = vadd.f32 %v7626_v18, %v1053_v14  ;;  %v9950_v61 = vpop.f32.mrf.mxu1  ;;  %v6279_v14 = vld [vmem:[%s8941_s12 + $0xca] sm:$0xff]  ;;  %v6280_v18 = vld [vmem:[%s8941_s12 + $0xda] sm:$0xff]  ;;  %8068 = vmatpush3.msra.mxu1 %v6328_v27 }
 0x13e   : > { %v7549_v53 = vpop.f32.mrf.mxu0  ;;  %8028 = vmatmul.mubr.f32.gmra.mxu0 %v6275_v58 }
 0x13f   : > { %v1055_v26 = vadd.f32 %v7549_v53, %v9776_v44  ;;  %v7629_v59 = vpop.f32.mrf.mxu1  ;;  %8030 = vmatprep.mubr.f32.mxu0 %v6276_v30 }
 0x140   : > { %v927_v62 = vpop.f32.mrf.mxu0 }
 0x141   : > { %v9959_v31 = vadd.f32 %v927_v62, %v9781_v22  ;;  %v9961_v11 = vadd.f32 %v7629_v59, %v1055_v26  ;;  %v9963_v39 = vpop.f32.mrf.mxu1  ;;  %v6281_v59 = vld [vmem:[%s8941_s12 + $0xe2] sm:$0xff] }
 0x142   : > { %v7552_v44 = vpop.f32.mrf.mxu0  ;;  %8031 = vmatmul.mubr.f32.gmra.mxu0 %v6277_v33  ;;  %v6282_v33 = vld [vmem:[%s8941_s12 + $0xf2] sm:$0xff] }
 0x143   : > { %v1057_v51 = vadd.f32 %v7552_v44, %v9787_v21  ;;  %v7632_v8 = vpop.f32.mrf.mxu1  ;;  %8033 = vmatprep.mubr.f32.mxu0 %v6278_v5  ;;  %v6327_v44 = vld [vmem:[%s12110_s3 + $0xe0] sm:$0xff] }
 0x144   : > { %v937_v22 = vpop.f32.mrf.mxu0  ;;  %8069 = vmatprep.subr.mxu1 %v6327_v44 }
 0x145   : > { %v9972_v58 = vadd.f32 %v937_v22, %v9792_v7  ;;  %v9974_v24 = vadd.f32 %v7632_v8, %v1057_v51  ;;  %v9976_v30 = vpop.f32.mrf.mxu1  ;;  %8070 = vmatpush3.msra.mxu1 %v6327_v44  ;;  %v6284_v22 = vld [vmem:[%s8941_s12 + $0x10a] sm:$0xff]  ;;  %v6286_v44 = vld [vmem:[%s8941_s12 + $0x122] sm:$0xff] }
 0x146   : > { %v7555_v21 = vpop.f32.mrf.mxu0  ;;  %8034 = vmatmul.mubr.f32.gmra.mxu0 %v6279_v14  ;;  %v6283_v14 = vld [vmem:[%s8941_s12 + $0xfa] sm:$0xff] }
 0x147   : > { %v1059_v53 = vadd.f32 %v7555_v21, %v9798_v35  ;;  %v7635_v26 = vpop.f32.mrf.mxu1  ;;  %8036 = vmatprep.mubr.f32.mxu0 %v6280_v18 }
 0x148   : > { %v947_v7 = vpop.f32.mrf.mxu0 }
 0x149   : > { %v9985_v62 = vadd.f32 %v947_v7, %v9803_v46  ;;  %v9987_v5 = vadd.f32 %v7635_v26, %v1059_v53  ;;  %v9989_v37 = vpop.f32.mrf.mxu1  ;;  %v6326_v53 = vld [vmem:[%s12110_s3 + $0xd8] sm:$0xff]  ;;  %v694_v26 = vadd.f32 %v9825_v50, %v9823_v10  ;;  %v6325_v10 = vld [vmem:[%s12110_s3 + $0xd0] sm:$0xff] }
 0x14a   : > { %12133 = vst [vmem:[#allocation10_spill] sm:$0xff] %v9989_v37  ;;  %v7558_v35 = vpop.f32.mrf.mxu0  ;;  %8037 = vmatmul.mubr.f32.gmra.mxu0 %v6281_v59  ;;  %8071 = vmatprep.subr.mxu1 %v6326_v53 }
 0x14b   : > { %12132 = vst [vmem:[#allocation9_spill] sm:$0xff] %v9985_v62  ;;  %v1061_v51 = vadd.f32 %v7558_v35, %v9809_v0  ;;  %v7638_v8 = vpop.f32.mrf.mxu1  ;;  %8039 = vmatprep.mubr.f32.mxu0 %v6282_v33  ;;  %8072 = vmatpush3.msra.mxu1 %v6326_v53 }
 0x14c   : > { %v957_v46 = vpop.f32.mrf.mxu0  ;;  %8073 = vmatprep.subr.mxu1 %v6325_v10 }
 0x14d   : > { %v9998_v18 = vadd.f32 %v957_v46, %v9814_v20  ;;  %v10000_v27 = vadd.f32 %v7638_v8, %v1061_v51  ;;  %v10002_v21 = vpop.f32.mrf.mxu1  ;;  %v6285_v20 = vld [vmem:[%s8941_s12 + $0x112] sm:$0xff]  ;;  %8074 = vmatpush3.msra.mxu1 %v6325_v10  ;;  %v6289_v10 = vld [vmem:[%s8941_s12 + $0x142] sm:$0xff] }
 0x14e   : > { %12135 = vst [vmem:[#allocation12_spill] sm:$0xff] %v10002_v21  ;;  %v7561_v0 = vpop.f32.mrf.mxu0  ;;  %8040 = vmatmul.mubr.f32.gmra.mxu0 %v6283_v14 }
 0x14f   : > { %12134 = vst [vmem:[#allocation11_spill] sm:$0xff] %v9998_v18  ;;  %v1063_v59 = vadd.f32 %v7561_v0, %v9820_v40  ;;  %v7641_v7 = vpop.f32.mrf.mxu1  ;;  %8042 = vmatprep.mubr.f32.mxu0 %v6284_v22  ;;  %v3121_v40 = vld [vmem:[%s12110_s3 + $0x78] sm:$0xff]  ;;  %v6287_v22 = vld [vmem:[%s8941_s12 + $0x12a] sm:$0xff] }
 0x150   : > { %v967_v33 = vpop.f32.mrf.mxu0  ;;  %v6288_v0 = vld [vmem:[%s8941_s12 + $0x13a] sm:$0xff]  ;;  %8143 = vmatprep.subr.mxu0 %v3121_v40 }
 0x151   : > { %v10012_v35 = vadd.f32 %v967_v33, %v694_v26  ;;  %v10014_v51 = vadd.f32 %v7641_v7, %v1063_v59  ;;  %v10016_v8 = vpop.f32.mrf.mxu1  ;;  %v6324_v7 = vld [vmem:[%s12110_s3 + $0xc8] sm:$0xff]  ;;  %8144 = vmatpush3.msra.mxu0 %v3121_v40 }
 0x152   : > { %12137 = vst [vmem:[#allocation14_spill] sm:$0xff] %v10016_v8  ;;  %v7564_v50 = vpop.f32.mrf.mxu0  ;;  %8043 = vmatmul.mubr.f32.gmra.mxu0 %v6285_v20  ;;  %8075 = vmatprep.subr.mxu1 %v6324_v7 }
 0x153   : > { %12136 = vst [vmem:[#allocation13_spill] sm:$0xff] %v10012_v35  ;;  %v1065_v14 = vadd.f32 %v7564_v50, %v9833_v3  ;;  %v7644_v46 = vpop.f32.mrf.mxu1  ;;  %8045 = vmatprep.mubr.f32.mxu0 %v6286_v44  ;;  %v3120_v3 = vld [vmem:[%s12110_s3 + $0x70] sm:$0xff]  ;;  %8076 = vmatpush3.msra.mxu1 %v6324_v7 }
 0x154   : > { %v10026_v53 = vpop.f32.mrf.mxu0  ;;  %8145 = vmatprep.subr.mxu0 %v3120_v3 }
 0x155   : > { %12138 = vst [vmem:[#allocation15_spill] sm:$0xff] %v10026_v53  ;;  %v10029_v26 = vadd.f32 %v7644_v46, %v1065_v14  ;;  %v10031_v59 = vpop.f32.mrf.mxu1  ;;  %v6290_v14 = vld [vmem:[%s8941_s12 + $0x152] sm:$0xff]  ;;  %8146 = vmatpush3.msra.mxu0 %v3120_v3 }
 0x156   : > { %12139 = vst [vmem:[#allocation16_spill] sm:$0xff] %v10031_v59  ;;  %v7567_v20 = vpop.f32.mrf.mxu0  ;;  %8046 = vmatmul.mubr.f32.gmra.mxu0 %v6287_v22  ;;  %v6323_v22 = vld [vmem:[%s12110_s3 + $0xc0] sm:$0xff] }
 0x157   : > { %v1067_v33 = vadd.f32 %v7567_v20, %v9846_v63  ;;  %v7647_v44 = vpop.f32.mrf.mxu1  ;;  %8048 = vmatprep.mubr.f32.mxu0 %v6288_v0  ;;  %v3119_v63 = vld [vmem:[%s12110_s3 + $0x68] sm:$0xff]  ;;  %8077 = vmatprep.subr.mxu1 %v6323_v22 }
 0x158   : > { %v10041_v50 = vpop.f32.mrf.mxu0  ;;  %8078 = vmatpush3.msra.mxu1 %v6323_v22  ;;  %8147 = vmatprep.subr.mxu0 %v3119_v63 }
 0x159   : > { %12140 = vst [vmem:[#allocation17_spill] sm:$0xff] %v10041_v50  ;;  %v10044_v40 = vadd.f32 %v7647_v44, %v1067_v33  ;;  %v10046_v46 = vpop.f32.mrf.mxu1  ;;  %v6291_v33 = vld [vmem:[%s8941_s12 + $0x15a] sm:$0xff]  ;;  %8148 = vmatpush3.msra.mxu0 %v3119_v63 }
 0x15a   : > { %12141 = vst [vmem:[#allocation18_spill] sm:$0xff] %v10046_v46  ;;  %v7570_v0 = vpop.f32.mrf.mxu0  ;;  %8049 = vmatmul.mubr.f32.gmra.mxu0 %v6289_v10  ;;  %v6292_v46 = vld [vmem:[%s8941_s12 + $0x16a] sm:$0xff]  ;;  %v6322_v10 = vld [vmem:[%s12110_s3 + $0xb8] sm:$0xff] }
 0x15b   : > { %v1069_v7 = vadd.f32 %v7570_v0, %v9859_v52  ;;  %v7650_v20 = vpop.f32.mrf.mxu1  ;;  %8051 = vmatprep.mubr.f32.mxu0 %v6290_v14  ;;  %v3118_v52 = vld [vmem:[%s12110_s3 + $0x60] sm:$0xff]  ;;  %8079 = vmatprep.subr.mxu1 %v6322_v10 }
 0x15c   : > { %v10056_v44 = vpop.f32.mrf.mxu0  ;;  %8080 = vmatpush3.msra.mxu1 %v6322_v10  ;;  %8149 = vmatprep.subr.mxu0 %v3118_v52 }
 0x15d   : > { %12142 = vst [vmem:[#allocation19_spill] sm:$0xff] %v10056_v44  ;;  %v10059_v50 = vadd.f32 %v7650_v20, %v1069_v7  ;;  %v10061_v3 = vpop.f32.mrf.mxu1  ;;  %v6293_v7 = vld [vmem:[%s8941_s12 + $0x172] sm:$0xff]  ;;  %8150 = vmatpush3.msra.mxu0 %v3118_v52 }
 0x15e   : > { %12143 = vst [vmem:[#allocation20_spill] sm:$0xff] %v10061_v3  ;;  %v7573_v14 = vpop.f32.mrf.mxu0  ;;  %8052 = vmatmul.mubr.f32.gmra.mxu0 %v6291_v33  ;;  %v6321_v44 = vld [vmem:[%s12110_s3 + $0xb0] sm:$0xff] }
 0x15f   : > { %v1071_v22 = vadd.f32 %v7573_v14, %v9872_v32  ;;  %v7653_v0 = vpop.f32.mrf.mxu1  ;;  %8054 = vmatprep.mubr.f32.mxu0 %v6292_v46  ;;  %v3117_v32 = vld [vmem:[%s12110_s3 + $0x58] sm:$0xff]  ;;  %8081 = vmatprep.subr.mxu1 %v6321_v44 }
 0x160   : > { %v10071_v20 = vpop.f32.mrf.mxu0  ;;  %8082 = vmatpush3.msra.mxu1 %v6321_v44  ;;  %8151 = vmatprep.subr.mxu0 %v3117_v32 }
 0x161   : > { %12144 = vst [vmem:[#allocation21_spill] sm:$0xff] %v10071_v20  ;;  %v10073_v3 = vadd.f32 %v7653_v0, %v1071_v22  ;;  %v10075_v63 = vpop.f32.mrf.mxu1  ;;  %v6296_v22 = vld [vmem:[%s8941_s12 + $0x19a] sm:$0xff]  ;;  %8152 = vmatpush3.msra.mxu0 %v3117_v32  ;;  %v12152_v20 = vmov 0.0  }
 0x162   : > { %12145 = vst [vmem:[#allocation22_spill] sm:$0xff] %v10075_v63  ;;  %v7576_v46 = vpop.f32.mrf.mxu0  ;;  %8055 = vmatmul.mubr.f32.gmra.mxu0 %v6293_v7  ;;  %v6320_v7 = vld [vmem:[%s12110_s3 + $0xa8] sm:$0xff]  ;;  %v6319_v32 = vld [vmem:[%s12110_s3 + $0xa0] sm:$0xff] }
 0x163   : > { %v1073_v33 = vadd.f32 %v7576_v46, %v9883_v34  ;;  %v7656_v10 = vpop.f32.mrf.mxu1  ;;  %8057 = vmatprep.mubr.f32.mxu0 %v9697_v49  ;;  %v3116_v34 = vld [vmem:[%s12110_s3 + $0x50] sm:$0xff]  ;;  %8083 = vmatprep.subr.mxu1 %v6320_v7 }
 0x164   : > { %v10085_v14 = vpop.f32.mrf.mxu0  ;;  %8084 = vmatpush3.msra.mxu1 %v6320_v7  ;;  %8153 = vmatprep.subr.mxu0 %v3116_v34  ;;  %v10125_v7 = vld [vmem:[%s12110_s3 + $0x98] sm:$0xff] }
 0x165   : > { %12146 = vst [vmem:[#allocation23_spill] sm:$0xff] %v10085_v14  ;;  %v10088_v0 = vadd.f32 %v7656_v10, %v1073_v33  ;;  %v10090_v52 = vpop.f32.mrf.mxu1  ;;  %v10101_v33 = vld [vmem:[%s8941_s12 + $0x1a2] sm:$0xff]  ;;  %8085 = vmatprep.subr.mxu1 %v6319_v32  ;;  %8154 = vmatpush3.msra.mxu0 %v3116_v34 }
 0x166   : > { %12147 = vst [vmem:[#allocation24_spill] sm:$0xff] %v10090_v52  ;;  %v7579_v49 = vpop.f32.mrf.mxu0  ;;  %8058 = vmatmul.mubr.f32.gmra.mxu0 %v9710_v42  ;;  %v10106_v10 = vld [vmem:[%s12110_s3 + $0x48] sm:$0xff]  ;;  %8086 = vmatpush3.msra.mxu1 %v6319_v32  ;;  %v3113_v32 = vld [vmem:[%s12110_s3 + $0x38] sm:$0xff] }
 0x167   : > { %v1075_v44 = vadd.f32 %v7579_v49, %v9894_v45  ;;  %v7659_v46 = vpop.f32.mrf.mxu1  ;;  %8060 = vmatprep.mubr.f32.mxu0 %v6296_v22  ;;  %v10120_v22 = vld [vmem:[%s12110_s3 + $0x40] sm:$0xff]  ;;  %v12116_v49 = vmov 0.0   ;;  %8155 = vmatprep.subr.mxu0 %v10106_v10 }
 0x168   : > { %v10111_v52 = vpop.f32.mrf.mxu0  ;;  %2991 = vst [vmem:[#allocation2 + $0x20] sm:$0xff] %v12116_v49  ;;  %2992 = vst [vmem:[#allocation2 + $0x28] sm:$0x3] %v12116_v49  ;;  %8156 = vmatpush3.msra.mxu0 %v10106_v10  ;;  %8087 = vmatprep.subr.mxu1 %v10125_v7  ;;  %v3112_v10 = vld [vmem:[%s12110_s3 + $0x30] sm:$0xff] }
 0x169   : > { %12148 = vst [vmem:[#allocation25_spill] sm:$0xff] %v10111_v52  ;;  %v10113_v42 = vadd.f32 %v7659_v46, %v1075_v44  ;;  %v10115_v45 = vpop.f32.mrf.mxu1  ;;  %2987 = vst [vmem:[#allocation2] sm:$0xff] %v12116_v49  ;;  %8157 = vmatprep.subr.mxu0 %v10120_v22  ;;  %8088 = vmatpush3.msra.mxu1 %v10125_v7 }
 0x16a   : > { %12149 = vst [vmem:[#allocation26_spill] sm:$0xff] %v10115_v45  ;;  %2988 = vst [vmem:[#allocation2 + $0x8] sm:$0xff] %v12116_v49  ;;  %v7582_v34 = vpop.f32.mrf.mxu0  ;;  %8061 = vmatmul.mubr.f32.gmra.mxu0 %v10101_v33 }
 0x16b   : > { %2989 = vst [vmem:[#allocation2 + $0x10] sm:$0x3] %v12116_v49  ;;  %2990 = vst [vmem:[#allocation2 + $0x18] sm:$0xff] %v12116_v49  ;;  %v1077_v44 = vadd.f32 %v7582_v34, %v9904_v25  ;;  %v7662_v46 = vpop.f32.mrf.mxu1  ;;  %8158 = vmatpush3.msra.mxu0 %v10120_v22  ;;  %v6316_v34 = vld [vmem:[%s12110_s3 + $0x88] sm:$0xff]  ;;  %8175 = vmatprep.mubr.f32.mxu0 %v12152_v20 }
 0x16c   : > { %2993 = vst [vmem:[#allocation2 + $0x30] sm:$0xff] %v12116_v49  ;;  %2994 = vst [vmem:[#allocation2 + $0x38] sm:$0xff] %v12116_v49  ;;  %v10192_v45 = vpop.f32.mrf.mxu0  ;;  %8159 = vmatprep.subr.mxu0 %v3113_v32  ;;  %v3111_v22 = vld [vmem:[%s12110_s3 + $0x28] sm:$0xff] }
 0x16d   : > { %2995 = vst [vmem:[#allocation2 + $0x40] sm:$0x3] %v12116_v49  ;;  %2996 = vst [vmem:[#allocation2 + $0x48] sm:$0xff] %v12116_v49  ;;  %v10196_v25 = vadd.f32 %v7662_v46, %v1077_v44  ;;  %v10198_v33 = vpop.f32.mrf.mxu1  ;;  %8160 = vmatpush3.msra.mxu0 %v3113_v32  ;;  %v6315_v46 = vld [vmem:[%s12110_s3 + $0x80] sm:$0xff] }
 0x16e   : > { %2997 = vst [vmem:[#allocation2 + $0x50] sm:$0xff] %v12116_v49  ;;  %2998 = vst [vmem:[#allocation2 + $0x58] sm:$0x3] %v12116_v49  ;;  %8161 = vmatprep.subr.mxu0 %v3112_v10 }
 0x16f   : > { %2999 = vst [vmem:[#allocation2 + $0x60] sm:$0xff] %v12116_v49  ;;  %3000 = vst [vmem:[#allocation2 + $0x68] sm:$0xff] %v12116_v49  ;;  %v10210_v44 = vpop.f32.mrf.mxu1  ;;  %8162 = vmatpush3.msra.mxu0 %v3112_v10 }
 0x170   : > { %3001 = vst [vmem:[#allocation2 + $0x70] sm:$0x3] %v12116_v49  ;;  %3002 = vst [vmem:[#allocation2 + $0x78] sm:$0xff] %v12116_v49  ;;  %8163 = vmatprep.subr.mxu0 %v3111_v22 }
 0x171   : > { %3003 = vst [vmem:[#allocation2 + $0x80] sm:$0xff] %v12116_v49  ;;  %3004 = vst [vmem:[#allocation2 + $0x88] sm:$0x3] %v12116_v49  ;;  %v10220_v52 = vpop.f32.mrf.mxu1  ;;  %8164 = vmatpush3.msra.mxu0 %v3111_v22 }
 0x172   : > { %3005 = vst [vmem:[#allocation2 + $0x90] sm:$0xff] %v12116_v49  ;;  %3006 = vst [vmem:[#allocation2 + $0x98] sm:$0xff] %v12116_v49  ;;  %v3123_v32 = vld [vmem:[#allocation2 + $0x9] sm:$0xff] }
 0x173   : > { %3007 = vst [vmem:[#allocation2 + $0xa0] sm:$0x3] %v12116_v49  ;;  %3008 = vst [vmem:[#allocation2 + $0xa8] sm:$0xff] %v12116_v49  ;;  %v10228_v63 = vpop.f32.mrf.mxu1 }
 0x174   : > { %3009 = vst [vmem:[#allocation2 + $0xb0] sm:$0xff] %v12116_v49  ;;  %3010 = vst [vmem:[#allocation2 + $0xb8] sm:$0x3] %v12116_v49 }
 0x175   : > { %3011 = vst [vmem:[#allocation2 + $0xc0] sm:$0xff] %v12116_v49  ;;  %3012 = vst [vmem:[#allocation2 + $0xc8] sm:$0xff] %v12116_v49  ;;  %v10236_v59 = vpop.f32.mrf.mxu1 }
 0x176   : > { %3013 = vst [vmem:[#allocation2 + $0xd0] sm:$0x3] %v12116_v49  ;;  %3014 = vst [vmem:[#allocation2 + $0xd8] sm:$0xff] %v12116_v49 }
 0x177   : > { %3015 = vst [vmem:[#allocation2 + $0xe0] sm:$0xff] %v12116_v49  ;;  %3016 = vst [vmem:[#allocation2 + $0xe8] sm:$0x3] %v12116_v49 }
 0x178   : > { %3017 = vst [vmem:[#allocation2 + $0xf0] sm:$0xff] %v12116_v49  ;;  %3018 = vst [vmem:[#allocation2 + $0xf8] sm:$0xff] %v12116_v49 }
 0x179   : > { %3019 = vst [vmem:[#allocation2 + $0x100] sm:$0x3] %v12116_v49  ;;  %3020 = vst [vmem:[#allocation2 + $0x108] sm:$0xff] %v12116_v49 }
 0x17a   : > { %3021 = vst [vmem:[#allocation2 + $0x110] sm:$0xff] %v12116_v49  ;;  %3022 = vst [vmem:[#allocation2 + $0x118] sm:$0x3] %v12116_v49 }
 0x17b   : > { %3023 = vst [vmem:[#allocation2 + $0x120] sm:$0xff] %v12116_v49  ;;  %3024 = vst [vmem:[#allocation2 + $0x128] sm:$0xff] %v12116_v49 }
 0x17c   : > { %3025 = vst [vmem:[#allocation2 + $0x130] sm:$0x3] %v12116_v49  ;;  %3026 = vst [vmem:[#allocation2 + $0x138] sm:$0xff] %v12116_v49 }
 0x17d   : > { %3027 = vst [vmem:[#allocation2 + $0x140] sm:$0xff] %v12116_v49  ;;  %3028 = vst [vmem:[#allocation2 + $0x148] sm:$0x3] %v12116_v49 }
 0x17e   : > { %3029 = vst [vmem:[#allocation2 + $0x150] sm:$0xff] %v12116_v49  ;;  %3030 = vst [vmem:[#allocation2 + $0x158] sm:$0xff] %v12116_v49 }
 0x17f   : > { %3031 = vst [vmem:[#allocation2 + $0x160] sm:$0x3] %v12116_v49  ;;  %3032 = vst [vmem:[#allocation2 + $0x168] sm:$0xff] %v12116_v49 }
 0x180   : > { %3033 = vst [vmem:[#allocation2 + $0x170] sm:$0xff] %v12116_v49  ;;  %3034 = vst [vmem:[#allocation2 + $0x178] sm:$0x3] %v12116_v49 }
 0x181   : > { %3035 = vst [vmem:[#allocation2 + $0x180] sm:$0xff] %v12116_v49  ;;  %3036 = vst [vmem:[#allocation2 + $0x188] sm:$0xff] %v12116_v49 }
 0x182   : > { %3037 = vst [vmem:[#allocation2 + $0x190] sm:$0x3] %v12116_v49  ;;  %3038 = vst [vmem:[#allocation2 + $0x198] sm:$0xff] %v12116_v49 }
 0x183   : > { %3039 = vst [vmem:[#allocation2 + $0x1a0] sm:$0xff] %v12116_v49  ;;  %3040 = vst [vmem:[#allocation2 + $0x1a8] sm:$0x3] %v12116_v49  ;;  %v6317_v49 = vld [vmem:[%s12110_s3 + $0x90] sm:$0xff] }
 0x184   : > { %12150 = vst [vmem:[#allocation27_spill] sm:$0xff] %v10192_v45  ;;  %12151 = vst [vmem:[#allocation28_spill] sm:$0xff] %v10198_v33  ;;  %8089 = vmatprep.subr.mxu1 %v6317_v49  ;;  %v7697_v45 = vpop.f32.mrf.mxu0 }
 0x185   : > { %8090 = vmatpush3.msra.mxu1 %v6317_v49  ;;  %v10208_v7 = vadd.f32 %v7697_v45, %v9918_v38  ;;  %v3122_v49 = vld [vmem:[#allocation2 + $0x1] sm:$0xff] }
 0x186   : > { %8091 = vmatprep.subr.mxu1 %v6316_v34  ;;  %v10218_v33 = vpop.f32.mrf.mxu0  ;;  %v3110_v38 = vld [vmem:[%s12110_s3 + $0x20] sm:$0xff]  ;;  %8095 = vmatprep.mubr.f32.mxu1 %v3122_v49  ;;  %v3107_v49 = vld [vmem:[%s12110_s3 + $0x8] sm:$0xff] }
 0x187   : > { %8092 = vmatpush3.msra.mxu1 %v6316_v34  ;;  %v3109_v34 = vld [vmem:[%s12110_s3 + $0x18] sm:$0xff]  ;;  %8165 = vmatprep.subr.mxu0 %v3110_v38 }
 0x188   : > { %8093 = vmatprep.subr.mxu1 %v6315_v46  ;;  %v7700_v45 = vpop.f32.mrf.mxu0  ;;  %8166 = vmatpush3.msra.mxu0 %v3110_v38 }
 0x189   : > { %8094 = vmatpush3.msra.mxu1 %v6315_v46  ;;  %v10226_v14 = vadd.f32 %v7700_v45, %v9928_v13  ;;  %v3108_v13 = vld [vmem:[%s12110_s3 + $0x10] sm:$0xff]  ;;  %8167 = vmatprep.subr.mxu0 %v3109_v34  ;;  %v10244_v45 = vpop.f32.mrf.mxu1 }
 0x18a   : > { %v10233_v10 = vpop.f32.mrf.mxu0  ;;  %8096 = vmatmul.mubr.f32.vlgmr.msra.gmra.mxu1 %v3123_v32  ;;  %8168 = vmatpush3.msra.mxu0 %v3109_v34  ;;  %v3106_v32 = vld [vmem:[%s12110_s3] sm:$0xff] }
 0x18b   : > { %8169 = vmatprep.subr.mxu0 %v3108_v13  ;;  %v10251_v38 = vpop.f32.mrf.mxu1 }
 0x18c   : > { %v7703_v46 = vpop.f32.mrf.mxu0  ;;  %8170 = vmatpush3.msra.mxu0 %v3108_v13 }
 0x18d   : > { %v10242_v22 = vadd.f32 %v7703_v46, %v9938_v43  ;;  %8171 = vmatprep.subr.mxu0 %v3107_v49  ;;  %v10259_v34 = vpop.f32.mrf.mxu1 }
 0x18e   : > { %v10249_v53 = vpop.f32.mrf.mxu0  ;;  %8172 = vmatpush3.msra.mxu0 %v3107_v49 }
 0x18f   : > { %8173 = vmatprep.subr.mxu0 %v3106_v32  ;;  %v10263_v35 = vpop.f32.mrf.mxu1 }
 0x190   : > { %v7706_v8 = vpop.f32.mrf.mxu0  ;;  %8174 = vmatpush3.msra.mxu0 %v3106_v32  ;;  %v6346_v32 = vld [vmem:[%s12110_s3 + $0x178] sm:$0xff] }
 0x191   : > { %v10257_v43 = vadd.f32 %v7706_v8, %v9948_v12  ;;  %8176 = vmatmul.mubr.f32.vlgmr.msra.gmra.mxu0 %v12152_v20  ;;  %v10269_v18 = vpop.f32.mrf.mxu1  ;;  %8223 = vmatprep.subr.mxu1 %v6346_v32 }
 0x192   : > { %v10261_v46 = vpop.f32.mrf.mxu0  ;;  %8224 = vmatpush3.msra.mxu1 %v6346_v32 }
 0x193   : > { %v10273_v12 = vpop.f32.mrf.mxu1 }
 0x194   : > { %v7709_v21 = vpop.f32.mrf.mxu0  ;;  %12153 = vst [vmem:[#allocation29_spill] sm:$0xff] %v10273_v12 }
 0x195   : > { %v10267_v13 = vadd.f32 %v7709_v21, %v9961_v11  ;;  %v10278_v41 = vpop.f32.mrf.mxu1 }
 0x196   : > { %v10271_v54 = vpop.f32.mrf.mxu0  ;;  %12155 = vst [vmem:[#allocation31_spill] sm:$0xff] %v10278_v41 }
 0x197   : > { %v10285_v11 = vpop.f32.mrf.mxu1 }
 0x198   : > { %v7712_v8 = vpop.f32.mrf.mxu0  ;;  %12157 = vst [vmem:[#allocation33_spill] sm:$0xff] %v10285_v11 }
 0x199   : > { %v10276_v49 = vadd.f32 %v7712_v8, %v9974_v24  ;;  %v10290_v17 = vpop.f32.mrf.mxu1  ;;  %v6345_v24 = vld [vmem:[%s12110_s3 + $0x170] sm:$0xff] }
 0x19a   : > { %v10283_v20 = vpop.f32.mrf.mxu0  ;;  %12159 = vst [vmem:[#allocation35_spill] sm:$0xff] %v10290_v17  ;;  %8225 = vmatprep.subr.mxu1 %v6345_v24 }
 0x19b   : > { %12154 = vst [vmem:[#allocation30_spill] sm:$0xff] %v10276_v49  ;;  %12156 = vst [vmem:[#allocation32_spill] sm:$0xff] %v10283_v20  ;;  %v10297_v41 = vpop.f32.mrf.mxu1  ;;  %8226 = vmatpush3.msra.mxu1 %v6345_v24 }
 0x19c   : > { %v7715_v21 = vpop.f32.mrf.mxu0  ;;  %12161 = vst [vmem:[#allocation37_spill] sm:$0xff] %v10297_v41 }
 0x19d   : > { %v10288_v28 = vadd.f32 %v7715_v21, %v9987_v5  ;;  %v10302_v32 = vpop.f32.mrf.mxu1  ;;  %v6344_v5 = vld [vmem:[%s12110_s3 + $0x168] sm:$0xff] }
 0x19e   : > { %v10295_v8 = vpop.f32.mrf.mxu0  ;;  %12163 = vst [vmem:[#allocation39_spill] sm:$0xff] %v10302_v32  ;;  %8227 = vmatprep.subr.mxu1 %v6344_v5 }
 0x19f   : > { %12158 = vst [vmem:[#allocation34_spill] sm:$0xff] %v10288_v28  ;;  %12160 = vst [vmem:[#allocation36_spill] sm:$0xff] %v10295_v8  ;;  %v10309_v17 = vpop.f32.mrf.mxu1  ;;  %8228 = vmatpush3.msra.mxu1 %v6344_v5 }
 0x1a0   : > { %v7718_v49 = vpop.f32.mrf.mxu0  ;;  %12165 = vst [vmem:[#allocation41_spill] sm:$0xff] %v10309_v17 }
 0x1a1   : > { %v10300_v11 = vadd.f32 %v7718_v49, %v10000_v27  ;;  %v10314_v24 = vpop.f32.mrf.mxu1  ;;  %v6343_v27 = vld [vmem:[%s12110_s3 + $0x160] sm:$0xff] }
 0x1a2   : > { %v10307_v21 = vpop.f32.mrf.mxu0  ;;  %12167 = vst [vmem:[#allocation43_spill] sm:$0xff] %v10314_v24  ;;  %8229 = vmatprep.subr.mxu1 %v6343_v27 }
 0x1a3   : > { %12162 = vst [vmem:[#allocation38_spill] sm:$0xff] %v10300_v11  ;;  %12164 = vst [vmem:[#allocation40_spill] sm:$0xff] %v10307_v21  ;;  %v10321_v32 = vpop.f32.mrf.mxu1  ;;  %8230 = vmatpush3.msra.mxu1 %v6343_v27 }
 0x1a4   : > { %v7721_v28 = vpop.f32.mrf.mxu0  ;;  %12169 = vst [vmem:[#allocation45_spill] sm:$0xff] %v10321_v32 }
 0x1a5   : > { %v10312_v41 = vadd.f32 %v7721_v28, %v10014_v51  ;;  %v10326_v5 = vpop.f32.mrf.mxu1  ;;  %v6342_v28 = vld [vmem:[%s12110_s3 + $0x158] sm:$0xff] }
 0x1a6   : > { %v10319_v49 = vpop.f32.mrf.mxu0  ;;  %12171 = vst [vmem:[#allocation47_spill] sm:$0xff] %v10326_v5  ;;  %8231 = vmatprep.subr.mxu1 %v6342_v28 }
 0x1a7   : > { %12166 = vst [vmem:[#allocation42_spill] sm:$0xff] %v10312_v41  ;;  %12168 = vst [vmem:[#allocation44_spill] sm:$0xff] %v10319_v49  ;;  %v10333_v24 = vpop.f32.mrf.mxu1  ;;  %8232 = vmatpush3.msra.mxu1 %v6342_v28 }
 0x1a8   : > { %v7724_v11 = vpop.f32.mrf.mxu0  ;;  %12173 = vst [vmem:[#allocation49_spill] sm:$0xff] %v10333_v24 }
 0x1a9   : > { %v10324_v17 = vadd.f32 %v7724_v11, %v10029_v26  ;;  %v10338_v27 = vpop.f32.mrf.mxu1  ;;  %v6341_v26 = vld [vmem:[%s12110_s3 + $0x150] sm:$0xff] }
 0x1aa   : > { %v10331_v51 = vpop.f32.mrf.mxu0  ;;  %12175 = vst [vmem:[#allocation51_spill] sm:$0xff] %v10338_v27  ;;  %8233 = vmatprep.subr.mxu1 %v6341_v26 }
 0x1ab   : > { %12170 = vst [vmem:[#allocation46_spill] sm:$0xff] %v10324_v17  ;;  %12172 = vst [vmem:[#allocation48_spill] sm:$0xff] %v10331_v51  ;;  %v10345_v5 = vpop.f32.mrf.mxu1  ;;  %8234 = vmatpush3.msra.mxu1 %v6341_v26  ;;  %v10499_v51 = vld [vmem:[%s12110_s3 + $0x278] sm:$0xff] }
 0x1ac   : > { %v7727_v41 = vpop.f32.mrf.mxu0  ;;  %12177 = vst [vmem:[#allocation53_spill] sm:$0xff] %v10345_v5  ;;  %12198 = vst [vmem:[#allocation74_spill] sm:$0xff] %v10499_v51 }
 0x1ad   : > { %v10336_v32 = vadd.f32 %v7727_v41, %v10044_v40  ;;  %v10350_v28 = vpop.f32.mrf.mxu1  ;;  %v6340_v41 = vld [vmem:[%s12110_s3 + $0x148] sm:$0xff]  ;;  %v6362_v40 = vld [vmem:[%s12110_s3 + $0x1f8] sm:$0xff] }
 0x1ae   : > { %v10343_v11 = vpop.f32.mrf.mxu0  ;;  %12179 = vst [vmem:[#allocation55_spill] sm:$0xff] %v10350_v28  ;;  %8235 = vmatprep.subr.mxu1 %v6340_v41  ;;  %8303 = vmatprep.subr.mxu0 %v6362_v40 }
 0x1af   : > { %12174 = vst [vmem:[#allocation50_spill] sm:$0xff] %v10336_v32  ;;  %12176 = vst [vmem:[#allocation52_spill] sm:$0xff] %v10343_v11  ;;  %v10360_v5 = vpop.f32.mrf.mxu1  ;;  %8236 = vmatpush3.msra.mxu1 %v6340_v41  ;;  %8304 = vmatpush3.msra.mxu0 %v6362_v40  ;;  %v6360_v41 = vld [vmem:[%s12110_s3 + $0x1e8] sm:$0xff]  ;;  %v6347_v32 = vld [vmem:[%s12110_s3 + $0x180] sm:$0xff] }
 0x1b0   : > { %v7730_v17 = vpop.f32.mrf.mxu0  ;;  %12181 = vst [vmem:[#allocation57_spill] sm:$0xff] %v10360_v5 }
 0x1b1   : > { %v10348_v24 = vadd.f32 %v7730_v17, %v10059_v50  ;;  %v6361_v17 = vld [vmem:[%s12110_s3 + $0x1f0] sm:$0xff]  ;;  %v10368_v28 = vpop.f32.mrf.mxu1 }
 0x1b2   : > { %v10358_v27 = vpop.f32.mrf.mxu0  ;;  %8305 = vmatprep.subr.mxu0 %v6361_v17  ;;  %12183 = vst [vmem:[#allocation59_spill] sm:$0xff] %v10368_v28 }
 0x1b3   : > { %12178 = vst [vmem:[#allocation54_spill] sm:$0xff] %v10348_v24  ;;  %12180 = vst [vmem:[#allocation56_spill] sm:$0xff] %v10358_v27  ;;  %v6339_v24 = vld [vmem:[%s12110_s3 + $0x140] sm:$0xff]  ;;  %8306 = vmatpush3.msra.mxu0 %v6361_v17  ;;  %v10378_v5 = vpop.f32.mrf.mxu1 }
 0x1b4   : > { %v7733_v50 = vpop.f32.mrf.mxu0  ;;  %8237 = vmatprep.subr.mxu1 %v6339_v24  ;;  %8307 = vmatprep.subr.mxu0 %v6360_v41  ;;  %12185 = vst [vmem:[#allocation61_spill] sm:$0xff] %v10378_v5 }
 0x1b5   : > { %v10366_v26 = vadd.f32 %v7733_v50, %v10073_v3  ;;  %8238 = vmatpush3.msra.mxu1 %v6339_v24  ;;  %8308 = vmatpush3.msra.mxu0 %v6360_v41  ;;  %v6359_v3 = vld [vmem:[%s12110_s3 + $0x1e0] sm:$0xff]  ;;  %v10386_v28 = vpop.f32.mrf.mxu1  ;;  %v6358_v24 = vld [vmem:[%s12110_s3 + $0x1d8] sm:$0xff] }
 0x1b6   : > { %v10376_v40 = vpop.f32.mrf.mxu0  ;;  %8309 = vmatprep.subr.mxu0 %v6359_v3  ;;  %12187 = vst [vmem:[#allocation63_spill] sm:$0xff] %v10386_v28 }
 0x1b7   : > { %12182 = vst [vmem:[#allocation58_spill] sm:$0xff] %v10366_v26  ;;  %12184 = vst [vmem:[#allocation60_spill] sm:$0xff] %v10376_v40  ;;  %v6338_v26 = vld [vmem:[%s12110_s3 + $0x138] sm:$0xff]  ;;  %8310 = vmatpush3.msra.mxu0 %v6359_v3  ;;  %v10396_v5 = vpop.f32.mrf.mxu1  ;;  %v6357_v3 = vld [vmem:[%s12110_s3 + $0x1d0] sm:$0xff] }
 0x1b8   : > { %v7736_v50 = vpop.f32.mrf.mxu0  ;;  %8239 = vmatprep.subr.mxu1 %v6338_v26  ;;  %8311 = vmatprep.subr.mxu0 %v6358_v24  ;;  %12189 = vst [vmem:[#allocation65_spill] sm:$0xff] %v10396_v5 }
 0x1b9   : > { %v10384_v17 = vadd.f32 %v7736_v50, %v10088_v0  ;;  %8240 = vmatpush3.msra.mxu1 %v6338_v26  ;;  %v6337_v0 = vld [vmem:[%s12110_s3 + $0x130] sm:$0xff]  ;;  %8312 = vmatpush3.msra.mxu0 %v6358_v24  ;;  %v6336_v26 = vld [vmem:[%s12110_s3 + $0x128] sm:$0xff] }
 0x1ba   : > { %v10394_v41 = vpop.f32.mrf.mxu0  ;;  %8241 = vmatprep.subr.mxu1 %v6337_v0  ;;  %8313 = vmatprep.subr.mxu0 %v6357_v3  ;;  %v6356_v24 = vld [vmem:[%s12110_s3 + $0x1c8] sm:$0xff] }
 0x1bb   : > { %12186 = vst [vmem:[#allocation62_spill] sm:$0xff] %v10384_v17  ;;  %12188 = vst [vmem:[#allocation64_spill] sm:$0xff] %v10394_v41  ;;  %v10407_v17 = vpop.f32.mrf.mxu1  ;;  %8242 = vmatpush3.msra.mxu1 %v6337_v0  ;;  %8314 = vmatpush3.msra.mxu0 %v6357_v3  ;;  %v6355_v0 = vld [vmem:[%s12110_s3 + $0x1c0] sm:$0xff] }
 0x1bc   : > { %v7739_v50 = vpop.f32.mrf.mxu0  ;;  %12191 = vst [vmem:[#allocation67_spill] sm:$0xff] %v10407_v17  ;;  %8243 = vmatprep.subr.mxu1 %v6336_v26  ;;  %8315 = vmatprep.subr.mxu0 %v6356_v24 }
 0x1bd   : > { %v10405_v28 = vadd.f32 %v7739_v50, %v10113_v42  ;;  %v10417_v41 = vpop.f32.mrf.mxu1  ;;  %8244 = vmatpush3.msra.mxu1 %v6336_v26  ;;  %v6335_v42 = vld [vmem:[%s12110_s3 + $0x120] sm:$0xff]  ;;  %8316 = vmatpush3.msra.mxu0 %v6356_v24  ;;  %v6334_v26 = vld [vmem:[%s12110_s3 + $0x118] sm:$0xff] }
 0x1be   : > { %v10415_v5 = vpop.f32.mrf.mxu0  ;;  %12193 = vst [vmem:[#allocation69_spill] sm:$0xff] %v10417_v41  ;;  %8245 = vmatprep.subr.mxu1 %v6335_v42  ;;  %8317 = vmatprep.subr.mxu0 %v6355_v0  ;;  %v6354_v24 = vld [vmem:[%s12110_s3 + $0x1b8] sm:$0xff] }
 0x1bf   : > { %12190 = vst [vmem:[#allocation66_spill] sm:$0xff] %v10405_v28  ;;  %12192 = vst [vmem:[#allocation68_spill] sm:$0xff] %v10415_v5  ;;  %v10428_v17 = vpop.f32.mrf.mxu1  ;;  %8246 = vmatpush3.msra.mxu1 %v6335_v42  ;;  %8318 = vmatpush3.msra.mxu0 %v6355_v0  ;;  %v6333_v42 = vld [vmem:[%s12110_s3 + $0x110] sm:$0xff] }
 0x1c0   : > { %v7742_v3 = vpop.f32.mrf.mxu0  ;;  %12195 = vst [vmem:[#allocation71_spill] sm:$0xff] %v10428_v17  ;;  %8247 = vmatprep.subr.mxu1 %v6334_v26  ;;  %8319 = vmatprep.subr.mxu0 %v6354_v24 }
 0x1c1   : > { %v10426_v50 = vadd.f32 %v7742_v3, %v10196_v25  ;;  %v10438_v28 = vpop.f32.mrf.mxu1  ;;  %8248 = vmatpush3.msra.mxu1 %v6334_v26  ;;  %8320 = vmatpush3.msra.mxu0 %v6354_v24  ;;  %v6353_v25 = vld [vmem:[%s12110_s3 + $0x1b0] sm:$0xff]  ;;  %v6352_v26 = vld [vmem:[%s12110_s3 + $0x1a8] sm:$0xff] }
 0x1c2   : > { %v10436_v41 = vpop.f32.mrf.mxu0  ;;  %12197 = vst [vmem:[#allocation73_spill] sm:$0xff] %v10438_v28  ;;  %8321 = vmatprep.subr.mxu0 %v6353_v25  ;;  %8249 = vmatprep.subr.mxu1 %v6333_v42  ;;  %v6332_v24 = vld [vmem:[%s12110_s3 + $0x108] sm:$0xff] }
 0x1c3   : > { %12194 = vst [vmem:[#allocation70_spill] sm:$0xff] %v10426_v50  ;;  %12196 = vst [vmem:[#allocation72_spill] sm:$0xff] %v10436_v41  ;;  %v10448_v3 = vpop.f32.mrf.mxu1  ;;  %8322 = vmatpush3.msra.mxu0 %v6353_v25  ;;  %8250 = vmatpush3.msra.mxu1 %v6333_v42  ;;  %v6351_v25 = vld [vmem:[%s12110_s3 + $0x1a0] sm:$0xff]  ;;  %v6350_v41 = vld [vmem:[%s12110_s3 + $0x198] sm:$0xff] }
 0x1c4   : > { %v10446_v0 = vpop.f32.mrf.mxu0  ;;  %8323 = vmatprep.subr.mxu0 %v6352_v26  ;;  %8251 = vmatprep.subr.mxu1 %v6332_v24  ;;  %v6331_v42 = vld [vmem:[%s12110_s3 + $0x100] sm:$0xff] }
 0x1c5   : > { %v10458_v17 = vpop.f32.mrf.mxu1  ;;  %8324 = vmatpush3.msra.mxu0 %v6352_v26  ;;  %8252 = vmatpush3.msra.mxu1 %v6332_v24  ;;  %v6349_v24 = vld [vmem:[%s12110_s3 + $0x190] sm:$0xff] }
 0x1c6   : > { %v10456_v28 = vpop.f32.mrf.mxu0  ;;  %8325 = vmatprep.subr.mxu0 %v6351_v25  ;;  %8253 = vmatprep.subr.mxu1 %v6331_v42 }
 0x1c7   : > { %8326 = vmatpush3.msra.mxu0 %v6351_v25  ;;  %8254 = vmatpush3.msra.mxu1 %v6331_v42  ;;  %v10473_v5 = vpop.f32.mrf.mxu1  ;;  %v6348_v25 = vld [vmem:[%s12110_s3 + $0x188] sm:$0xff] }
 0x1c8   : > { %v10466_v50 = vpop.f32.mrf.mxu0  ;;  %8327 = vmatprep.subr.mxu0 %v6350_v41  ;;  %8383 = vmatprep.subr.mxu1 %v10499_v51 }
 0x1c9   : > { %8328 = vmatpush3.msra.mxu0 %v6350_v41  ;;  %v10483_v27 = vpop.f32.mrf.mxu1 }
 0x1ca   : > { %v10471_v26 = vpop.f32.mrf.mxu0  ;;  %8329 = vmatprep.subr.mxu0 %v6349_v24 }
 0x1cb   : > { %8330 = vmatpush3.msra.mxu0 %v6349_v24  ;;  %v10492_v41 = vpop.f32.mrf.mxu1 }
 0x1cc   : > { %v10478_v40 = vpop.f32.mrf.mxu0  ;;  %8331 = vmatprep.subr.mxu0 %v6348_v25 }
 0x1cd   : > { %8332 = vmatpush3.msra.mxu0 %v6348_v25  ;;  %v10504_v49 = vpop.f32.mrf.mxu1 }
 0x1ce   : > { %v10485_v42 = vpop.f32.mrf.mxu0  ;;  %8333 = vmatprep.subr.mxu0 %v6347_v32 }
 0x1cf   : > { %8334 = vmatpush3.msra.mxu0 %v6347_v32  ;;  %v10510_v32 = vpop.f32.mrf.mxu1 }
 0x1d0   : > { %v10490_v11 = vpop.f32.mrf.mxu0  ;;  %12202 = vst [vmem:[#allocation78_spill] sm:$0xff] %v10510_v32 }
 0x1d1   : > { %v10516_v47 = vpop.f32.mrf.mxu1 }
 0x1d2   : > { %v10494_v24 = vpop.f32.mrf.mxu0  ;;  %12205 = vst [vmem:[#allocation81_spill] sm:$0xff] %v10516_v47 }
 0x1d3   : > { %v10522_v51 = vpop.f32.mrf.mxu1 }
 0x1d4   : > { %v10502_v25 = vpop.f32.mrf.mxu0  ;;  %12208 = vst [vmem:[#allocation84_spill] sm:$0xff] %v10522_v51 }
 0x1d5   : > { %12199 = vst [vmem:[#allocation75_spill] sm:$0xff] %v10502_v25 }
 0x1d6   : > { %v10506_v21 = vpop.f32.mrf.mxu0 }
 0x1d7   : > { %12200 = vst [vmem:[#allocation76_spill] sm:$0xff] %v10506_v21  ;;  %v10528_v21 = vpop.f32.mrf.mxu1 }
 0x1d8   : > { %v10508_v8 = vpop.f32.mrf.mxu0 }
 0x1d9   : > { %12201 = vst [vmem:[#allocation77_spill] sm:$0xff] %v10508_v8 }
 0x1da   : > { %v10512_v37 = vpop.f32.mrf.mxu0 }
 0x1db   : > { %12203 = vst [vmem:[#allocation79_spill] sm:$0xff] %v10512_v37  ;;  %v10534_v37 = vpop.f32.mrf.mxu1 }
 0x1dc   : > { %v10514_v62 = vpop.f32.mrf.mxu0  ;;  %12213 = vst [vmem:[#allocation89_spill] sm:$0xff] %v10534_v37 }
 0x1dd   : > { %12204 = vst [vmem:[#allocation80_spill] sm:$0xff] %v10514_v62 }
 0x1de   : > { %v10518_v9 = vpop.f32.mrf.mxu0 }
 0x1df   : > { %12206 = vst [vmem:[#allocation82_spill] sm:$0xff] %v10518_v9  ;;  %v10540_v9 = vpop.f32.mrf.mxu1 }
 0x1e0   : > { %v10520_v20 = vpop.f32.mrf.mxu0  ;;  %12216 = vst [vmem:[#allocation92_spill] sm:$0xff] %v10540_v9 }
 0x1e1   : > { %12207 = vst [vmem:[#allocation83_spill] sm:$0xff] %v10520_v20 }
 0x1e2   : > { %v10524_v25 = vpop.f32.mrf.mxu0 }
 0x1e3   : > { %12209 = vst [vmem:[#allocation85_spill] sm:$0xff] %v10524_v25 }
 0x1e4   : > { %v10526_v12 = vpop.f32.mrf.mxu0 }
 0x1e5   : > { %12210 = vst [vmem:[#allocation86_spill] sm:$0xff] %v10526_v12  ;;  %v10549_v12 = vld [vmem:[%s12110_s3 + $0x2f8] sm:$0xff] }
 0x1e6   : > { %v10530_v8 = vpop.f32.mrf.mxu0  ;;  %12219 = vst [vmem:[#allocation95_spill] sm:$0xff] %v10549_v12  ;;  %8463 = vmatprep.subr.mxu0 %v10549_v12  ;;  %v1355_v12 = vadd.f32 %v9930_v57, %v9926_v1  ;;  %v1968_v1 = vadd.f32 %v10228_v63, %v10226_v14 }
 0x1e7   : > { %12211 = vst [vmem:[#allocation87_spill] sm:$0xff] %v10530_v8  ;;  %v10551_v8 = vpop.f32.mrf.mxu1 }
 0x1e8   : > { %v10532_v32 = vpop.f32.mrf.mxu0  ;;  %12220 = vst [vmem:[#allocation96_spill] sm:$0xff] %v10551_v8 }
 0x1e9   : > { %12212 = vst [vmem:[#allocation88_spill] sm:$0xff] %v10532_v32 }
 0x1ea   : > { %v10536_v62 = vpop.f32.mrf.mxu0 }
 0x1eb   : > { %12214 = vst [vmem:[#allocation90_spill] sm:$0xff] %v10536_v62 }
 0x1ec   : > { %v10538_v47 = vpop.f32.mrf.mxu0 }
 0x1ed   : > { %12215 = vst [vmem:[#allocation91_spill] sm:$0xff] %v10538_v47  ;;  %v10558_v47 = vpop.f32.mrf.mxu1 }
 0x1ee   : > { %v10542_v20 = vpop.f32.mrf.mxu0 }
 0x1ef   : > { %12217 = vst [vmem:[#allocation93_spill] sm:$0xff] %v10542_v20  ;;  %v10566_v9 = vpop.f32.mrf.mxu1 }
 0x1f0   : > { %v10544_v51 = vpop.f32.mrf.mxu0 }
 0x1f1   : > { %12218 = vst [vmem:[#allocation94_spill] sm:$0xff] %v10544_v51  ;;  %v1353_v51 = vadd.f32 %v9920_v55, %v9916_v36  ;;  %v1661_v55 = vadd.f32 %v10233_v10, %v1355_v12  ;;  %v2275_v10 = vadd.f32 %v10466_v50, %v1968_v1 }
 0x1f2   : > { %v10553_v32 = vpop.f32.mrf.mxu0 }
 0x1f3   : > { %12221 = vst [vmem:[#allocation97_spill] sm:$0xff] %v10553_v32  ;;  %v1659_v8 = vadd.f32 %v10218_v33, %v1353_v51  ;;  %v1357_v33 = vadd.f32 %v9940_v6, %v9936_v48  ;;  %v1359_v48 = vadd.f32 %v9950_v61, %v9946_v4  ;;  %v1970_v6 = vadd.f32 %v10244_v45, %v10242_v22 }
 0x1f4   : > { %v10556_v62 = vpop.f32.mrf.mxu0  ;;  %v2581_v45 = vadd.f32 %v10473_v5, %v2275_v10 }
 0x1f5   : > { %12222 = vst [vmem:[#allocation98_spill] sm:$0xff] %v10556_v62  ;;  %v1966_v62 = vadd.f32 %v10210_v44, %v10208_v7  ;;  %v1965_v36 = vadd.f32 %v10220_v52, %v1659_v8  ;;  %v1663_v7 = vadd.f32 %v10249_v53, %v1357_v33  ;;  %v1967_v52 = vadd.f32 %v10236_v59, %v1661_v55  ;;  %v10606_v53 = vld [vmem:[%s12109_s2] ss:$0 sm:$0xff] }
 0x1f6   : > { %v10560_v25 = vpop.f32.mrf.mxu0  ;;  %v1665_v8 = vadd.f32 %v10261_v46, %v1359_v48  ;;  %v2277_v4 = vadd.f32 %v10478_v40, %v1970_v6  ;;  %v10630_v55 = vadd.f32 %v9851_v29, %v9849_v19  ;;  %v10641_v19 = vadd.f32 %v9864_v2, %v9862_v60  ;;  %v12227_v2 = vld [vmem:[#allocation29_spill] sm:$0xff] }
 0x1f7   : > { %12223 = vst [vmem:[#allocation99_spill] sm:$0xff] %v10560_v25  ;;  %v10577_v25 = vpop.f32.mrf.mxu1  ;;  %v2272_v57 = vadd.f32 %v10456_v28, %v1965_v36  ;;  %v2274_v59 = vadd.f32 %v10471_v26, %v1967_v52  ;;  %v1363_v29 = vadd.f32 %v9976_v30, %v9972_v58  ;;  %v10652_v60 = vadd.f32 %v9877_v23, %v9875_v56  ;;  %v12228_v30 = vld [vmem:[#allocation32_spill] sm:$0xff] }
 0x1f8   : > { %v10562_v20 = vpop.f32.mrf.mxu0  ;;  %v12232_v56 = vld [vmem:[#allocation4_spill] sm:$0xff] }
 0x1f9   : > { %12224 = vst [vmem:[#allocation100_spill] sm:$0xff] %v10562_v20  ;;  %v10592_v44 = vpop.f32.mrf.mxu1  ;;  %v2578_v14 = vadd.f32 %v10458_v17, %v2272_v57  ;;  %v10619_v17 = vadd.f32 %v9838_v15, %v9836_v16  ;;  %v1971_v16 = vadd.f32 %v10263_v35, %v1665_v8  ;;  %v1669_v52 = vadd.f32 %v12228_v30, %v1363_v29  ;;  %v12235_v8 = vld [vmem:[#allocation30_spill] sm:$0xff]  ;;  %v12244_v29 = vld [vmem:[#allocation77_spill] sm:$0xff]  ;;  %v12248_v30 = vld [vmem:[#allocation12_spill] sm:$0xff] }
 0x1fa   : > { %v10568_v37 = vpop.f32.mrf.mxu0 }
 0x1fb   : > { %12225 = vst [vmem:[#allocation101_spill] sm:$0xff] %v10568_v37  ;;  %v2273_v37 = vadd.f32 %v10446_v0, %v1966_v62  ;;  %v10613_v61 = vpop.f32.mrf.mxu1  ;;  %v1361_v0 = vadd.f32 %v9963_v39, %v9959_v31  ;;  %v2583_v31 = vadd.f32 %v10492_v41, %v2277_v4  ;;  %v12236_v4 = vld [vmem:[#allocation31_spill] sm:$0xff] }
 0x1fc   : > { %v10571_v32 = vpop.f32.mrf.mxu0 }
 0x1fd   : > { %v2579_v62 = vadd.f32 %v10448_v3, %v2273_v37  ;;  %v1969_v37 = vadd.f32 %v10251_v38, %v1663_v7  ;;  %v1972_v38 = vadd.f32 %v10259_v34, %v10257_v43  ;;  %v2580_v3 = vadd.f32 %v10483_v27, %v2274_v59  ;;  %v10635_v39 = vpop.f32.mrf.mxu1  ;;  %v12233_v59 = vld [vmem:[#allocation9_spill] sm:$0xff] }
 0x1fe   : > { %v10579_v20 = vpop.f32.mrf.mxu0  ;;  %v1667_v15 = vadd.f32 %v10271_v54, %v1361_v0  ;;  %v1974_v54 = vadd.f32 %v10269_v18, %v10267_v13  ;;  %v12229_v18 = vld [vmem:[#allocation75_spill] sm:$0xff]  ;;  %v12238_v0 = vld [vmem:[#allocation81_spill] sm:$0xff] }
 0x1ff   : > { %12226 = vst [vmem:[#allocation102_spill] sm:$0xff] %v10579_v20  ;;  %v2276_v46 = vadd.f32 %v10485_v42, %v1969_v37  ;;  %v2279_v34 = vadd.f32 %v10490_v11, %v1972_v38  ;;  %v2278_v11 = vadd.f32 %v10494_v24, %v1971_v16  ;;  %v12230_v24 = vld [vmem:[#allocation78_spill] sm:$0xff]  ;;  %v12241_v16 = vld [vmem:[#allocation33_spill] sm:$0xff] }
 0x200   : > { %v10586_v51 = vpop.f32.mrf.mxu0  ;;  %v1973_v58 = vadd.f32 %v12227_v2, %v1667_v15  ;;  %v2281_v13 = vadd.f32 %v12229_v18, %v1974_v54  ;;  %v1975_v15 = vadd.f32 %v12241_v16, %v1669_v52  ;;  %v12249_v18 = vld [vmem:[#allocation34_spill] sm:$0xff] }
 0x201   : > { %v2582_v35 = vadd.f32 %v10504_v49, %v2276_v46  ;;  %v10657_v49 = vpop.f32.mrf.mxu1  ;;  %v2585_v10 = vadd.f32 %v12230_v24, %v2279_v34  ;;  %v2584_v38 = vadd.f32 %v12238_v0, %v2278_v11  ;;  %v12243_v34 = vld [vmem:[#allocation84_spill] sm:$0xff] }
 0x202   : > { %v10594_v20 = vpop.f32.mrf.mxu0 }
 0x204   : > { %v8017_v63 = vpop.f32.mrf.mxu0 }
 0x205   : > { %v2885_v12 = vadd.f32 %v8017_v63, %v2579_v62 }
 0x206   : > { %v2725_v22 = vpop.f32.mrf.mxu0 }
 0x207   : > { %v2924_v28 = vadd.f32 %v10606_v53, %v2885_v12  ;;  %v2884_v50 = vadd.f32 %v2725_v22, %v2578_v14  ;;  %v12231_v14 = vld [vmem:[#allocation3_spill] sm:$0xff]  ;;  %v12234_v12 = vld [vmem:[#allocation10_spill] sm:$0xff]  ;;  %v1976_v22 = vadd.f32 %v12236_v4, %v12235_v8  ;;  %v12253_v8 = vld [vmem:[#allocation40_spill] sm:$0xff] }
 0x208   : > { %v8020_v40 = vpop.f32.mrf.mxu0  ;;  %v10663_v23 = vadd.f32 %v12232_v56, %v12231_v14  ;;  %v1365_v37 = vadd.f32 %v12234_v12, %v12233_v59  ;;  %v12252_v12 = vld [vmem:[#allocation37_spill] sm:$0xff] }
 0x209   : > { %v2956_v26 = vmax.f32 %v2924_v28, 0.0  ;;  %v2923_v5 = vadd.f32 %v10606_v53, %v2884_v50  ;;  %v2887_v36 = vadd.f32 %v8020_v40, %v2581_v45  ;;  %v12237_v45 = vld [vmem:[#allocation76_spill] sm:$0xff]  ;;  %v2283_v54 = vadd.f32 %v12244_v29, %v1976_v22 }
 0x20a   : > { %v2735_v43 = vpop.f32.mrf.mxu0  ;;  %v2280_v28 = vadd.f32 %v12237_v45, %v1973_v58  ;;  %v12247_v58 = vld [vmem:[#allocation11_spill] sm:$0xff] }
 0x20b   : > { %3043 = vst [vmem:[#allocation2 + $0x21] sm:$0xff] %v2956_v26  ;;  %v2955_v27 = vmax.f32 %v2923_v5, 0.0  ;;  %v2926_v42 = vadd.f32 %v10606_v53, %v2887_v36  ;;  %v2886_v33 = vadd.f32 %v2735_v43, %v2580_v3  ;;  %v12240_v5 = vld [vmem:[#allocation6_spill] sm:$0xff]  ;;  %v1367_v52 = vadd.f32 %v12248_v30, %v12247_v58 }
 0x20c   : > { %v8023_v41 = vpop.f32.mrf.mxu0  ;;  %v2586_v24 = vadd.f32 %v10528_v21, %v2280_v28  ;;  %v12254_v21 = vld [vmem:[#allocation80_spill] sm:$0xff] }
 0x20d   : > { %3042 = vst [vmem:[#allocation2 + $0x19] sm:$0xff] %v2955_v27  ;;  %v2958_v1 = vmax.f32 %v2926_v42, 0.0  ;;  %v2925_v57 = vadd.f32 %v10606_v53, %v2886_v33  ;;  %v2889_v7 = vadd.f32 %v8023_v41, %v2583_v31  ;;  %8098 = vmatprep.mubr.f32.mxu1 %v2955_v27  ;;  %v12242_v31 = vld [vmem:[#allocation36_spill] sm:$0xff]  ;;  %v2587_v27 = vadd.f32 %v12243_v34, %v2281_v13  ;;  %v10679_v42 = vpop.f32.mrf.mxu1  ;;  %v12250_v13 = vld [vmem:[#allocation35_spill] sm:$0xff] }
 0x20e   : > { %v2745_v62 = vpop.f32.mrf.mxu0  ;;  %8099 = vmatmul.mubr.f32.gmra.mxu1 %v2956_v26  ;;  %v12239_v26 = vld [vmem:[#allocation5_spill] sm:$0xff]  ;;  %v1671_v43 = vadd.f32 %v12242_v31, %v1365_v37  ;;  %v1673_v4 = vadd.f32 %v12253_v8, %v1367_v52  ;;  %v12260_v34 = vld [vmem:[#allocation39_spill] sm:$0xff]  ;;  %v12264_v52 = vld [vmem:[#allocation44_spill] sm:$0xff] }
 0x20f   : > { %3045 = vst [vmem:[#allocation2 + $0x39] sm:$0xff] %v2958_v1  ;;  %v2957_v48 = vmax.f32 %v2925_v57, 0.0  ;;  %v2928_v6 = vadd.f32 %v10606_v53, %v2889_v7  ;;  %v2888_v63 = vadd.f32 %v2745_v62, %v2582_v35  ;;  %v10674_v36 = vadd.f32 %v12240_v5, %v12239_v26  ;;  %v12245_v57 = vld [vmem:[#allocation7_spill] sm:$0xff]  ;;  %v12246_v7 = vld [vmem:[#allocation8_spill] sm:$0xff]  ;;  %v10702_v45 = vpop.f32.mrf.mxu1  ;;  %v12256_v26 = vld [vmem:[#allocation13_spill] sm:$0xff] }
 0x210   : > { %v8026_v50 = vpop.f32.mrf.mxu0  ;;  %v10685_v2 = vadd.f32 %v12246_v7, %v12245_v57  ;;  %v1978_v62 = vadd.f32 %v12250_v13, %v12249_v18  ;;  %v1977_v37 = vadd.f32 %v12252_v12, %v1671_v43  ;;  %v12257_v5 = vld [vmem:[#allocation14_spill] sm:$0xff]  ;;  %v12265_v13 = vld [vmem:[#allocation96_spill] sm:$0xff] }
 0x211   : > { %3044 = vst [vmem:[#allocation2 + $0x31] sm:$0xff] %v2957_v48  ;;  %v2960_v46 = vmax.f32 %v2928_v6, 0.0  ;;  %v2927_v40 = vadd.f32 %v10606_v53, %v2888_v63  ;;  %v2891_v3 = vadd.f32 %v8026_v50, %v2585_v10  ;;  %8101 = vmatprep.mubr.f32.mxu1 %v2957_v48  ;;  %v12251_v6 = vld [vmem:[#allocation79_spill] sm:$0xff]  ;;  %v12255_v50 = vld [vmem:[#allocation89_spill] sm:$0xff]  ;;  %v1369_v16 = vadd.f32 %v12257_v5, %v12256_v26  ;;  %v12259_v43 = vld [vmem:[#allocation38_spill] sm:$0xff] }
 0x212   : > { %v2755_v33 = vpop.f32.mrf.mxu0  ;;  %8102 = vmatmul.mubr.f32.gmra.mxu1 %v2958_v1  ;;  %v2282_v63 = vadd.f32 %v12251_v6, %v1975_v15  ;;  %v2285_v22 = vadd.f32 %v12254_v21, %v1978_v62  ;;  %v2589_v0 = vadd.f32 %v12255_v50, %v2283_v54  ;;  %v12258_v15 = vld [vmem:[#allocation15_spill] sm:$0xff] }
 0x213   : > { %3047 = vst [vmem:[#allocation2 + $0x51] sm:$0xff] %v2960_v46  ;;  %v2959_v35 = vmax.f32 %v2927_v40, 0.0  ;;  %v2930_v41 = vadd.f32 %v10606_v53, %v2891_v3  ;;  %v2890_v11 = vadd.f32 %v2755_v33, %v2584_v38  ;;  %v1064_v31 = vadd.f32 %v12258_v15, %v10619_v17  ;;  %v12261_v33 = vld [vmem:[#allocation82_spill] sm:$0xff]  ;;  %v12263_v17 = vld [vmem:[#allocation41_spill] sm:$0xff]  ;;  %v12266_v6 = vld [vmem:[#allocation83_spill] sm:$0xff] }
 0x214   : > { %v8029_v1 = vpop.f32.mrf.mxu0  ;;  %v10692_v10 = vld [vmem:[#allocation2 + $0x18] sm:$0xff]  ;;  %v10694_v48 = vld [vmem:[#allocation2 + $0x20] sm:$0xff]  ;;  %v2284_v29 = vadd.f32 %v12261_v33, %v1977_v37  ;;  %v1979_v30 = vadd.f32 %v12263_v17, %v1673_v4  ;;  %v1675_v18 = vadd.f32 %v12264_v52, %v1369_v16  ;;  %v2591_v62 = vadd.f32 %v12265_v13, %v2285_v22  ;;  %v12270_v22 = vld [vmem:[#allocation43_spill] sm:$0xff] }
 0x215   : > { %3046 = vst [vmem:[#allocation2 + $0x49] sm:$0xff] %v2959_v35  ;;  %v2962_v14 = vmax.f32 %v2930_v41, 0.0  ;;  %v2929_v56 = vadd.f32 %v10606_v53, %v2890_v11  ;;  %v2893_v59 = vadd.f32 %v8029_v1, %v2587_v27  ;;  %8178 = vmatprep.mubr.f32.mxu0 %v10692_v10  ;;  %8104 = vmatprep.mubr.f32.mxu1 %v2959_v35  ;;  %v12262_v41 = vld [vmem:[#allocation92_spill] sm:$0xff]  ;;  %v12268_v4 = vld [vmem:[#allocation17_spill] sm:$0xff]  ;;  %v12278_v13 = vld [vmem:[#allocation47_spill] sm:$0xff] }
 0x216   : > { %v2765_v28 = vpop.f32.mrf.mxu0  ;;  %8179 = vmatmul.mubr.f32.gmra.mxu0 %v10694_v48  ;;  %8105 = vmatmul.mubr.f32.gmra.mxu1 %v2960_v46  ;;  %v1980_v27 = vadd.f32 %v12260_v34, %v12259_v43  ;;  %v2588_v11 = vadd.f32 %v12262_v41, %v2282_v63  ;;  %v12267_v37 = vld [vmem:[#allocation16_spill] sm:$0xff]  ;;  %v1066_v21 = vadd.f32 %v12268_v4, %v10630_v55  ;;  %v12272_v55 = vld [vmem:[#allocation45_spill] sm:$0xff] }
 0x217   : > { %3049 = vst [vmem:[#allocation2 + $0x69] sm:$0xff] %v2962_v14  ;;  %v2961_v38 = vmax.f32 %v2929_v56, 0.0  ;;  %v2932_v40 = vadd.f32 %v10606_v53, %v2893_v59  ;;  %v2892_v3 = vadd.f32 %v2765_v28, %v2586_v24  ;;  %v10724_v24 = vpop.f32.mrf.mxu1  ;;  %v1371_v8 = vadd.f32 %v12267_v37, %v1064_v31  ;;  %v12269_v28 = vld [vmem:[#allocation42_spill] sm:$0xff]  ;;  %v12273_v43 = vld [vmem:[#allocation48_spill] sm:$0xff] }
 0x218   : > { %v8032_v35 = vpop.f32.mrf.mxu0  ;;  %v10714_v46 = vld [vmem:[#allocation2 + $0x30] sm:$0xff]  ;;  %v10716_v54 = vld [vmem:[#allocation2 + $0x38] sm:$0xff]  ;;  %v2287_v63 = vadd.f32 %v12266_v6, %v1980_v27  ;;  %v1982_v50 = vadd.f32 %v12270_v22, %v12269_v28  ;;  %v1981_v31 = vadd.f32 %v12272_v55, %v1675_v18  ;;  %v12277_v18 = vld [vmem:[#allocation46_spill] sm:$0xff] }
 0x219   : > { %3048 = vst [vmem:[#allocation2 + $0x61] sm:$0xff] %v2961_v38  ;;  %v2964_v57 = vmax.f32 %v2932_v40, 0.0  ;;  %v2931_v7 = vadd.f32 %v10606_v53, %v2892_v3  ;;  %v2895_v58 = vadd.f32 %v8032_v35, %v2589_v0  ;;  %8181 = vmatprep.mubr.f32.mxu0 %v10714_v46  ;;  %8107 = vmatprep.mubr.f32.mxu1 %v2961_v38  ;;  %v12271_v3 = vld [vmem:[#allocation85_spill] sm:$0xff]  ;;  %v10745_v33 = vpop.f32.mrf.mxu1  ;;  %v12281_v4 = vld [vmem:[#allocation52_spill] sm:$0xff] }
 0x21a   : > { %v2775_v1 = vpop.f32.mrf.mxu0  ;;  %8182 = vmatmul.mubr.f32.gmra.mxu0 %v10716_v54  ;;  %8108 = vmatmul.mubr.f32.gmra.mxu1 %v2962_v14  ;;  %v2590_v0 = vadd.f32 %v10558_v47, %v2284_v29  ;;  %v2286_v26 = vadd.f32 %v12271_v3, %v1979_v30  ;;  %v1677_v34 = vadd.f32 %v12273_v43, %v1371_v8  ;;  %v12274_v47 = vld [vmem:[#allocation86_spill] sm:$0xff]  ;;  %v12276_v30 = vld [vmem:[#allocation19_spill] sm:$0xff]  ;;  %v12284_v55 = vld [vmem:[#allocation21_spill] sm:$0xff] }
 0x21b   : > { %3051 = vst [vmem:[#allocation2 + $0x81] sm:$0xff] %v2964_v57  ;;  %v2963_v56 = vmax.f32 %v2931_v7, 0.0  ;;  %v2934_v59 = vadd.f32 %v10606_v53, %v2895_v58  ;;  %v2894_v12 = vadd.f32 %v2775_v1, %v2588_v11  ;;  %v2289_v27 = vadd.f32 %v12274_v47, %v1982_v50  ;;  %v12275_v58 = vld [vmem:[#allocation18_spill] sm:$0xff]  ;;  %v12279_v1 = vld [vmem:[#allocation87_spill] sm:$0xff]  ;;  %v10766_v22 = vpop.f32.mrf.mxu1 }
 0x21c   : > { %v8035_v38 = vpop.f32.mrf.mxu0  ;;  %v10735_v40 = vld [vmem:[#allocation2 + $0x48] sm:$0xff]  ;;  %v10737_v14 = vld [vmem:[#allocation2 + $0x50] sm:$0xff]  ;;  %v2593_v35 = vadd.f32 %v10566_v9, %v2287_v63  ;;  %v1373_v17 = vadd.f32 %v12275_v58, %v1066_v21  ;;  %v1068_v52 = vadd.f32 %v12276_v30, %v10641_v19  ;;  %v2288_v6 = vadd.f32 %v12279_v1, %v1981_v31  ;;  %v12280_v19 = vld [vmem:[#allocation49_spill] sm:$0xff] }
 0x21d   : > { %3050 = vst [vmem:[#allocation2 + $0x79] sm:$0xff] %v2963_v56  ;;  %v2966_v5 = vmax.f32 %v2934_v59, 0.0  ;;  %v2933_v16 = vadd.f32 %v10606_v53, %v2894_v12  ;;  %v2897_v15 = vadd.f32 %v8035_v38, %v2591_v62  ;;  %8184 = vmatprep.mubr.f32.mxu0 %v10735_v40  ;;  %8110 = vmatprep.mubr.f32.mxu1 %v2963_v56  ;;  %v12285_v43 = vld [vmem:[#allocation50_spill] sm:$0xff]  ;;  %v12289_v30 = vld [vmem:[#allocation56_spill] sm:$0xff] }
 0x21e   : > { %v2785_v29 = vpop.f32.mrf.mxu0  ;;  %8185 = vmatmul.mubr.f32.gmra.mxu0 %v10737_v14  ;;  %8111 = vmatmul.mubr.f32.gmra.mxu1 %v2964_v57  ;;  %v1984_v62 = vadd.f32 %v12278_v13, %v12277_v18  ;;  %v2592_v9 = vadd.f32 %v10577_v25, %v2286_v26  ;;  %v1983_v8 = vadd.f32 %v12280_v19, %v1677_v34  ;;  %v12282_v25 = vld [vmem:[#allocation88_spill] sm:$0xff]  ;;  %v10787_v13 = vpop.f32.mrf.mxu1  ;;  %v12292_v19 = vld [vmem:[#allocation23_spill] sm:$0xff] }
 0x21f   : > { %3053 = vst [vmem:[#allocation2 + $0x99] sm:$0xff] %v2966_v5  ;;  %v2965_v41 = vmax.f32 %v2933_v16, 0.0  ;;  %v2936_v11 = vadd.f32 %v10606_v53, %v2897_v15  ;;  %v2896_v7 = vadd.f32 %v2785_v29, %v2590_v0  ;;  %v1679_v21 = vadd.f32 %v12281_v4, %v1373_v17  ;;  %v12283_v16 = vld [vmem:[#allocation20_spill] sm:$0xff]  ;;  %v12293_v4 = vld [vmem:[#allocation54_spill] sm:$0xff] }
 0x220   : > { %v8038_v56 = vpop.f32.mrf.mxu0  ;;  %v10756_v59 = vld [vmem:[#allocation2 + $0x60] sm:$0xff]  ;;  %v10758_v57 = vld [vmem:[#allocation2 + $0x68] sm:$0xff]  ;;  %v2595_v28 = vadd.f32 %v10592_v44, %v2289_v27  ;;  %v2291_v0 = vadd.f32 %v12282_v25, %v1984_v62  ;;  %v1375_v15 = vadd.f32 %v12283_v16, %v1068_v52  ;;  %v1070_v31 = vadd.f32 %v12284_v55, %v10652_v60  ;;  %v12286_v44 = vld [vmem:[#allocation51_spill] sm:$0xff] }
 0x221   : > { %3052 = vst [vmem:[#allocation2 + $0x91] sm:$0xff] %v2965_v41  ;;  %v2968_v63 = vmax.f32 %v2936_v11, 0.0  ;;  %v2935_v12 = vadd.f32 %v10606_v53, %v2896_v7  ;;  %v2899_v37 = vadd.f32 %v8038_v56, %v2593_v35  ;;  %8187 = vmatprep.mubr.f32.mxu0 %v10756_v59  ;;  %8113 = vmatprep.mubr.f32.mxu1 %v2965_v41  ;;  %v12287_v35 = vld [vmem:[#allocation90_spill] sm:$0xff]  ;;  %v12288_v60 = vld [vmem:[#allocation53_spill] sm:$0xff]  ;;  %v12297_v55 = vld [vmem:[#allocation60_spill] sm:$0xff] }
 0x222   : > { %v2795_v50 = vpop.f32.mrf.mxu0  ;;  %8188 = vmatmul.mubr.f32.gmra.mxu0 %v10758_v57  ;;  %8114 = vmatmul.mubr.f32.gmra.mxu1 %v2966_v5  ;;  %v1986_v34 = vadd.f32 %v12286_v44, %v12285_v43  ;;  %v2594_v47 = vadd.f32 %v10613_v61, %v2288_v6  ;;  %v2290_v41 = vadd.f32 %v12287_v35, %v1983_v8  ;;  %v12290_v61 = vld [vmem:[#allocation91_spill] sm:$0xff]  ;;  %v10808_v44 = vpop.f32.mrf.mxu1 }
 0x223   : > { %3055 = vst [vmem:[#allocation2 + $0xb1] sm:$0xff] %v2968_v63  ;;  %v2967_v38 = vmax.f32 %v2935_v12, 0.0  ;;  %v2938_v3 = vadd.f32 %v10606_v53, %v2899_v37  ;;  %v2898_v26 = vadd.f32 %v2795_v50, %v2592_v9  ;;  %v1985_v17 = vadd.f32 %v12288_v60, %v1679_v21  ;;  %v12291_v12 = vld [vmem:[#allocation22_spill] sm:$0xff]  ;;  %v12294_v21 = vld [vmem:[#allocation55_spill] sm:$0xff]  ;;  %v12295_v50 = vld [vmem:[#allocation93_spill] sm:$0xff] }
 0x224   : > { %v8041_v27 = vpop.f32.mrf.mxu0  ;;  %v10777_v29 = vld [vmem:[#allocation2 + $0x78] sm:$0xff]  ;;  %v10779_v5 = vld [vmem:[#allocation2 + $0x80] sm:$0xff]  ;;  %v1681_v52 = vadd.f32 %v12289_v30, %v1375_v15  ;;  %v2293_v18 = vadd.f32 %v12290_v61, %v1986_v34  ;;  %v2597_v1 = vadd.f32 %v10635_v39, %v2291_v0  ;;  %v1377_v37 = vadd.f32 %v12291_v12, %v1070_v31  ;;  %v12301_v30 = vld [vmem:[#allocation58_spill] sm:$0xff] }
 0x225   : > { %3054 = vst [vmem:[#allocation2 + $0xa9] sm:$0xff] %v2967_v38  ;;  %v2970_v11 = vmax.f32 %v2938_v3, 0.0  ;;  %v2937_v7 = vadd.f32 %v10606_v53, %v2898_v26  ;;  %v2901_v58 = vadd.f32 %v8041_v27, %v2595_v28  ;;  %8190 = vmatprep.mubr.f32.mxu0 %v10777_v29  ;;  %8116 = vmatprep.mubr.f32.mxu1 %v2967_v38  ;;  %v12300_v60 = vld [vmem:[#allocation25_spill] sm:$0xff] }
 0x226   : > { %v2805_v62 = vpop.f32.mrf.mxu0  ;;  %8191 = vmatmul.mubr.f32.gmra.mxu0 %v10779_v5  ;;  %8117 = vmatmul.mubr.f32.gmra.mxu1 %v2968_v63  ;;  %v1072_v8 = vadd.f32 %v12292_v19, %v10663_v23  ;;  %v1988_v28 = vadd.f32 %v12294_v21, %v12293_v4  ;;  %v2292_v25 = vadd.f32 %v12295_v50, %v1985_v17  ;;  %v12296_v23 = vld [vmem:[#allocation57_spill] sm:$0xff]  ;;  %v12305_v19 = vld [vmem:[#allocation64_spill] sm:$0xff]  ;;  %v10829_v21 = vpop.f32.mrf.mxu1 }
 0x227   : > { %3057 = vst [vmem:[#allocation2 + $0xc9] sm:$0xff] %v2970_v11  ;;  %v2969_v6 = vmax.f32 %v2937_v7, 0.0  ;;  %v2940_v56 = vadd.f32 %v10606_v53, %v2901_v58  ;;  %v2900_v9 = vadd.f32 %v2805_v62, %v2594_v47  ;;  %v2596_v39 = vadd.f32 %v10657_v49, %v2290_v41  ;;  %v12298_v49 = vld [vmem:[#allocation94_spill] sm:$0xff]  ;;  %v12299_v7 = vld [vmem:[#allocation24_spill] sm:$0xff] }
 0x228   : > { %v8044_v38 = vpop.f32.mrf.mxu0  ;;  %v10798_v3 = vld [vmem:[#allocation2 + $0x90] sm:$0xff]  ;;  %v10800_v63 = vld [vmem:[#allocation2 + $0x98] sm:$0xff]  ;;  %v1987_v15 = vadd.f32 %v12296_v23, %v1681_v52  ;;  %v1683_v31 = vadd.f32 %v12297_v55, %v1377_v37  ;;  %v2599_v43 = vadd.f32 %v10679_v42, %v2293_v18  ;;  %v2295_v47 = vadd.f32 %v12298_v49, %v1988_v28  ;;  %v12309_v55 = vld [vmem:[#allocation62_spill] sm:$0xff] }
 0x229   : > { %3056 = vst [vmem:[#allocation2 + $0xc1] sm:$0xff] %v2969_v6  ;;  %v2972_v0 = vmax.f32 %v2940_v56, 0.0  ;;  %v2939_v26 = vadd.f32 %v10606_v53, %v2900_v9  ;;  %v2903_v16 = vadd.f32 %v8044_v38, %v2597_v1  ;;  %8193 = vmatprep.mubr.f32.mxu0 %v10798_v3  ;;  %8119 = vmatprep.mubr.f32.mxu1 %v2969_v6  ;;  %v12302_v42 = vld [vmem:[#allocation59_spill] sm:$0xff]  ;;  %v12303_v1 = vld [vmem:[#allocation97_spill] sm:$0xff] }
 0x22a   : > { %v2815_v34 = vpop.f32.mrf.mxu0  ;;  %8194 = vmatmul.mubr.f32.gmra.mxu0 %v10800_v63  ;;  %8120 = vmatmul.mubr.f32.gmra.mxu1 %v2970_v11  ;;  %v1379_v58 = vadd.f32 %v12299_v7, %v1072_v8  ;;  %v1074_v17 = vadd.f32 %v12300_v60, %v10674_v36  ;;  %v1990_v52 = vadd.f32 %v12302_v42, %v12301_v30  ;;  %v12304_v36 = vld [vmem:[#allocation61_spill] sm:$0xff]  ;;  %v12308_v23 = vld [vmem:[#allocation27_spill] sm:$0xff]  ;;  %v12313_v60 = vld [vmem:[#allocation68_spill] sm:$0xff]  ;;  %v7979_v42 = vpop.f32.mrf.mxu1 }
 0x22b   : > { %3059 = vst [vmem:[#allocation2 + $0xe1] sm:$0xff] %v2972_v0  ;;  %v2971_v27 = vmax.f32 %v2939_v26, 0.0  ;;  %v2942_v35 = vadd.f32 %v10606_v53, %v2903_v16  ;;  %v2902_v41 = vadd.f32 %v2815_v34, %v2596_v39  ;;  %v2598_v61 = vadd.f32 %v10702_v45, %v2292_v25  ;;  %v12306_v45 = vld [vmem:[#allocation98_spill] sm:$0xff]  ;;  %v12311_v34 = vld [vmem:[#allocation99_spill] sm:$0xff] }
 0x22c   : > { %v8047_v18 = vpop.f32.mrf.mxu0  ;;  %v10819_v62 = vld [vmem:[#allocation2 + $0xa8] sm:$0xff]  ;;  %v10821_v11 = vld [vmem:[#allocation2 + $0xb0] sm:$0xff]  ;;  %v2294_v6 = vadd.f32 %v12303_v1, %v1987_v15  ;;  %v1989_v37 = vadd.f32 %v12304_v36, %v1683_v31  ;;  %v1685_v8 = vadd.f32 %v12305_v19, %v1379_v58  ;;  %v2297_v4 = vadd.f32 %v12306_v45, %v1990_v52 }
 0x22d   : > { %3058 = vst [vmem:[#allocation2 + $0xd9] sm:$0xff] %v2971_v27  ;;  %v2974_v56 = vmax.f32 %v2942_v35, 0.0  ;;  %v2941_v9 = vadd.f32 %v10606_v53, %v2902_v41  ;;  %v2905_v12 = vadd.f32 %v8047_v18, %v2599_v43  ;;  %8196 = vmatprep.mubr.f32.mxu0 %v10819_v62  ;;  %8122 = vmatprep.mubr.f32.mxu1 %v2971_v27  ;;  %v12307_v26 = vld [vmem:[#allocation26_spill] sm:$0xff]  ;;  %v12310_v31 = vld [vmem:[#allocation63_spill] sm:$0xff] }
 0x22e   : > { %v2825_v28 = vpop.f32.mrf.mxu0  ;;  %8197 = vmatmul.mubr.f32.gmra.mxu0 %v10821_v11  ;;  %8123 = vmatmul.mubr.f32.gmra.mxu1 %v2972_v0  ;;  %v2601_v50 = vadd.f32 %v10724_v24, %v2295_v47  ;;  %v1381_v16 = vadd.f32 %v12307_v26, %v1074_v17  ;;  %v1076_v15 = vadd.f32 %v12308_v23, %v10685_v2  ;;  %v12312_v2 = vld [vmem:[#allocation65_spill] sm:$0xff]  ;;  %v12316_v36 = vld [vmem:[#allocation66_spill] sm:$0xff] }
 0x22f   : > { %3061 = vst [vmem:[#allocation2 + $0xf9] sm:$0xff] %v2974_v56  ;;  %v2973_v25 = vmax.f32 %v2941_v9, 0.0  ;;  %v2944_v38 = vadd.f32 %v10606_v53, %v2905_v12  ;;  %v2904_v39 = vadd.f32 %v2825_v28, %v2598_v61  ;;  %v1992_v43 = vadd.f32 %v12310_v31, %v12309_v55  ;;  %v12315_v9 = vld [vmem:[#allocation28_spill] sm:$0xff] }
 0x230   : > { %v2296_v49 = vadd.f32 %v12311_v34, %v1989_v37  ;;  %v8050_v27 = vpop.f32.mrf.mxu0  ;;  %v10840_v35 = vld [vmem:[#allocation2 + $0xc0] sm:$0xff]  ;;  %v10842_v0 = vld [vmem:[#allocation2 + $0xc8] sm:$0xff]  ;;  %v2600_v24 = vadd.f32 %v10745_v33, %v2294_v6  ;;  %v1991_v58 = vadd.f32 %v12312_v2, %v1685_v8  ;;  %v1687_v17 = vadd.f32 %v12313_v60, %v1381_v16  ;;  %v12314_v33 = vld [vmem:[#allocation100_spill] sm:$0xff] }
 0x231   : > { %3060 = vst [vmem:[#allocation2 + $0xf1] sm:$0xff] %v2973_v25  ;;  %v2976_v47 = vmax.f32 %v2944_v38, 0.0  ;;  %v2943_v41 = vadd.f32 %v10606_v53, %v2904_v39  ;;  %v2907_v7 = vadd.f32 %v8050_v27, %v2601_v50  ;;  %8199 = vmatprep.mubr.f32.mxu0 %v10840_v35  ;;  %8125 = vmatprep.mubr.f32.mxu1 %v2973_v25  ;;  %v12317_v37 = vld [vmem:[#allocation67_spill] sm:$0xff]  ;;  %v12319_v39 = vld [vmem:[#allocation69_spill] sm:$0xff]  ;;  %v12320_v16 = vld [vmem:[#allocation72_spill] sm:$0xff] }
 0x232   : > { %v2603_v30 = vadd.f32 %v10766_v22, %v2297_v4  ;;  %v2835_v52 = vpop.f32.mrf.mxu0  ;;  %8200 = vmatmul.mubr.f32.gmra.mxu0 %v10842_v0  ;;  %8126 = vmatmul.mubr.f32.gmra.mxu1 %v2974_v56  ;;  %v2299_v61 = vadd.f32 %v12314_v33, %v1992_v43  ;;  %v1383_v12 = vadd.f32 %v12315_v9, %v1076_v15  ;;  %v12318_v56 = vld [vmem:[#allocation101_spill] sm:$0xff]  ;;  %v2559_v15 = vpop.f32.mrf.mxu1  ;;  %v12321_v27 = vld [vmem:[#allocation70_spill] sm:$0xff] }
 0x233   : > { %3063 = vst [vmem:[#allocation2 + $0x111] sm:$0xff] %v2976_v47  ;;  %v2975_v18 = vmax.f32 %v2943_v41, 0.0  ;;  %v2946_v1 = vadd.f32 %v10606_v53, %v2907_v7  ;;  %v2906_v6 = vadd.f32 %v2835_v52, %v2600_v24  ;;  %v1994_v19 = vadd.f32 %v12317_v37, %v12316_v36  ;;  %v12322_v24 = vld [vmem:[#allocation71_spill] sm:$0xff]  ;;  %v12323_v7 = vld [vmem:[#allocation102_spill] sm:$0xff]  ;;  %v12324_v52 = vld [vmem:[#allocation73_spill] sm:$0xff] }
 0x234   : > { %v2602_v8 = vadd.f32 %v10787_v13, %v2296_v49  ;;  %v8053_v22 = vpop.f32.mrf.mxu0  ;;  %v10857_v45 = vld [vmem:[#allocation2 + $0xd8] sm:$0xff]  ;;  %v10859_v4 = vld [vmem:[#allocation2 + $0xe0] sm:$0xff]  ;;  %v2298_v28 = vadd.f32 %v12318_v56, %v1991_v58  ;;  %v1993_v26 = vadd.f32 %v12319_v39, %v1687_v17  ;;  %v1689_v23 = vadd.f32 %v12320_v16, %v1383_v12 }
 0x235   : > { %3062 = vst [vmem:[#allocation2 + $0x109] sm:$0xff] %v2975_v18  ;;  %v2978_v50 = vmax.f32 %v2946_v1, 0.0  ;;  %v2945_v25 = vadd.f32 %v10606_v53, %v2906_v6  ;;  %v2909_v38 = vadd.f32 %v8053_v22, %v2603_v30  ;;  %8202 = vmatprep.mubr.f32.mxu0 %v10857_v45  ;;  %8128 = vmatprep.mubr.f32.mxu1 %v2975_v18  ;;  %v7982_v18 = vpop.f32.mrf.mxu1 }
 0x236   : > { %v2301_v13 = vadd.f32 %v10571_v32, %v1994_v19  ;;  %v2845_v55 = vpop.f32.mrf.mxu0  ;;  %8203 = vmatmul.mubr.f32.gmra.mxu0 %v10859_v4  ;;  %8129 = vmatmul.mubr.f32.gmra.mxu1 %v2976_v47  ;;  %v2605_v31 = vadd.f32 %v10808_v44, %v2299_v61  ;;  %v1996_v41 = vadd.f32 %v12322_v24, %v12321_v27 }
 0x237   : > { %3065 = vst [vmem:[#allocation2 + $0x129] sm:$0xff] %v2978_v50  ;;  %v2977_v43 = vmax.f32 %v2945_v25, 0.0  ;;  %v2948_v34 = vadd.f32 %v10606_v53, %v2909_v38  ;;  %v2908_v49 = vadd.f32 %v2845_v55, %v2602_v8  ;;  %v2300_v2 = vadd.f32 %v12323_v7, %v1993_v26  ;;  %v3621_v7 = vld [vmem:[#allocation2 + $0x2] sm:$0xff] }
 0x238   : > { %v8056_v58 = vpop.f32.mrf.mxu0  ;;  %v10873_v60 = vld [vmem:[#allocation2 + $0xf0] sm:$0xff]  ;;  %v10875_v32 = vld [vmem:[#allocation2 + $0xf8] sm:$0xff]  ;;  %v2604_v17 = vadd.f32 %v10829_v21, %v2298_v28  ;;  %v1995_v33 = vadd.f32 %v12324_v52, %v1689_v23  ;;  %v2607_v61 = vadd.f32 %v7979_v42, %v2301_v13  ;;  %v2303_v6 = vadd.f32 %v10586_v51, %v1996_v41  ;;  %v2569_v51 = vpop.f32.mrf.mxu1 }
 0x239   : > { %3064 = vst [vmem:[#allocation2 + $0x121] sm:$0xff] %v2977_v43  ;;  %v2980_v47 = vmax.f32 %v2948_v34, 0.0  ;;  %v2947_v44 = vadd.f32 %v10606_v53, %v2908_v49  ;;  %v2911_v30 = vadd.f32 %v8056_v58, %v2605_v31  ;;  %8205 = vmatprep.mubr.f32.mxu0 %v10873_v60  ;;  %8131 = vmatprep.mubr.f32.mxu1 %v2977_v43  ;;  %v10935_v52 = vld [vmem:[#allocation2 + $0x1a] sm:$0xff] }
 0x23a   : > { %v2855_v1 = vpop.f32.mrf.mxu0  ;;  %8206 = vmatmul.mubr.f32.gmra.mxu0 %v10875_v32  ;;  %8132 = vmatmul.mubr.f32.gmra.mxu1 %v2978_v50  ;;  %v2606_v36 = vadd.f32 %v2559_v15, %v2300_v2  ;;  %v2302_v42 = vadd.f32 %v10594_v20, %v1995_v33  ;;  %v2609_v25 = vadd.f32 %v7982_v18, %v2303_v6  ;;  %v12325_v33 = vld [vmem:[#allocation74_spill] sm:$0xff] }
 0x23b   : > { %3067 = vst [vmem:[#allocation2 + $0x141] sm:$0xff] %v2980_v47  ;;  %v2979_v21 = vmax.f32 %v2947_v44, 0.0  ;;  %v2950_v9 = vadd.f32 %v10606_v53, %v2911_v30  ;;  %v2910_v12 = vadd.f32 %v2855_v1, %v2604_v17  ;;  %v10944_v1 = vld [vmem:[#allocation2 + $0x22] sm:$0xff] }
 0x23c   : > { %v8059_v37 = vpop.f32.mrf.mxu0  ;;  %v10884_v19 = vld [vmem:[#allocation2 + $0x108] sm:$0xff]  ;;  %v10886_v8 = vld [vmem:[#allocation2 + $0x110] sm:$0xff]  ;;  %v2608_v13 = vadd.f32 %v2569_v51, %v2302_v42 }
 0x23d   : > { %3066 = vst [vmem:[#allocation2 + $0x139] sm:$0xff] %v2979_v21  ;;  %v2982_v22 = vmax.f32 %v2950_v9, 0.0  ;;  %v2949_v56 = vadd.f32 %v10606_v53, %v2910_v12  ;;  %v2913_v28 = vadd.f32 %v8059_v37, %v2607_v61  ;;  %8208 = vmatprep.mubr.f32.mxu0 %v10884_v19  ;;  %8134 = vmatprep.mubr.f32.mxu1 %v2979_v21  ;;  %v6376_v6 = vld [vmem:[%s12110_s3 + $0x268] sm:$0xff]  ;;  %v10951_v21 = vld [vmem:[#allocation2 + $0x32] sm:$0xff]  ;;  %v10955_v9 = vld [vmem:[#allocation2 + $0x3a] sm:$0xff] }
 0x23e   : > { %v2865_v50 = vpop.f32.mrf.mxu0  ;;  %8209 = vmatmul.mubr.f32.gmra.mxu0 %v10886_v8  ;;  %8135 = vmatmul.mubr.f32.gmra.mxu1 %v2980_v47  ;;  %v3622_v47 = vld [vmem:[#allocation2 + $0xa] sm:$0xff]  ;;  %v6375_v12 = vld [vmem:[%s12110_s3 + $0x260] sm:$0xff] }
 0x23f   : > { %3069 = vst [vmem:[#allocation2 + $0x159] sm:$0xff] %v2982_v22  ;;  %v10892_v38 = vmax.f32 %v2949_v56, 0.0  ;;  %v2952_v39 = vadd.f32 %v10606_v53, %v2913_v28  ;;  %v2912_v20 = vadd.f32 %v2865_v50, %v2606_v36  ;;  %v10962_v36 = vld [vmem:[#allocation2 + $0x4a] sm:$0xff]  ;;  %v10970_v56 = vld [vmem:[#allocation2 + $0x52] sm:$0xff] }
 0x240   : > { %v8062_v26 = vpop.f32.mrf.mxu0  ;;  %v10895_v16 = vld [vmem:[#allocation2 + $0x120] sm:$0xff]  ;;  %v10897_v23 = vld [vmem:[#allocation2 + $0x128] sm:$0xff]  ;;  %v12326_v37 = vld [vmem:[#allocation95_spill] sm:$0xff] }
 0x241   : > { %3068 = vst [vmem:[#allocation2 + $0x151] sm:$0xff] %v10892_v38  ;;  %v2984_v15 = vmax.f32 %v2952_v39, 0.0  ;;  %v2951_v55 = vadd.f32 %v10606_v53, %v2912_v20  ;;  %v2915_v31 = vadd.f32 %v8062_v26, %v2609_v25  ;;  %8211 = vmatprep.mubr.f32.mxu0 %v10895_v16  ;;  %8137 = vmatprep.mubr.f32.mxu1 %v10892_v38  ;;  %v6392_v51 = vld [vmem:[%s12110_s3 + $0x2e8] sm:$0xff]  ;;  %v10993_v25 = vld [vmem:[#allocation2 + $0x7a] sm:$0xff]  ;;  %v11007_v20 = vld [vmem:[#allocation2 + $0x92] sm:$0xff] }
 0x242   : > { %v2875_v43 = vpop.f32.mrf.mxu0  ;;  %8212 = vmatmul.mubr.f32.gmra.mxu0 %v10897_v23  ;;  %8138 = vmatmul.mubr.f32.gmra.mxu1 %v2982_v22  ;;  %v10986_v50 = vld [vmem:[#allocation2 + $0x6a] sm:$0xff]  ;;  %v11000_v39 = vld [vmem:[#allocation2 + $0x82] sm:$0xff]  ;;  %v11014_v26 = vld [vmem:[#allocation2 + $0x9a] sm:$0xff] }
 0x243   : > { %3071 = vst [vmem:[#allocation2 + $0x171] sm:$0xff] %v2984_v15  ;;  %v10904_v34 = vmax.f32 %v2951_v55, 0.0  ;;  %v10907_v49 = vadd.f32 %v10606_v53, %v2915_v31  ;;  %v2914_v27 = vadd.f32 %v2875_v43, %v2608_v13  ;;  %v11021_v13 = vld [vmem:[#allocation2 + $0xaa] sm:$0xff]  ;;  %v11035_v55 = vld [vmem:[#allocation2 + $0xc2] sm:$0xff]  ;;  %v11049_v43 = vld [vmem:[#allocation2 + $0xda] sm:$0xff] }
 0x244   : > { %v10909_v24 = vld [vmem:[#allocation2 + $0x138] sm:$0xff]  ;;  %v10911_v41 = vld [vmem:[#allocation2 + $0x140] sm:$0xff]  ;;  %v11042_v31 = vld [vmem:[#allocation2 + $0xca] sm:$0xff] }
 0x245   : > { %3070 = vst [vmem:[#allocation2 + $0x169] sm:$0xff] %v10904_v34  ;;  %v2986_v2 = vmax.f32 %v10907_v49, 0.0  ;;  %v10916_v58 = vadd.f32 %v10606_v53, %v2914_v27  ;;  %8214 = vmatprep.mubr.f32.mxu0 %v10909_v24  ;;  %8140 = vmatprep.mubr.f32.mxu1 %v10904_v34  ;;  %v6377_v53 = vld [vmem:[%s12110_s3 + $0x270] sm:$0xff]  ;;  %v11056_v27 = vld [vmem:[#allocation2 + $0xe2] sm:$0xff] }
 0x246   : > { %8215 = vmatmul.mubr.f32.gmra.mxu0 %v10911_v41  ;;  %8141 = vmatmul.mubr.f32.gmra.mxu1 %v2984_v15  ;;  %v11028_v15 = vld [vmem:[#allocation2 + $0xb2] sm:$0xff] }
 0x247   : > { %3073 = vst [vmem:[#allocation2 + $0x189] sm:$0xff] %v2986_v2  ;;  %v2985_v17 = vmax.f32 %v10916_v58, 0.0  ;;  %8255 = vmatprep.mubr.f32.mxu1 %v3621_v7  ;;  %v11063_v7 = vld [vmem:[#allocation2 + $0xf2] sm:$0xff] }
 0x248   : > { %v10924_v44 = vld [vmem:[#allocation2 + $0x150] sm:$0xff]  ;;  %v10926_v30 = vld [vmem:[#allocation2 + $0x158] sm:$0xff] }
 0x249   : > { %3072 = vst [vmem:[#allocation2 + $0x181] sm:$0xff] %v2985_v17  ;;  %8217 = vmatprep.mubr.f32.mxu0 %v10924_v44  ;;  %v4846_v58 = vld [vmem:[#allocation2 + $0x30] sm:$0xff] }
 0x24a   : > { %8218 = vmatmul.mubr.f32.gmra.mxu0 %v10926_v30  ;;  %8256 = vmatmul.mubr.f32.vlgmr.msra.gmra.mxu1 %v3622_v47  ;;  %v8097_v42 = vpop.f32.mrf.mxu1  ;;  %v11070_v47 = vld [vmem:[#allocation2 + $0xfa] sm:$0xff] }
 0x24b   : > { %8258 = vmatprep.mubr.f32.mxu1 %v10935_v52  ;;  %8384 = vmatpush3.msra.mxu1 %v12325_v33  ;;  %v11084_v33 = vld [vmem:[#allocation2 + $0x112] sm:$0xff] }
 0x24c   : > { %v10939_v61 = vld [vmem:[#allocation2 + $0x168] sm:$0xff]  ;;  %v10941_v18 = vld [vmem:[#allocation2 + $0x170] sm:$0xff]  ;;  %8385 = vmatprep.subr.mxu1 %v6377_v53  ;;  %v11381_v49 = vpop.f32.mrf.mxu1 }
 0x24d   : > { %8220 = vmatprep.mubr.f32.mxu0 %v10939_v61  ;;  %8386 = vmatpush3.msra.mxu1 %v6377_v53  ;;  %v11077_v53 = vld [vmem:[#allocation2 + $0x10a] sm:$0xff] }
 0x24e   : > { %8221 = vmatmul.mubr.f32.gmra.mxu0 %v10941_v18  ;;  %8259 = vmatmul.mubr.f32.gmra.mxu1 %v10944_v1 }
 0x24f   : > { %8335 = vmatprep.mubr.f32.mxu0 %v10692_v10  ;;  %8261 = vmatprep.mubr.f32.mxu1 %v10951_v21  ;;  %v6393_v10 = vld [vmem:[%s12110_s3 + $0x2f0] sm:$0xff] }
 0x250   : > { %8387 = vmatprep.subr.mxu1 %v6376_v6 }
 0x251   : > { %8388 = vmatpush3.msra.mxu1 %v6376_v6  ;;  %v8177_v22 = vpop.f32.mrf.mxu0  ;;  %v11091_v6 = vld [vmem:[#allocation2 + $0x122] sm:$0xff] }
 0x252   : > { %8336 = vmatmul.mubr.f32.vlgmr.msra.gmra.mxu0 %v10694_v48  ;;  %8262 = vmatmul.mubr.f32.gmra.mxu1 %v10955_v9  ;;  %v6374_v48 = vld [vmem:[%s12110_s3 + $0x258] sm:$0xff]  ;;  %v10975_v28 = vadd.f32 %v8177_v22, %v8097_v42 }
 0x253   : > { %8338 = vmatprep.mubr.f32.mxu0 %v10714_v46  ;;  %8264 = vmatprep.mubr.f32.mxu1 %v10962_v36  ;;  %v10979_v46 = vld [vmem:[#allocation2 + $0x62] sm:$0xff]  ;;  %v11119_v42 = vld [vmem:[#allocation2 + $0x152] sm:$0xff]  ;;  %v11126_v22 = vld [vmem:[#allocation2 + $0x15a] sm:$0xff] }
 0x254   : > { %8389 = vmatprep.subr.mxu1 %v6375_v12  ;;  %8464 = vmatpush3.msra.mxu0 %v12326_v37  ;;  %v11112_v37 = vld [vmem:[#allocation2 + $0x142] sm:$0xff] }
 0x255   : > { %8390 = vmatpush3.msra.mxu1 %v6375_v12  ;;  %8465 = vmatprep.subr.mxu0 %v6393_v10  ;;  %v11098_v12 = vld [vmem:[#allocation2 + $0x12a] sm:$0xff] }
 0x256   : > { %8339 = vmatmul.mubr.f32.gmra.mxu0 %v10716_v54  ;;  %8265 = vmatmul.mubr.f32.gmra.mxu1 %v10970_v56  ;;  %v6373_v54 = vld [vmem:[%s12110_s3 + $0x250] sm:$0xff] }
 0x257   : > { %8341 = vmatprep.mubr.f32.mxu0 %v10735_v40  ;;  %8267 = vmatprep.mubr.f32.mxu1 %v10979_v46  ;;  %v6391_v40 = vld [vmem:[%s12110_s3 + $0x2e0] sm:$0xff] }
 0x258   : > { %8391 = vmatprep.subr.mxu1 %v6374_v48  ;;  %8466 = vmatpush3.msra.mxu0 %v6393_v10  ;;  %v11105_v10 = vld [vmem:[#allocation2 + $0x13a] sm:$0xff] }
 0x259   : > { %8392 = vmatpush3.msra.mxu1 %v6374_v48  ;;  %8467 = vmatprep.subr.mxu0 %v6392_v51  ;;  %v11133_v48 = vld [vmem:[#allocation2 + $0x16a] sm:$0xff] }
 0x25a   : > { %8342 = vmatmul.mubr.f32.gmra.mxu0 %v10737_v14  ;;  %8268 = vmatmul.mubr.f32.gmra.mxu1 %v10986_v50  ;;  %v6372_v14 = vld [vmem:[%s12110_s3 + $0x248] sm:$0xff] }
 0x25b   : > { %8344 = vmatprep.mubr.f32.mxu0 %v10756_v59  ;;  %8270 = vmatprep.mubr.f32.mxu1 %v10993_v25  ;;  %v6390_v59 = vld [vmem:[%s12110_s3 + $0x2d8] sm:$0xff] }
 0x25c   : > { %8393 = vmatprep.subr.mxu1 %v6373_v54  ;;  %8468 = vmatpush3.msra.mxu0 %v6392_v51  ;;  %v11140_v51 = vld [vmem:[#allocation2 + $0x172] sm:$0xff] }
 0x25d   : > { %8394 = vmatpush3.msra.mxu1 %v6373_v54  ;;  %8469 = vmatprep.subr.mxu0 %v6391_v40  ;;  %v4233_v54 = vld [vmem:[#allocation2 + $0x19] sm:$0xff] }
 0x25e   : > { %8345 = vmatmul.mubr.f32.gmra.mxu0 %v10758_v57  ;;  %8271 = vmatmul.mubr.f32.gmra.mxu1 %v11000_v39  ;;  %v6371_v57 = vld [vmem:[%s12110_s3 + $0x240] sm:$0xff] }
 0x25f   : > { %8347 = vmatprep.mubr.f32.mxu0 %v10777_v29  ;;  %8273 = vmatprep.mubr.f32.mxu1 %v11007_v20  ;;  %v6389_v29 = vld [vmem:[%s12110_s3 + $0x2d0] sm:$0xff] }
 0x260   : > { %8395 = vmatprep.subr.mxu1 %v6372_v14  ;;  %8470 = vmatpush3.msra.mxu0 %v6391_v40  ;;  %v6379_v40 = vld [vmem:[%s12110_s3 + $0x280] sm:$0xff] }
 0x261   : > { %8396 = vmatpush3.msra.mxu1 %v6372_v14  ;;  %8471 = vmatprep.subr.mxu0 %v6390_v59  ;;  %v11160_v14 = vld [vmem:[#allocation2 + $0x180] sm:$0xff] }
 0x262   : > { %8348 = vmatmul.mubr.f32.gmra.mxu0 %v10779_v5  ;;  %8274 = vmatmul.mubr.f32.gmra.mxu1 %v11014_v26  ;;  %v6370_v5 = vld [vmem:[%s12110_s3 + $0x238] sm:$0xff] }
 0x263   : > { %8350 = vmatprep.mubr.f32.mxu0 %v10798_v3  ;;  %8276 = vmatprep.mubr.f32.mxu1 %v11021_v13  ;;  %v6388_v3 = vld [vmem:[%s12110_s3 + $0x2c8] sm:$0xff] }
 0x264   : > { %8397 = vmatprep.subr.mxu1 %v6371_v57  ;;  %8472 = vmatpush3.msra.mxu0 %v6390_v59  ;;  %v6409_v59 = vld [vmem:[%s12110_s3 + $0x370] sm:$0xff] }
 0x265   : > { %8398 = vmatpush3.msra.mxu1 %v6371_v57  ;;  %8473 = vmatprep.subr.mxu0 %v6389_v29  ;;  %v11166_v57 = vld [vmem:[#allocation2 + $0x31] sm:$0xff] }
 0x266   : > { %8351 = vmatmul.mubr.f32.gmra.mxu0 %v10800_v63  ;;  %8277 = vmatmul.mubr.f32.gmra.mxu1 %v11028_v15  ;;  %v6369_v63 = vld [vmem:[%s12110_s3 + $0x230] sm:$0xff] }
 0x267   : > { %8353 = vmatprep.mubr.f32.mxu0 %v10819_v62  ;;  %8279 = vmatprep.mubr.f32.mxu1 %v11035_v55  ;;  %v6387_v62 = vld [vmem:[%s12110_s3 + $0x2c0] sm:$0xff] }
 0x268   : > { %8399 = vmatprep.subr.mxu1 %v6370_v5  ;;  %8474 = vmatpush3.msra.mxu0 %v6389_v29  ;;  %v11169_v29 = vld [vmem:[#allocation2 + $0x188] sm:$0xff] }
 0x269   : > { %8400 = vmatpush3.msra.mxu1 %v6370_v5  ;;  %8475 = vmatprep.subr.mxu0 %v6388_v3  ;;  %v11177_v5 = vld [vmem:[#allocation2 + $0x39] sm:$0xff] }
 0x26a   : > { %8354 = vmatmul.mubr.f32.gmra.mxu0 %v10821_v11  ;;  %8280 = vmatmul.mubr.f32.gmra.mxu1 %v11042_v31  ;;  %v6368_v11 = vld [vmem:[%s12110_s3 + $0x228] sm:$0xff] }
 0x26b   : > { %8356 = vmatprep.mubr.f32.mxu0 %v10840_v35  ;;  %8282 = vmatprep.mubr.f32.mxu1 %v11049_v43  ;;  %v6386_v35 = vld [vmem:[%s12110_s3 + $0x2b8] sm:$0xff] }
 0x26c   : > { %8401 = vmatprep.subr.mxu1 %v6369_v63  ;;  %8476 = vmatpush3.msra.mxu0 %v6388_v3  ;;  %v6407_v3 = vld [vmem:[%s12110_s3 + $0x360] sm:$0xff] }
 0x26d   : > { %8402 = vmatpush3.msra.mxu1 %v6369_v63  ;;  %8477 = vmatprep.subr.mxu0 %v6387_v62  ;;  %v11183_v63 = vld [vmem:[#allocation2 + $0x49] sm:$0xff] }
 0x26e   : > { %8357 = vmatmul.mubr.f32.gmra.mxu0 %v10842_v0  ;;  %8283 = vmatmul.mubr.f32.gmra.mxu1 %v11056_v27  ;;  %v6367_v0 = vld [vmem:[%s12110_s3 + $0x220] sm:$0xff] }
 0x26f   : > { %8359 = vmatprep.mubr.f32.mxu0 %v10857_v45  ;;  %8285 = vmatprep.mubr.f32.mxu1 %v11063_v7  ;;  %v6385_v45 = vld [vmem:[%s12110_s3 + $0x2b0] sm:$0xff] }
 0x270   : > { %8403 = vmatprep.subr.mxu1 %v6368_v11  ;;  %8478 = vmatpush3.msra.mxu0 %v6387_v62  ;;  %v6406_v62 = vld [vmem:[%s12110_s3 + $0x358] sm:$0xff] }
 0x271   : > { %8404 = vmatpush3.msra.mxu1 %v6368_v11  ;;  %8479 = vmatprep.subr.mxu0 %v6386_v35  ;;  %v6405_v11 = vld [vmem:[%s12110_s3 + $0x350] sm:$0xff] }
 0x272   : > { %8360 = vmatmul.mubr.f32.gmra.mxu0 %v10859_v4  ;;  %8286 = vmatmul.mubr.f32.gmra.mxu1 %v11070_v47  ;;  %v6366_v4 = vld [vmem:[%s12110_s3 + $0x218] sm:$0xff] }
 0x273   : > { %8362 = vmatprep.mubr.f32.mxu0 %v10873_v60  ;;  %8288 = vmatprep.mubr.f32.mxu1 %v11077_v53  ;;  %v6384_v60 = vld [vmem:[%s12110_s3 + $0x2a8] sm:$0xff] }
 0x274   : > { %8405 = vmatprep.subr.mxu1 %v6367_v0  ;;  %8480 = vmatpush3.msra.mxu0 %v6386_v35  ;;  %v11197_v35 = vld [vmem:[#allocation2 + $0x61] sm:$0xff] }
 0x275   : > { %8406 = vmatpush3.msra.mxu1 %v6367_v0  ;;  %8481 = vmatprep.subr.mxu0 %v6385_v45  ;;  %v6403_v0 = vld [vmem:[%s12110_s3 + $0x340] sm:$0xff] }
 0x276   : > { %8363 = vmatmul.mubr.f32.gmra.mxu0 %v10875_v32  ;;  %8289 = vmatmul.mubr.f32.gmra.mxu1 %v11084_v33  ;;  %v6365_v32 = vld [vmem:[%s12110_s3 + $0x210] sm:$0xff] }
 0x277   : > { %8365 = vmatprep.mubr.f32.mxu0 %v10884_v19  ;;  %8291 = vmatprep.mubr.f32.mxu1 %v11091_v6  ;;  %v6383_v19 = vld [vmem:[%s12110_s3 + $0x2a0] sm:$0xff] }
 0x278   : > { %8407 = vmatprep.subr.mxu1 %v6366_v4  ;;  %8482 = vmatpush3.msra.mxu0 %v6385_v45  ;;  %v11211_v45 = vld [vmem:[#allocation2 + $0x79] sm:$0xff] }
 0x279   : > { %8408 = vmatpush3.msra.mxu1 %v6366_v4  ;;  %8483 = vmatprep.subr.mxu0 %v6384_v60  ;;  %v6401_v4 = vld [vmem:[%s12110_s3 + $0x330] sm:$0xff] }
 0x27a   : > { %8366 = vmatmul.mubr.f32.gmra.mxu0 %v10886_v8  ;;  %8292 = vmatmul.mubr.f32.gmra.mxu1 %v11098_v12  ;;  %v6364_v8 = vld [vmem:[%s12110_s3 + $0x208] sm:$0xff] }
 0x27b   : > { %8368 = vmatprep.mubr.f32.mxu0 %v10895_v16  ;;  %8294 = vmatprep.mubr.f32.mxu1 %v11105_v10  ;;  %v6382_v16 = vld [vmem:[%s12110_s3 + $0x298] sm:$0xff] }
 0x27c   : > { %8409 = vmatprep.subr.mxu1 %v6365_v32  ;;  %8484 = vmatpush3.msra.mxu0 %v6384_v60  ;;  %v11225_v60 = vld [vmem:[#allocation2 + $0x91] sm:$0xff] }
 0x27d   : > { %8410 = vmatpush3.msra.mxu1 %v6365_v32  ;;  %8485 = vmatprep.subr.mxu0 %v6383_v19  ;;  %v6424_v32 = vld [vmem:[%s12110_s3 + $0x3e8] sm:$0xff] }
 0x27e   : > { %8369 = vmatmul.mubr.f32.gmra.mxu0 %v10897_v23  ;;  %8295 = vmatmul.mubr.f32.gmra.mxu1 %v11112_v37  ;;  %v6363_v23 = vld [vmem:[%s12110_s3 + $0x200] sm:$0xff] }
 0x27f   : > { %8371 = vmatprep.mubr.f32.mxu0 %v10909_v24  ;;  %8297 = vmatprep.mubr.f32.mxu1 %v11119_v42  ;;  %v6381_v24 = vld [vmem:[%s12110_s3 + $0x290] sm:$0xff] }
 0x280   : > { %8486 = vmatpush3.msra.mxu0 %v6383_v19  ;;  %8411 = vmatprep.subr.mxu1 %v6364_v8  ;;  %v11240_v19 = vld [vmem:[#allocation2 + $0xa9] sm:$0xff] }
 0x281   : > { %8487 = vmatprep.subr.mxu0 %v6382_v16  ;;  %8412 = vmatpush3.msra.mxu1 %v6364_v8  ;;  %v6400_v8 = vld [vmem:[%s12110_s3 + $0x328] sm:$0xff] }
 0x282   : > { %8372 = vmatmul.mubr.f32.gmra.mxu0 %v10911_v41  ;;  %8298 = vmatmul.mubr.f32.gmra.mxu1 %v11126_v22  ;;  %v6380_v41 = vld [vmem:[%s12110_s3 + $0x288] sm:$0xff] }
 0x283   : > { %8374 = vmatprep.mubr.f32.mxu0 %v10924_v44  ;;  %8300 = vmatprep.mubr.f32.mxu1 %v11133_v48  ;;  %v6410_v44 = vld [vmem:[%s12110_s3 + $0x378] sm:$0xff] }
 0x284   : > { %8488 = vmatpush3.msra.mxu0 %v6382_v16  ;;  %8413 = vmatprep.subr.mxu1 %v6363_v23  ;;  %v11254_v16 = vld [vmem:[#allocation2 + $0xc1] sm:$0xff] }
 0x285   : > { %8489 = vmatprep.subr.mxu0 %v6381_v24  ;;  %8414 = vmatpush3.msra.mxu1 %v6363_v23  ;;  %v6399_v23 = vld [vmem:[%s12110_s3 + $0x320] sm:$0xff] }
 0x286   : > { %8375 = vmatmul.mubr.f32.gmra.mxu0 %v10926_v30  ;;  %8301 = vmatmul.mubr.f32.gmra.mxu1 %v11140_v51  ;;  %v11157_v30 = vld [vmem:[%s12110_s3 + $0x3f8] sm:$0xff] }
 0x287   : > { %8377 = vmatprep.mubr.f32.mxu0 %v10939_v61  ;;  %8490 = vmatpush3.msra.mxu0 %v6381_v24  ;;  %v4234_v61 = vld [vmem:[#allocation2 + $0x21] sm:$0xff]  ;;  %v11268_v24 = vld [vmem:[#allocation2 + $0xd9] sm:$0xff] }
 0x288   : > { %8491 = vmatprep.subr.mxu0 %v6380_v41  ;;  %8415 = vmatprep.mubr.f32.mxu1 %v4233_v54  ;;  %v6398_v54 = vld [vmem:[%s12110_s3 + $0x318] sm:$0xff] }
 0x289   : > { %8492 = vmatpush3.msra.mxu0 %v6380_v41  ;;  %8543 = vmatprep.subr.mxu1 %v6410_v44  ;;  %v6420_v41 = vld [vmem:[%s12110_s3 + $0x3c8] sm:$0xff] }
 0x28a   : > { %8378 = vmatmul.mubr.f32.gmra.mxu0 %v10941_v18  ;;  %8493 = vmatprep.subr.mxu0 %v6379_v40  ;;  %v6408_v18 = vld [vmem:[%s12110_s3 + $0x368] sm:$0xff] }
 0x28b   : > { %8380 = vmatprep.mubr.f32.mxu0 %v11160_v14  ;;  %8494 = vmatpush3.msra.mxu0 %v6379_v40  ;;  %v11296_v40 = vld [vmem:[#allocation2 + $0x109] sm:$0xff] }
 0x28c   : > { %8416 = vmatmul.mubr.f32.vlgmr.msra.gmra.mxu1 %v4234_v61  ;;  %8623 = vmatprep.subr.mxu0 %v11157_v30  ;;  %v11310_v61 = vld [vmem:[#allocation2 + $0x121] sm:$0xff] }
 0x28d   : > { %8418 = vmatprep.mubr.f32.mxu1 %v11166_v57  ;;  %8544 = vmatpush3.msra.mxu1 %v6410_v44  ;;  %v11282_v44 = vld [vmem:[#allocation2 + $0xf1] sm:$0xff] }
 0x28e   : > { %8381 = vmatmul.mubr.f32.gmra.mxu0 %v11169_v29  ;;  %8545 = vmatprep.subr.mxu1 %v6409_v59 }
 0x28f   : > { %8495 = vmatprep.mubr.f32.mxu0 %v10935_v52  ;;  %8546 = vmatpush3.msra.mxu1 %v6409_v59  ;;  %v11191_v52 = vld [vmem:[#allocation2 + $0x51] sm:$0xff]  ;;  %v6416_v59 = vld [vmem:[%s12110_s3 + $0x3a8] sm:$0xff] }
 0x290   : > { %8419 = vmatmul.mubr.f32.gmra.mxu1 %v11177_v5  ;;  %8547 = vmatprep.subr.mxu1 %v6408_v18 }
 0x291   : > { %8421 = vmatprep.mubr.f32.mxu1 %v11183_v63  ;;  %8548 = vmatpush3.msra.mxu1 %v6408_v18  ;;  %v11324_v18 = vld [vmem:[#allocation2 + $0x139] sm:$0xff] }
 0x292   : > { %8496 = vmatmul.mubr.f32.vlgmr.msra.gmra.mxu0 %v10944_v1  ;;  %8549 = vmatprep.subr.mxu1 %v6407_v3  ;;  %v6404_v1 = vld [vmem:[%s12110_s3 + $0x348] sm:$0xff] }
 0x293   : > { %8498 = vmatprep.mubr.f32.mxu0 %v10951_v21  ;;  %8550 = vmatpush3.msra.mxu1 %v6407_v3  ;;  %v11205_v21 = vld [vmem:[#allocation2 + $0x69] sm:$0xff] }
 0x294   : > { %8422 = vmatmul.mubr.f32.gmra.mxu1 %v11191_v52  ;;  %8551 = vmatprep.subr.mxu1 %v6406_v62  ;;  %v6396_v3 = vld [vmem:[%s12110_s3 + $0x308] sm:$0xff] }
 0x295   : > { %8424 = vmatprep.mubr.f32.mxu1 %v11197_v35  ;;  %8552 = vmatpush3.msra.mxu1 %v6406_v62  ;;  %v6395_v62 = vld [vmem:[%s12110_s3 + $0x300] sm:$0xff] }
 0x296   : > { %8499 = vmatmul.mubr.f32.gmra.mxu0 %v10955_v9  ;;  %8553 = vmatprep.subr.mxu1 %v6405_v11  ;;  %v6402_v9 = vld [vmem:[%s12110_s3 + $0x338] sm:$0xff] }
 0x297   : > { %8501 = vmatprep.mubr.f32.mxu0 %v10962_v36  ;;  %8554 = vmatpush3.msra.mxu1 %v6405_v11  ;;  %v11219_v36 = vld [vmem:[#allocation2 + $0x81] sm:$0xff] }
 0x298   : > { %8425 = vmatmul.mubr.f32.gmra.mxu1 %v11205_v21  ;;  %8555 = vmatprep.subr.mxu1 %v6404_v1 }
 0x299   : > { %8427 = vmatprep.mubr.f32.mxu1 %v11211_v45  ;;  %8556 = vmatpush3.msra.mxu1 %v6404_v1  ;;  %v4849_v1 = vld [vmem:[#allocation2 + $0x50] sm:$0xff] }
 0x29a   : > { %8502 = vmatmul.mubr.f32.gmra.mxu0 %v10970_v56  ;;  %8557 = vmatprep.subr.mxu1 %v6403_v0  ;;  %v6425_v56 = vld [vmem:[%s12110_s3 + $0x3f0] sm:$0xff] }
 0x29b   : > { %8504 = vmatprep.mubr.f32.mxu0 %v10979_v46  ;;  %8558 = vmatpush3.msra.mxu1 %v6403_v0  ;;  %v11233_v46 = vld [vmem:[#allocation2 + $0x99] sm:$0xff] }
 0x29c   : > { %8428 = vmatmul.mubr.f32.gmra.mxu1 %v11219_v36  ;;  %8559 = vmatprep.subr.mxu1 %v6402_v9  ;;  %v6439_v0 = vld [vmem:[%s12110_s3 + $0x460] sm:$0xff] }
 0x29d   : > { %8430 = vmatprep.mubr.f32.mxu1 %v11225_v60  ;;  %8560 = vmatpush3.msra.mxu1 %v6402_v9  ;;  %v4850_v9 = vld [vmem:[#allocation2 + $0x60] sm:$0xff] }
 0x29e   : > { %8505 = vmatmul.mubr.f32.gmra.mxu0 %v10986_v50  ;;  %8561 = vmatprep.subr.mxu1 %v6401_v4  ;;  %v6423_v50 = vld [vmem:[%s12110_s3 + $0x3e0] sm:$0xff] }
 0x29f   : > { %8507 = vmatprep.mubr.f32.mxu0 %v10993_v25  ;;  %8624 = vmatpush3.msra.mxu0 %v11157_v30  ;;  %v11248_v25 = vld [vmem:[#allocation2 + $0xb1] sm:$0xff] }
 0x2a0   : > { %8431 = vmatmul.mubr.f32.gmra.mxu1 %v11233_v46  ;;  %8625 = vmatprep.subr.mxu0 %v6425_v56  ;;  %v6397_v30 = vld [vmem:[%s12110_s3 + $0x310] sm:$0xff] }
 0x2a1   : > { %8433 = vmatprep.mubr.f32.mxu1 %v11240_v19  ;;  %8626 = vmatpush3.msra.mxu0 %v6425_v56  ;;  %v6438_v56 = vld [vmem:[%s12110_s3 + $0x458] sm:$0xff] }
 0x2a2   : > { %8508 = vmatmul.mubr.f32.gmra.mxu0 %v11000_v39  ;;  %8627 = vmatprep.subr.mxu0 %v6424_v32  ;;  %v6422_v39 = vld [vmem:[%s12110_s3 + $0x3d8] sm:$0xff] }
 0x2a3   : > { %8510 = vmatprep.mubr.f32.mxu0 %v11007_v20  ;;  %8562 = vmatpush3.msra.mxu1 %v6401_v4  ;;  %v11262_v20 = vld [vmem:[#allocation2 + $0xc9] sm:$0xff] }
 0x2a4   : > { %8434 = vmatmul.mubr.f32.gmra.mxu1 %v11248_v25  ;;  %8628 = vmatpush3.msra.mxu0 %v6424_v32 }
 0x2a5   : > { %8436 = vmatprep.mubr.f32.mxu1 %v11254_v16  ;;  %8629 = vmatprep.subr.mxu0 %v6423_v50 }
 0x2a6   : > { %8511 = vmatmul.mubr.f32.gmra.mxu0 %v11014_v26  ;;  %8563 = vmatprep.subr.mxu1 %v6400_v8  ;;  %v6421_v26 = vld [vmem:[%s12110_s3 + $0x3d0] sm:$0xff] }
 0x2a7   : > { %8513 = vmatprep.mubr.f32.mxu0 %v11021_v13  ;;  %8630 = vmatpush3.msra.mxu0 %v6423_v50  ;;  %v11276_v13 = vld [vmem:[#allocation2 + $0xe1] sm:$0xff]  ;;  %v6437_v50 = vld [vmem:[%s12110_s3 + $0x450] sm:$0xff] }
 0x2a8   : > { %8437 = vmatmul.mubr.f32.gmra.mxu1 %v11262_v20  ;;  %8631 = vmatprep.subr.mxu0 %v6422_v39 }
 0x2a9   : > { %8439 = vmatprep.mubr.f32.mxu1 %v11268_v24  ;;  %8564 = vmatpush3.msra.mxu1 %v6400_v8  ;;  %v11401_v8 = vpop.f32.mrf.mxu0 }
 0x2aa   : > { %8514 = vmatmul.mubr.f32.gmra.mxu0 %v11028_v15  ;;  %8565 = vmatprep.subr.mxu1 %v6399_v23  ;;  %v6419_v15 = vld [vmem:[%s12110_s3 + $0x3c0] sm:$0xff] }
 0x2ab   : > { %8516 = vmatprep.mubr.f32.mxu0 %v11035_v55  ;;  %8632 = vmatpush3.msra.mxu0 %v6422_v39  ;;  %v11290_v55 = vld [vmem:[#allocation2 + $0xf9] sm:$0xff] }
 0x2ac   : > { %8440 = vmatmul.mubr.f32.gmra.mxu1 %v11276_v13  ;;  %8633 = vmatprep.subr.mxu0 %v6421_v26  ;;  %v4852_v39 = vld [vmem:[#allocation2 + $0x78] sm:$0xff] }
 0x2ad   : > { %8442 = vmatprep.mubr.f32.mxu1 %v11282_v44  ;;  %8634 = vmatpush3.msra.mxu0 %v6421_v26 }
 0x2ae   : > { %8517 = vmatmul.mubr.f32.gmra.mxu0 %v11042_v31  ;;  %8635 = vmatprep.subr.mxu0 %v6420_v41  ;;  %v6418_v31 = vld [vmem:[%s12110_s3 + $0x3b8] sm:$0xff] }
 0x2af   : > { %8519 = vmatprep.mubr.f32.mxu0 %v11049_v43  ;;  %8566 = vmatpush3.msra.mxu1 %v6399_v23  ;;  %v11304_v43 = vld [vmem:[#allocation2 + $0x111] sm:$0xff] }
 0x2b0   : > { %8443 = vmatmul.mubr.f32.gmra.mxu1 %v11290_v55  ;;  %8636 = vmatpush3.msra.mxu0 %v6420_v41 }
 0x2b1   : > { %8445 = vmatprep.mubr.f32.mxu1 %v11296_v40  ;;  %8637 = vmatprep.subr.mxu0 %v6419_v15 }
 0x2b2   : > { %8520 = vmatmul.mubr.f32.gmra.mxu0 %v11056_v27  ;;  %8567 = vmatprep.subr.mxu1 %v6398_v54  ;;  %v6417_v27 = vld [vmem:[%s12110_s3 + $0x3b0] sm:$0xff] }
 0x2b3   : > { %8522 = vmatprep.mubr.f32.mxu0 %v11063_v7  ;;  %8638 = vmatpush3.msra.mxu0 %v6419_v15  ;;  %v11318_v7 = vld [vmem:[#allocation2 + $0x129] sm:$0xff]  ;;  %v4853_v15 = vld [vmem:[#allocation2 + $0x80] sm:$0xff] }
 0x2b4   : > { %8446 = vmatmul.mubr.f32.gmra.mxu1 %v11304_v43  ;;  %8639 = vmatprep.subr.mxu0 %v6418_v31 }
 0x2b5   : > { %8448 = vmatprep.mubr.f32.mxu1 %v11310_v61  ;;  %8568 = vmatpush3.msra.mxu1 %v6398_v54  ;;  %v6435_v54 = vld [vmem:[%s12110_s3 + $0x440] sm:$0xff] }
 0x2b6   : > { %8523 = vmatmul.mubr.f32.gmra.mxu0 %v11070_v47  ;;  %8569 = vmatprep.subr.mxu1 %v6397_v30  ;;  %v6415_v47 = vld [vmem:[%s12110_s3 + $0x3a0] sm:$0xff] }
 0x2b7   : > { %8525 = vmatprep.mubr.f32.mxu0 %v11077_v53  ;;  %8640 = vmatpush3.msra.mxu0 %v6418_v31  ;;  %v11332_v53 = vld [vmem:[#allocation2 + $0x141] sm:$0xff] }
 0x2b8   : > { %8449 = vmatmul.mubr.f32.gmra.mxu1 %v11318_v7  ;;  %8641 = vmatprep.subr.mxu0 %v6417_v27 }
 0x2b9   : > { %8451 = vmatprep.mubr.f32.mxu1 %v11324_v18  ;;  %8642 = vmatpush3.msra.mxu0 %v6417_v27 }
 0x2ba   : > { %8526 = vmatmul.mubr.f32.gmra.mxu0 %v11084_v33  ;;  %8643 = vmatprep.subr.mxu0 %v6416_v59  ;;  %v6414_v33 = vld [vmem:[%s12110_s3 + $0x398] sm:$0xff] }
 0x2bb   : > { %8528 = vmatprep.mubr.f32.mxu0 %v11091_v6  ;;  %8570 = vmatpush3.msra.mxu1 %v6397_v30  ;;  %v11344_v6 = vld [vmem:[#allocation2 + $0x159] sm:$0xff]  ;;  %v4854_v30 = vld [vmem:[#allocation2 + $0x90] sm:$0xff] }
 0x2bc   : > { %8452 = vmatmul.mubr.f32.gmra.mxu1 %v11332_v53  ;;  %8644 = vmatpush3.msra.mxu0 %v6416_v59 }
 0x2bd   : > { %8454 = vmatprep.mubr.f32.mxu1 %v10892_v38  ;;  %8645 = vmatprep.subr.mxu0 %v6415_v47  ;;  %v6413_v38 = vld [vmem:[%s12110_s3 + $0x390] sm:$0xff] }
 0x2be   : > { %8529 = vmatmul.mubr.f32.gmra.mxu0 %v11098_v12  ;;  %8571 = vmatprep.subr.mxu1 %v6396_v3  ;;  %v11356_v12 = vld [vmem:[#allocation2 + $0x171] sm:$0xff] }
 0x2bf   : > { %8531 = vmatprep.mubr.f32.mxu0 %v11105_v10  ;;  %8646 = vmatpush3.msra.mxu0 %v6415_v47  ;;  %v6412_v10 = vld [vmem:[%s12110_s3 + $0x388] sm:$0xff] }
 0x2c0   : > { %8455 = vmatmul.mubr.f32.gmra.mxu1 %v11344_v6  ;;  %8647 = vmatprep.subr.mxu0 %v6414_v33 }
 0x2c1   : > { %8457 = vmatprep.mubr.f32.mxu1 %v10904_v34  ;;  %8572 = vmatpush3.msra.mxu1 %v6396_v3  ;;  %v6411_v34 = vld [vmem:[%s12110_s3 + $0x380] sm:$0xff] }
 0x2c2   : > { %8532 = vmatmul.mubr.f32.gmra.mxu0 %v11112_v37  ;;  %8573 = vmatprep.subr.mxu1 %v6395_v62  ;;  %v6442_v37 = vld [vmem:[%s12110_s3 + $0x478] sm:$0xff] }
 0x2c3   : > { %8534 = vmatprep.mubr.f32.mxu0 %v11119_v42  ;;  %8648 = vmatpush3.msra.mxu0 %v6414_v33  ;;  %v4847_v42 = vld [vmem:[#allocation2 + $0x38] sm:$0xff] }
 0x2c4   : > { %8458 = vmatmul.mubr.f32.gmra.mxu1 %v11356_v12  ;;  %8649 = vmatprep.subr.mxu0 %v6413_v38  ;;  %v4855_v33 = vld [vmem:[#allocation2 + $0x98] sm:$0xff] }
 0x2c5   : > { %8460 = vmatprep.mubr.f32.mxu1 %v2985_v17  ;;  %8650 = vmatpush3.msra.mxu0 %v6413_v38  ;;  %v11375_v17 = vld [vmem:[#allocation2 + $0x182] sm:$0xff] }
 0x2c6   : > { %8535 = vmatmul.mubr.f32.gmra.mxu0 %v11126_v22  ;;  %8651 = vmatprep.subr.mxu0 %v6412_v10  ;;  %v6441_v22 = vld [vmem:[%s12110_s3 + $0x470] sm:$0xff] }
 0x2c7   : > { %8537 = vmatprep.mubr.f32.mxu0 %v11133_v48  ;;  %8574 = vmatpush3.msra.mxu1 %v6395_v62  ;;  %v11383_v48 = vld [vmem:[#allocation2 + $0x18a] sm:$0xff] }
 0x2c8   : > { %8461 = vmatmul.mubr.f32.gmra.mxu1 %v2986_v2  ;;  %8652 = vmatpush3.msra.mxu0 %v6412_v10  ;;  %v4848_v2 = vld [vmem:[#allocation2 + $0x48] sm:$0xff]  ;;  %v6433_v62 = vld [vmem:[%s12110_s3 + $0x430] sm:$0xff] }
 0x2c9   : > { %8575 = vmatprep.mubr.f32.mxu1 %v4846_v58  ;;  %8653 = vmatprep.subr.mxu0 %v6411_v34  ;;  %v4856_v10 = vld [vmem:[#allocation2 + $0xa8] sm:$0xff] }
 0x2ca   : > { %8538 = vmatmul.mubr.f32.gmra.mxu0 %v11140_v51  ;;  %8703 = vmatprep.subr.mxu1 %v6442_v37  ;;  %v6440_v51 = vld [vmem:[%s12110_s3 + $0x468] sm:$0xff] }
 0x2cb   : > { %8540 = vmatprep.mubr.f32.mxu0 %v11375_v17  ;;  %8654 = vmatpush3.msra.mxu0 %v6411_v34 }
 0x2cc   : > { %8576 = vmatmul.mubr.f32.vlgmr.msra.gmra.mxu1 %v4847_v42 }
 0x2cd   : > { %8578 = vmatprep.mubr.f32.mxu1 %v4848_v2  ;;  %8704 = vmatpush3.msra.mxu1 %v6442_v37  ;;  %v6431_v2 = vld [vmem:[%s12110_s3 + $0x420] sm:$0xff] }
 0x2ce   : > { %8541 = vmatmul.mubr.f32.gmra.mxu0 %v11383_v48  ;;  %v8100_v11 = vpop.f32.mrf.mxu1  ;;  %8705 = vmatprep.subr.mxu1 %v6441_v22 }
 0x2cf   : > { %8655 = vmatprep.mubr.f32.mxu0 %v11166_v57  ;;  %8706 = vmatpush3.msra.mxu1 %v6441_v22  ;;  %v4851_v57 = vld [vmem:[#allocation2 + $0x68] sm:$0xff]  ;;  %v4857_v22 = vld [vmem:[#allocation2 + $0xb0] sm:$0xff] }
 0x2d0   : > { %8579 = vmatmul.mubr.f32.gmra.mxu1 %v4849_v1  ;;  %v3247_v4 = vpop.f32.mrf.mxu1  ;;  %8707 = vmatprep.subr.mxu1 %v6440_v51 }
 0x2d1   : > { %8581 = vmatprep.mubr.f32.mxu1 %v4850_v9  ;;  %8708 = vmatpush3.msra.mxu1 %v6440_v51 }
 0x2d2   : > { %8656 = vmatmul.mubr.f32.vlgmr.msra.gmra.mxu0 %v11177_v5  ;;  %v8103_v32 = vpop.f32.mrf.mxu1  ;;  %8709 = vmatprep.subr.mxu1 %v6439_v0  ;;  %v6436_v5 = vld [vmem:[%s12110_s3 + $0x448] sm:$0xff] }
 0x2d3   : > { %8658 = vmatprep.mubr.f32.mxu0 %v11183_v63  ;;  %8710 = vmatpush3.msra.mxu1 %v6439_v0 }
 0x2d4   : > { %8582 = vmatmul.mubr.f32.gmra.mxu1 %v4851_v57  ;;  %v3257_v23 = vpop.f32.mrf.mxu1  ;;  %8711 = vmatprep.subr.mxu1 %v6438_v56 }
 0x2d5   : > { %8584 = vmatprep.mubr.f32.mxu1 %v4852_v39  ;;  %8712 = vmatpush3.msra.mxu1 %v6438_v56  ;;  %v4859_v56 = vld [vmem:[#allocation2 + $0xc8] sm:$0xff] }
 0x2d6   : > { %v8180_v26 = vpop.f32.mrf.mxu0  ;;  %8659 = vmatmul.mubr.f32.gmra.mxu0 %v11191_v52  ;;  %v8106_v63 = vpop.f32.mrf.mxu1  ;;  %8713 = vmatprep.subr.mxu1 %v6437_v50  ;;  %v6434_v52 = vld [vmem:[%s12110_s3 + $0x438] sm:$0xff] }
 0x2d7   : > { %v11407_v41 = vadd.f32 %v8180_v26, %v8100_v11  ;;  %8661 = vmatprep.mubr.f32.mxu0 %v11197_v35  ;;  %8714 = vmatpush3.msra.mxu1 %v6437_v50  ;;  %v4858_v11 = vld [vmem:[#allocation2 + $0xc0] sm:$0xff]  ;;  %v4860_v50 = vld [vmem:[#allocation2 + $0xd8] sm:$0xff] }
 0x2d8   : > { %v3472_v31 = vpop.f32.mrf.mxu0  ;;  %8585 = vmatmul.mubr.f32.gmra.mxu1 %v4853_v15  ;;  %v3267_v27 = vpop.f32.mrf.mxu1  ;;  %8715 = vmatprep.subr.mxu1 %v6436_v5  ;;  %v6427_v15 = vld [vmem:[%s12110_s3 + $0x400] sm:$0xff] }
 0x2d9   : > { %v11413_v59 = vadd.f32 %v3472_v31, %v3247_v4  ;;  %8587 = vmatprep.mubr.f32.mxu1 %v4854_v30  ;;  %8716 = vmatpush3.msra.mxu1 %v6436_v5  ;;  %v4862_v31 = vld [vmem:[#allocation2 + $0xf0] sm:$0xff] }
 0x2da   : > { %v8183_v35 = vpop.f32.mrf.mxu0  ;;  %8662 = vmatmul.mubr.f32.gmra.mxu0 %v11205_v21  ;;  %v8109_v47 = vpop.f32.mrf.mxu1  ;;  %8717 = vmatprep.subr.mxu1 %v6435_v54  ;;  %v6432_v21 = vld [vmem:[%s12110_s3 + $0x428] sm:$0xff] }
 0x2db   : > { %v11419_v3 = vadd.f32 %v8183_v35, %v8103_v32  ;;  %8664 = vmatprep.mubr.f32.mxu0 %v11211_v45  ;;  %8718 = vmatpush3.msra.mxu1 %v6435_v54  ;;  %v6429_v32 = vld [vmem:[%s12110_s3 + $0x410] sm:$0xff]  ;;  %v4863_v35 = vld [vmem:[#allocation2 + $0xf8] sm:$0xff] }
 0x2dc   : > { %v3482_v38 = vpop.f32.mrf.mxu0  ;;  %8588 = vmatmul.mubr.f32.gmra.mxu1 %v4855_v33  ;;  %v3277_v34 = vpop.f32.mrf.mxu1  ;;  %8719 = vmatprep.subr.mxu1 %v6434_v52  ;;  %v4864_v33 = vld [vmem:[#allocation2 + $0x108] sm:$0xff] }
 0x2dd   : > { %v11425_v37 = vadd.f32 %v3482_v38, %v3257_v23  ;;  %8590 = vmatprep.mubr.f32.mxu1 %v4856_v10  ;;  %8720 = vmatpush3.msra.mxu1 %v6434_v52 }
 0x2de   : > { %v8186_v45 = vpop.f32.mrf.mxu0  ;;  %8665 = vmatmul.mubr.f32.gmra.mxu0 %v11219_v36  ;;  %v8112_v58 = vpop.f32.mrf.mxu1  ;;  %8721 = vmatprep.subr.mxu1 %v6433_v62  ;;  %v6430_v36 = vld [vmem:[%s12110_s3 + $0x418] sm:$0xff] }
 0x2df   : > { %v11431_v42 = vadd.f32 %v8186_v45, %v8106_v63  ;;  %8667 = vmatprep.mubr.f32.mxu0 %v11225_v60  ;;  %8722 = vmatpush3.msra.mxu1 %v6433_v62  ;;  %v4861_v63 = vld [vmem:[#allocation2 + $0xe0] sm:$0xff] }
 0x2e0   : > { %v3492_v51 = vpop.f32.mrf.mxu0  ;;  %8591 = vmatmul.mubr.f32.gmra.mxu1 %v4857_v22  ;;  %v3287_v1 = vpop.f32.mrf.mxu1  ;;  %8723 = vmatprep.subr.mxu1 %v6432_v21 }
 0x2e1   : > { %v11437_v0 = vadd.f32 %v3492_v51, %v3267_v27  ;;  %8593 = vmatprep.mubr.f32.mxu1 %v4858_v11  ;;  %8724 = vmatpush3.msra.mxu1 %v6432_v21  ;;  %v4865_v21 = vld [vmem:[#allocation2 + $0x110] sm:$0xff] }
 0x2e2   : > { %v8189_v60 = vpop.f32.mrf.mxu0  ;;  %8668 = vmatmul.mubr.f32.gmra.mxu0 %v11233_v46  ;;  %v8115_v9 = vpop.f32.mrf.mxu1  ;;  %8725 = vmatprep.subr.mxu1 %v6431_v2  ;;  %v6428_v46 = vld [vmem:[%s12110_s3 + $0x408] sm:$0xff] }
 0x2e3   : > { %v11443_v4 = vadd.f32 %v8189_v60, %v8109_v47  ;;  %8670 = vmatprep.mubr.f32.mxu0 %v11240_v19  ;;  %8726 = vmatpush3.msra.mxu1 %v6431_v2 }
 0x2e4   : > { %v3502_v57 = vpop.f32.mrf.mxu0  ;;  %8594 = vmatmul.mubr.f32.gmra.mxu1 %v4859_v56  ;;  %v3297_v39 = vpop.f32.mrf.mxu1  ;;  %8727 = vmatprep.subr.mxu1 %v6430_v36 }
 0x2e5   : > { %v11449_v23 = vadd.f32 %v3502_v57, %v3277_v34  ;;  %8596 = vmatprep.mubr.f32.mxu1 %v4860_v50  ;;  %8728 = vmatpush3.msra.mxu1 %v6430_v36 }
 0x2e6   : > { %v8192_v19 = vpop.f32.mrf.mxu0  ;;  %8671 = vmatmul.mubr.f32.gmra.mxu0 %v11248_v25  ;;  %v8118_v5 = vpop.f32.mrf.mxu1  ;;  %8729 = vmatprep.subr.mxu1 %v6429_v32 }
 0x2e7   : > { %v11455_v26 = vadd.f32 %v8192_v19, %v8112_v58  ;;  %8673 = vmatprep.mubr.f32.mxu0 %v11254_v16  ;;  %8730 = vmatpush3.msra.mxu1 %v6429_v32 }
 0x2e8   : > { %v3512_v54 = vpop.f32.mrf.mxu0  ;;  %8597 = vmatmul.mubr.f32.gmra.mxu1 %v4861_v63  ;;  %v3307_v30 = vpop.f32.mrf.mxu1  ;;  %8731 = vmatprep.subr.mxu1 %v6428_v46 }
 0x2e9   : > { %v11461_v27 = vadd.f32 %v3512_v54, %v3287_v1  ;;  %8599 = vmatprep.mubr.f32.mxu1 %v4862_v31  ;;  %8732 = vmatpush3.msra.mxu1 %v6428_v46 }
 0x2ea   : > { %v8195_v25 = vpop.f32.mrf.mxu0  ;;  %8674 = vmatmul.mubr.f32.gmra.mxu0 %v11262_v20  ;;  %v8121_v52 = vpop.f32.mrf.mxu1  ;;  %8733 = vmatprep.subr.mxu1 %v6427_v15 }
 0x2eb   : > { %v11464_v16 = vadd.f32 %v8195_v25, %v8115_v9  ;;  %8676 = vmatprep.mubr.f32.mxu0 %v11268_v24  ;;  %8734 = vmatpush3.msra.mxu1 %v6427_v15  ;;  %v4866_v24 = vld [vmem:[#allocation2 + $0x120] sm:$0xff] }
 0x2ec   : > { %v3522_v47 = vpop.f32.mrf.mxu0  ;;  %8600 = vmatmul.mubr.f32.gmra.mxu1 %v4863_v35  ;;  %v3317_v62 = vpop.f32.mrf.mxu1 }
 0x2ed   : > { %v11467_v38 = vadd.f32 %v3522_v47, %v3297_v39  ;;  %8602 = vmatprep.mubr.f32.mxu1 %v4864_v33 }
 0x2ee   : > { %v8198_v10 = vpop.f32.mrf.mxu0  ;;  %8677 = vmatmul.mubr.f32.gmra.mxu0 %v11276_v13  ;;  %v8124_v34 = vpop.f32.mrf.mxu1  ;;  %v4867_v13 = vld [vmem:[#allocation2 + $0x128] sm:$0xff] }
 0x2ef   : > { %v11470_v20 = vadd.f32 %v8198_v10, %v8118_v5  ;;  %8679 = vmatprep.mubr.f32.mxu0 %v11282_v44  ;;  %v4868_v44 = vld [vmem:[#allocation2 + $0x138] sm:$0xff] }
 0x2f0   : > { %v3532_v45 = vpop.f32.mrf.mxu0  ;;  %8603 = vmatmul.mubr.f32.gmra.mxu1 %v4865_v21  ;;  %v3327_v58 = vpop.f32.mrf.mxu1 }
 0x2f1   : > { %v11473_v22 = vadd.f32 %v3532_v45, %v3307_v30  ;;  %8605 = vmatprep.mubr.f32.mxu1 %v4866_v24  ;;  %v5176_v30 = vld [vmem:[#allocation2 + $0x151] sm:$0xff]  ;;  %v8793_v24 = vld [vmem:[#allocation2] sm:$0xff] }
 0x2f2   : > { %v8201_v2 = vpop.f32.mrf.mxu0  ;;  %8680 = vmatmul.mubr.f32.gmra.mxu0 %v11290_v55  ;;  %v8127_v51 = vpop.f32.mrf.mxu1  ;;  %v4869_v55 = vld [vmem:[#allocation2 + $0x140] sm:$0xff] }
 0x2f3   : > { %v11476_v11 = vadd.f32 %v8201_v2, %v8121_v52  ;;  %8682 = vmatprep.mubr.f32.mxu0 %v11296_v40  ;;  %v4870_v40 = vld [vmem:[#allocation2 + $0x150] sm:$0xff] }
 0x2f4   : > { %v3542_v1 = vpop.f32.mrf.mxu0  ;;  %8606 = vmatmul.mubr.f32.gmra.mxu1 %v4867_v13  ;;  %v3337_v36 = vpop.f32.mrf.mxu1  ;;  %v5182_v13 = vld [vmem:[#allocation2 + $0x199] sm:$0xff] }
 0x2f5   : > { %v11479_v60 = vadd.f32 %v3542_v1, %v3317_v62  ;;  %8608 = vmatprep.mubr.f32.mxu1 %v4868_v44  ;;  %v5178_v62 = vld [vmem:[#allocation2 + $0x169] sm:$0xff]  ;;  %v5458_v1 = vld [vmem:[#allocation2 + $0x32] sm:$0xff] }
 0x2f6   : > { %v8204_v9 = vpop.f32.mrf.mxu0  ;;  %8683 = vmatmul.mubr.f32.gmra.mxu0 %v11304_v43  ;;  %v8130_v56 = vpop.f32.mrf.mxu1  ;;  %v4871_v43 = vld [vmem:[#allocation2 + $0x158] sm:$0xff] }
 0x2f7   : > { %v11482_v32 = vadd.f32 %v8204_v9, %v8124_v34  ;;  %8685 = vmatprep.mubr.f32.mxu0 %v11310_v61  ;;  %v4872_v61 = vld [vmem:[#allocation2 + $0x168] sm:$0xff] }
 0x2f8   : > { %v3552_v57 = vpop.f32.mrf.mxu0  ;;  %8609 = vmatmul.mubr.f32.gmra.mxu1 %v4869_v55  ;;  %v3347_v50 = vpop.f32.mrf.mxu1 }
 0x2f9   : > { %v11485_v39 = vadd.f32 %v3552_v57, %v3327_v58  ;;  %8611 = vmatprep.mubr.f32.mxu1 %v4870_v40  ;;  %v5459_v40 = vld [vmem:[#allocation2 + $0x3a] sm:$0xff] }
 0x2fa   : > { %v8207_v46 = vpop.f32.mrf.mxu0  ;;  %8686 = vmatmul.mubr.f32.gmra.mxu0 %v11318_v7  ;;  %v8133_v19 = vpop.f32.mrf.mxu1  ;;  %v4873_v7 = vld [vmem:[#allocation2 + $0x170] sm:$0xff] }
 0x2fb   : > { %v11488_v5 = vadd.f32 %v8207_v46, %v8127_v51  ;;  %8688 = vmatprep.mubr.f32.mxu0 %v11324_v18  ;;  %v5460_v46 = vld [vmem:[#allocation2 + $0x4a] sm:$0xff] }
 0x2fc   : > { %v3562_v63 = vpop.f32.mrf.mxu0  ;;  %8612 = vmatmul.mubr.f32.gmra.mxu1 %v4871_v43  ;;  %v3357_v15 = vpop.f32.mrf.mxu1 }
 0x2fd   : > { %v11491_v54 = vadd.f32 %v3562_v63, %v3337_v36  ;;  %8614 = vmatprep.mubr.f32.mxu1 %v4872_v61 }
 0x2fe   : > { %v8210_v31 = vpop.f32.mrf.mxu0  ;;  %8689 = vmatmul.mubr.f32.gmra.mxu0 %v11332_v53  ;;  %v8136_v25 = vpop.f32.mrf.mxu1 }
 0x2ff   : > { %v11494_v52 = vadd.f32 %v8210_v31, %v8130_v56  ;;  %8691 = vmatprep.mubr.f32.mxu0 %v5176_v30  ;;  %v5461_v30 = vld [vmem:[#allocation2 + $0x52] sm:$0xff] }
 0x300   : > { %v3572_v35 = vpop.f32.mrf.mxu0  ;;  %8615 = vmatmul.mubr.f32.gmra.mxu1 %v4873_v7  ;;  %v3367_v18 = vpop.f32.mrf.mxu1  ;;  %v5462_v7 = vld [vmem:[#allocation2 + $0x62] sm:$0xff] }
 0x301   : > { %v11496_v47 = vadd.f32 %v3572_v35, %v3347_v50  ;;  %8617 = vmatprep.mubr.f32.mxu1 %v11160_v14  ;;  %v5180_v14 = vld [vmem:[#allocation2 + $0x181] sm:$0xff]  ;;  %v3463_v35 = vadd.f32 %v11401_v8, %v11381_v49 }
 0x302   : > { %v8213_v33 = vpop.f32.mrf.mxu0  ;;  %8692 = vmatmul.mubr.f32.gmra.mxu0 %v11344_v6  ;;  %v8139_v10 = vpop.f32.mrf.mxu1 }
 0x303   : > { %v11500_v34 = vadd.f32 %v8213_v33, %v8133_v19  ;;  %8694 = vmatprep.mubr.f32.mxu0 %v5178_v62 }
 0x304   : > { %v3582_v53 = vpop.f32.mrf.mxu0  ;;  %8618 = vmatmul.mubr.f32.gmra.mxu1 %v11169_v29  ;;  %v3377_v21 = vpop.f32.mrf.mxu1  ;;  %v5181_v29 = vld [vmem:[#allocation2 + $0x189] sm:$0xff] }
 0x305   : > { %v11503_v45 = vadd.f32 %v3582_v53, %v3357_v15  ;;  %8620 = vmatprep.mubr.f32.mxu1 %v8793_v24 }
 0x306   : > { %v8216_v58 = vpop.f32.mrf.mxu0  ;;  %8695 = vmatmul.mubr.f32.gmra.mxu0 %v11356_v12  ;;  %v8142_v2 = vpop.f32.mrf.mxu1  ;;  %v5183_v12 = vld [vmem:[#allocation2 + $0x1a1] sm:$0xff] }
 0x307   : > { %v11506_v51 = vadd.f32 %v8216_v58, %v8136_v25  ;;  %8697 = vmatprep.mubr.f32.mxu0 %v5180_v14  ;;  %v5464_v14 = vld [vmem:[#allocation2 + $0x7a] sm:$0xff] }
 0x308   : > { %v3592_v6 = vpop.f32.mrf.mxu0  ;;  %8621 = vmatmul.mubr.f32.gmra.mxu1 %v8793_v24  ;;  %v3387_v44 = vpop.f32.mrf.mxu1  ;;  %v5463_v24 = vld [vmem:[#allocation2 + $0x6a] sm:$0xff] }
 0x309   : > { %v11508_v36 = vadd.f32 %v3592_v6, %v3367_v18  ;;  %8735 = vmatprep.mubr.f32.mxu1 %v5458_v1 }
 0x30a   : > { %v8219_v9 = vpop.f32.mrf.mxu0  ;;  %8698 = vmatmul.mubr.f32.gmra.mxu0 %v5181_v29  ;;  %v8257_v56 = vpop.f32.mrf.mxu1 }
 0x30b   : > { %v11510_v55 = vadd.f32 %v8219_v9, %v8139_v10  ;;  %8700 = vmatprep.mubr.f32.mxu0 %v5182_v13  ;;  %v3896_v57 = vadd.f32 %v8257_v56, %v10975_v28 }
 0x30c   : > { %v3602_v50 = vpop.f32.mrf.mxu0  ;;  %8736 = vmatmul.mubr.f32.vlgmr.msra.gmra.mxu1 %v5459_v40  ;;  %v3736_v19 = vpop.f32.mrf.mxu1 }
 0x30d   : > { %v11513_v43 = vadd.f32 %v3602_v50, %v3377_v21  ;;  %8738 = vmatprep.mubr.f32.mxu1 %v5460_v46  ;;  %v3895_v21 = vadd.f32 %v3736_v19, %v3463_v35  ;;  %v5467_v46 = vld [vmem:[#allocation2 + $0x9a] sm:$0xff] }
 0x30e   : > { %v8222_v63 = vpop.f32.mrf.mxu0  ;;  %8701 = vmatmul.mubr.f32.gmra.mxu0 %v5183_v12  ;;  %v8260_v61 = vpop.f32.mrf.mxu1 }
 0x30f   : > { %v11515_v15 = vadd.f32 %v8222_v63, %v8142_v2  ;;  %v3898_v31 = vadd.f32 %v8260_v61, %v11407_v41 }
 0x310   : > { %v3612_v25 = vpop.f32.mrf.mxu0  ;;  %8739 = vmatmul.mubr.f32.gmra.mxu1 %v5461_v30  ;;  %v3746_v28 = vpop.f32.mrf.mxu1 }
 0x311   : > { %v11520_v18 = vadd.f32 %v3612_v25, %v3387_v44  ;;  %8741 = vmatprep.mubr.f32.mxu1 %v5462_v7  ;;  %v3897_v33 = vadd.f32 %v3746_v28, %v11413_v59  ;;  %v5465_v44 = vld [vmem:[#allocation2 + $0x82] sm:$0xff]  ;;  %v5469_v28 = vld [vmem:[#allocation2 + $0xb2] sm:$0xff] }
 0x312   : > { %v8337_v62 = vpop.f32.mrf.mxu0  ;;  %v8263_v10 = vpop.f32.mrf.mxu1 }
 0x313   : > { %v11523_v53 = vadd.f32 %v8337_v62, %v3896_v57  ;;  %v3900_v41 = vadd.f32 %v8263_v10, %v11419_v3  ;;  %v5466_v3 = vld [vmem:[#allocation2 + $0x92] sm:$0xff] }
 0x314   : > { %v4042_v58 = vpop.f32.mrf.mxu0  ;;  %8742 = vmatmul.mubr.f32.gmra.mxu1 %v5463_v24  ;;  %v3756_v2 = vpop.f32.mrf.mxu1 }
 0x315   : > { %v11526_v6 = vadd.f32 %v4042_v58, %v3895_v21  ;;  %8744 = vmatprep.mubr.f32.mxu1 %v5464_v14  ;;  %v3899_v49 = vadd.f32 %v3756_v2, %v11425_v37  ;;  %v5471_v58 = vld [vmem:[#allocation2 + $0xca] sm:$0xff] }
 0x316   : > { %v8340_v8 = vpop.f32.mrf.mxu0  ;;  %v8266_v13 = vpop.f32.mrf.mxu1 }
 0x317   : > { %v11529_v59 = vadd.f32 %v8340_v8, %v3898_v31  ;;  %v3902_v1 = vadd.f32 %v8266_v13, %v11431_v42  ;;  %v5468_v42 = vld [vmem:[#allocation2 + $0xaa] sm:$0xff] }
 0x318   : > { %v4052_v29 = vpop.f32.mrf.mxu0  ;;  %8745 = vmatmul.mubr.f32.gmra.mxu1 %v5465_v44  ;;  %v3766_v9 = vpop.f32.mrf.mxu1 }
 0x319   : > { %v11532_v56 = vadd.f32 %v4052_v29, %v3897_v33  ;;  %8747 = vmatprep.mubr.f32.mxu1 %v5466_v3  ;;  %v3901_v12 = vadd.f32 %v3766_v9, %v11437_v0  ;;  %v5473_v29 = vld [vmem:[#allocation2 + $0xe2] sm:$0xff] }
 0x31a   : > { %v8343_v57 = vpop.f32.mrf.mxu0  ;;  %v8269_v40 = vpop.f32.mrf.mxu1 }
 0x31b   : > { %v11535_v50 = vadd.f32 %v8343_v57, %v3900_v41  ;;  %v3904_v37 = vadd.f32 %v8269_v40, %v11443_v4  ;;  %v5470_v4 = vld [vmem:[#allocation2 + $0xc2] sm:$0xff] }
 0x31c   : > { %v4062_v19 = vpop.f32.mrf.mxu0  ;;  %8748 = vmatmul.mubr.f32.gmra.mxu1 %v5467_v46  ;;  %v3776_v63 = vpop.f32.mrf.mxu1 }
 0x31d   : > { %v11538_v61 = vadd.f32 %v4062_v19, %v3899_v49  ;;  %8750 = vmatprep.mubr.f32.mxu1 %v5468_v42  ;;  %v3903_v31 = vadd.f32 %v3776_v63, %v11449_v23  ;;  %v5475_v19 = vld [vmem:[#allocation2 + $0xfa] sm:$0xff] }
 0x31e   : > { %v8346_v30 = vpop.f32.mrf.mxu0  ;;  %v8272_v25 = vpop.f32.mrf.mxu1 }
 0x31f   : > { %v11541_v7 = vadd.f32 %v8346_v30, %v3902_v1  ;;  %v3906_v0 = vadd.f32 %v8272_v25, %v11455_v26  ;;  %v5472_v26 = vld [vmem:[#allocation2 + $0xda] sm:$0xff] }
 0x320   : > { %v4072_v35 = vpop.f32.mrf.mxu0  ;;  %8751 = vmatmul.mubr.f32.gmra.mxu1 %v5469_v28  ;;  %v3786_v33 = vpop.f32.mrf.mxu1 }
 0x321   : > { %v11544_v62 = vadd.f32 %v4072_v35, %v3901_v12  ;;  %8753 = vmatprep.mubr.f32.mxu1 %v5470_v4  ;;  %v3905_v10 = vadd.f32 %v3786_v33, %v11461_v27  ;;  %v5477_v35 = vld [vmem:[#allocation2 + $0x112] sm:$0xff] }
 0x322   : > { %v8349_v21 = vpop.f32.mrf.mxu0  ;;  %v8275_v41 = vpop.f32.mrf.mxu1 }
 0x323   : > { %v11547_v24 = vadd.f32 %v8349_v21, %v3904_v37  ;;  %v3908_v23 = vadd.f32 %v8275_v41, %v11464_v16  ;;  %v5474_v16 = vld [vmem:[#allocation2 + $0xf2] sm:$0xff] }
 0x324   : > { %v4082_v14 = vpop.f32.mrf.mxu0  ;;  %8754 = vmatmul.mubr.f32.gmra.mxu1 %v5471_v58  ;;  %v3796_v2 = vpop.f32.mrf.mxu1 }
 0x325   : > { %v11550_v49 = vadd.f32 %v4082_v14, %v3903_v31  ;;  %8756 = vmatprep.mubr.f32.mxu1 %v5472_v26  ;;  %v3907_v8 = vadd.f32 %v3796_v2, %v11467_v38  ;;  %v5479_v14 = vld [vmem:[#allocation2 + $0x12a] sm:$0xff] }
 0x326   : > { %v8352_v13 = vpop.f32.mrf.mxu0  ;;  %v8278_v1 = vpop.f32.mrf.mxu1 }
 0x327   : > { %v11553_v44 = vadd.f32 %v8352_v13, %v3906_v0  ;;  %v3910_v27 = vadd.f32 %v8278_v1, %v11470_v20  ;;  %v5476_v20 = vld [vmem:[#allocation2 + $0x10a] sm:$0xff] }
 0x328   : > { %v4092_v3 = vpop.f32.mrf.mxu0  ;;  %8757 = vmatmul.mubr.f32.gmra.mxu1 %v5473_v29  ;;  %v3806_v9 = vpop.f32.mrf.mxu1 }
 0x329   : > { %v11556_v12 = vadd.f32 %v4092_v3, %v3905_v10  ;;  %8759 = vmatprep.mubr.f32.mxu1 %v5474_v16  ;;  %v3909_v57 = vadd.f32 %v3806_v9, %v11473_v22  ;;  %v5481_v3 = vld [vmem:[#allocation2 + $0x142] sm:$0xff] }
 0x32a   : > { %v8355_v40 = vpop.f32.mrf.mxu0  ;;  %v8281_v37 = vpop.f32.mrf.mxu1 }
 0x32b   : > { %v11559_v46 = vadd.f32 %v8355_v40, %v3908_v23  ;;  %v3912_v38 = vadd.f32 %v8281_v37, %v11476_v11  ;;  %v5478_v11 = vld [vmem:[#allocation2 + $0x122] sm:$0xff] }
 0x32c   : > { %v4102_v42 = vpop.f32.mrf.mxu0  ;;  %8760 = vmatmul.mubr.f32.gmra.mxu1 %v5475_v19  ;;  %v3816_v63 = vpop.f32.mrf.mxu1 }
 0x32d   : > { %v11562_v31 = vadd.f32 %v4102_v42, %v3907_v8  ;;  %8762 = vmatprep.mubr.f32.mxu1 %v5476_v20  ;;  %v3911_v30 = vadd.f32 %v3816_v63, %v11479_v60  ;;  %v5483_v42 = vld [vmem:[#allocation2 + $0x15a] sm:$0xff] }
 0x32e   : > { %v8358_v25 = vpop.f32.mrf.mxu0  ;;  %v8284_v0 = vpop.f32.mrf.mxu1 }
 0x32f   : > { %v11565_v28 = vadd.f32 %v8358_v25, %v3910_v27  ;;  %v3914_v22 = vadd.f32 %v8284_v0, %v11482_v32  ;;  %v5480_v32 = vld [vmem:[#allocation2 + $0x13a] sm:$0xff] }
 0x330   : > { %v4112_v4 = vpop.f32.mrf.mxu0  ;;  %8763 = vmatmul.mubr.f32.gmra.mxu1 %v5477_v35  ;;  %v3826_v33 = vpop.f32.mrf.mxu1 }
 0x331   : > { %v11568_v10 = vadd.f32 %v4112_v4, %v3909_v57  ;;  %8765 = vmatprep.mubr.f32.mxu1 %v5478_v11  ;;  %v3913_v21 = vadd.f32 %v3826_v33, %v11485_v39  ;;  %v5485_v4 = vld [vmem:[#allocation2 + $0x172] sm:$0xff] }
 0x332   : > { %v8361_v41 = vpop.f32.mrf.mxu0  ;;  %v8287_v23 = vpop.f32.mrf.mxu1 }
 0x333   : > { %v11571_v58 = vadd.f32 %v8361_v41, %v3912_v38  ;;  %v3916_v60 = vadd.f32 %v8287_v23, %v11488_v5  ;;  %v5482_v5 = vld [vmem:[#allocation2 + $0x152] sm:$0xff] }
 0x334   : > { %v4122_v26 = vpop.f32.mrf.mxu0  ;;  %8766 = vmatmul.mubr.f32.gmra.mxu1 %v5479_v14  ;;  %v3836_v2 = vpop.f32.mrf.mxu1 }
 0x335   : > { %v11574_v8 = vadd.f32 %v4122_v26, %v3911_v30  ;;  %8768 = vmatprep.mubr.f32.mxu1 %v5480_v32  ;;  %v3915_v13 = vadd.f32 %v3836_v2, %v11491_v54 }
 0x336   : > { %v8364_v1 = vpop.f32.mrf.mxu0  ;;  %v8290_v27 = vpop.f32.mrf.mxu1 }
 0x337   : > { %v11577_v29 = vadd.f32 %v8364_v1, %v3914_v22  ;;  %v3918_v39 = vadd.f32 %v8290_v27, %v11494_v52  ;;  %v5484_v52 = vld [vmem:[#allocation2 + $0x16a] sm:$0xff] }
 0x338   : > { %v4132_v16 = vpop.f32.mrf.mxu0  ;;  %8769 = vmatmul.mubr.f32.gmra.mxu1 %v5481_v3  ;;  %v3846_v9 = vpop.f32.mrf.mxu1 }
 0x339   : > { %v11580_v57 = vadd.f32 %v4132_v16, %v3913_v21  ;;  %8771 = vmatprep.mubr.f32.mxu1 %v5482_v5  ;;  %v3917_v40 = vadd.f32 %v3846_v9, %v11496_v47 }
 0x33a   : > { %v8367_v37 = vpop.f32.mrf.mxu0  ;;  %v8293_v38 = vpop.f32.mrf.mxu1 }
 0x33b   : > { %v11583_v19 = vadd.f32 %v8367_v37, %v3916_v60  ;;  %v3920_v54 = vadd.f32 %v8293_v38, %v11500_v34  ;;  %v5488_v60 = vld [vmem:[#allocation2 + $0x19a] sm:$0xff] }
 0x33c   : > { %v4142_v20 = vpop.f32.mrf.mxu0  ;;  %8772 = vmatmul.mubr.f32.gmra.mxu1 %v5483_v42  ;;  %v3856_v63 = vpop.f32.mrf.mxu1 }
 0x33d   : > { %v11586_v30 = vadd.f32 %v4142_v20, %v3915_v13  ;;  %8774 = vmatprep.mubr.f32.mxu1 %v5484_v52  ;;  %v3919_v25 = vadd.f32 %v3856_v63, %v11503_v45  ;;  %v5489_v13 = vld [vmem:[#allocation2 + $0x1a2] sm:$0xff] }
 0x33e   : > { %v8370_v0 = vpop.f32.mrf.mxu0  ;;  %v8296_v22 = vpop.f32.mrf.mxu1 }
 0x33f   : > { %v11589_v35 = vadd.f32 %v8370_v0, %v3918_v39  ;;  %v3922_v47 = vadd.f32 %v8296_v22, %v11506_v51 }
 0x340   : > { %v4152_v11 = vpop.f32.mrf.mxu0  ;;  %8775 = vmatmul.mubr.f32.gmra.mxu1 %v5485_v4  ;;  %v3866_v34 = vpop.f32.mrf.mxu1 }
 0x341   : > { %v11592_v33 = vadd.f32 %v4152_v11, %v3917_v40  ;;  %8777 = vmatprep.mubr.f32.mxu1 %v11375_v17  ;;  %v3921_v21 = vadd.f32 %v3866_v34, %v11508_v36 }
 0x342   : > { %v8373_v41 = vpop.f32.mrf.mxu0  ;;  %v8299_v23 = vpop.f32.mrf.mxu1 }
 0x343   : > { %v11596_v45 = vadd.f32 %v8373_v41, %v3920_v54  ;;  %v3924_v14 = vadd.f32 %v8299_v23, %v11510_v55 }
 0x344   : > { %v4162_v26 = vpop.f32.mrf.mxu0  ;;  %8778 = vmatmul.mubr.f32.gmra.mxu1 %v11383_v48  ;;  %v3876_v51 = vpop.f32.mrf.mxu1 }
 0x345   : > { %v11600_v32 = vadd.f32 %v4162_v26, %v3919_v25  ;;  %v3923_v2 = vadd.f32 %v3876_v51, %v11513_v43  ;;  %8780 = vmatprep.mubr.f32.mxu1 %v5488_v60 }
 0x346   : > { %v8376_v17 = vpop.f32.mrf.mxu0  ;;  %v8302_v1 = vpop.f32.mrf.mxu1 }
 0x347   : > { %v11603_v36 = vadd.f32 %v8376_v17, %v3922_v47  ;;  %v3926_v27 = vadd.f32 %v8302_v1, %v11515_v15 }
 0x348   : > { %v4172_v39 = vpop.f32.mrf.mxu0  ;;  %8781 = vmatmul.mubr.f32.gmra.mxu1 %v5489_v13  ;;  %v3886_v3 = vpop.f32.mrf.mxu1 }
 0x349   : > { %v11606_v55 = vadd.f32 %v4172_v39, %v3921_v21  ;;  %v3925_v48 = vadd.f32 %v3886_v3, %v11520_v18 }
 0x34a   : > { %v8379_v16 = vpop.f32.mrf.mxu0 }
 0x34b   : > { %v11609_v5 = vadd.f32 %v8379_v16, %v3924_v14 }
 0x34c   : > { %v4182_v9 = vpop.f32.mrf.mxu0  ;;  %v8417_v43 = vpop.f32.mrf.mxu1 }
 0x34d   : > { %v11611_v40 = vadd.f32 %v4182_v9, %v3923_v2  ;;  %v11614_v37 = vadd.f32 %v8417_v43, %v11523_v53 }
 0x34e   : > { %v8382_v38 = vpop.f32.mrf.mxu0  ;;  %v4348_v54 = vpop.f32.mrf.mxu1 }
 0x34f   : > { %v11616_v15 = vadd.f32 %v8382_v38, %v3926_v27  ;;  %v11619_v42 = vadd.f32 %v4348_v54, %v11526_v6 }
 0x350   : > { %v4192_v20 = vpop.f32.mrf.mxu0  ;;  %v8420_v52 = vpop.f32.mrf.mxu1 }
 0x351   : > { %v11621_v18 = vadd.f32 %v4192_v20, %v3925_v48  ;;  %v11624_v63 = vadd.f32 %v8420_v52, %v11529_v59 }
 0x352   : > { %v11626_v25 = vpop.f32.mrf.mxu0  ;;  %v4358_v0 = vpop.f32.mrf.mxu1 }
 0x353   : > { %v11629_v53 = vadd.f32 %v4358_v0, %v11532_v56 }
 0x354   : > { %v11631_v22 = vpop.f32.mrf.mxu0  ;;  %v8423_v47 = vpop.f32.mrf.mxu1 }
 0x355   : > { %v11634_v4 = vadd.f32 %v8423_v47, %v11535_v50 }
 0x356   : > { %v11636_v6 = vpop.f32.mrf.mxu0  ;;  %v4368_v11 = vpop.f32.mrf.mxu1 }
 0x357   : > { %v11639_v34 = vadd.f32 %v4368_v11, %v11538_v61 }
 0x358   : > { %v11641_v59 = vpop.f32.mrf.mxu0  ;;  %v8426_v21 = vpop.f32.mrf.mxu1 }
 0x359   : > { %v11644_v41 = vadd.f32 %v8426_v21, %v11541_v7 }
 0x35a   : > { %v11646_v56 = vpop.f32.mrf.mxu0  ;;  %v4378_v23 = vpop.f32.mrf.mxu1 }
 0x35b   : > { %v11649_v60 = vadd.f32 %v4378_v23, %v11544_v62 }
 0x35c   : > { %v11651_v50 = vpop.f32.mrf.mxu0  ;;  %v8429_v14 = vpop.f32.mrf.mxu1 }
 0x35d   : > { %v11654_v26 = vadd.f32 %v8429_v14, %v11547_v24 }
 0x35e   : > { %v11656_v61 = vpop.f32.mrf.mxu0  ;;  %v4388_v51 = vpop.f32.mrf.mxu1 }
 0x35f   : > { %v11659_v2 = vadd.f32 %v4388_v51, %v11550_v49 }
 0x360   : > { %v11661_v7 = vpop.f32.mrf.mxu0  ;;  %v8432_v13 = vpop.f32.mrf.mxu1 }
 0x361   : > { %v11664_v17 = vadd.f32 %v8432_v13, %v11553_v44 }
 0x362   : > { %v11666_v62 = vpop.f32.mrf.mxu0  ;;  %v4398_v1 = vpop.f32.mrf.mxu1 }
 0x363   : > { %v11669_v27 = vadd.f32 %v4398_v1, %v11556_v12 }
 0x364   : > { %v11671_v24 = vpop.f32.mrf.mxu0  ;;  %v8435_v39 = vpop.f32.mrf.mxu1 }
 0x365   : > { %v11674_v3 = vadd.f32 %v8435_v39, %v11559_v46 }
 0x366   : > { %v11676_v49 = vpop.f32.mrf.mxu0  ;;  %v4408_v48 = vpop.f32.mrf.mxu1 }
 0x367   : > { %v11679_v16 = vadd.f32 %v4408_v48, %v11562_v31 }
 0x368   : > { %v11681_v44 = vpop.f32.mrf.mxu0  ;;  %v8438_v9 = vpop.f32.mrf.mxu1 }
 0x369   : > { %v11684_v43 = vadd.f32 %v8438_v9, %v11565_v28 }
 0x36a   : > { %v11686_v12 = vpop.f32.mrf.mxu0  ;;  %v4418_v38 = vpop.f32.mrf.mxu1 }
 0x36b   : > { %12327 = vst [vmem:[#allocation29_spill] sm:$0xff] %v11684_v43  ;;  %v11689_v54 = vadd.f32 %v4418_v38, %v11568_v10 }
 0x36c   : > { %v11691_v46 = vpop.f32.mrf.mxu0  ;;  %v8441_v20 = vpop.f32.mrf.mxu1 }
 0x36d   : > { %12328 = vst [vmem:[#allocation32_spill] sm:$0xff] %v11689_v54  ;;  %v11694_v52 = vadd.f32 %v8441_v20, %v11571_v58 }
 0x36e   : > { %v11696_v31 = vpop.f32.mrf.mxu0  ;;  %v4428_v0 = vpop.f32.mrf.mxu1 }
 0x36f   : > { %12329 = vst [vmem:[#allocation75_spill] sm:$0xff] %v11694_v52  ;;  %12330 = vst [vmem:[#allocation78_spill] sm:$0xff] %v11696_v31  ;;  %v11699_v47 = vadd.f32 %v4428_v0, %v11574_v8 }
 0x370   : > { %v11701_v28 = vpop.f32.mrf.mxu0  ;;  %v8444_v11 = vpop.f32.mrf.mxu1 }
 0x371   : > { %12331 = vst [vmem:[#allocation3_spill] sm:$0xff] %v11699_v47  ;;  %12332 = vst [vmem:[#allocation4_spill] sm:$0xff] %v11701_v28  ;;  %v11704_v21 = vadd.f32 %v8444_v11, %v11577_v29 }
 0x372   : > { %v11706_v10 = vpop.f32.mrf.mxu0  ;;  %v4438_v23 = vpop.f32.mrf.mxu1 }
 0x373   : > { %12333 = vst [vmem:[#allocation9_spill] sm:$0xff] %v11704_v21  ;;  %12334 = vst [vmem:[#allocation10_spill] sm:$0xff] %v11706_v10  ;;  %v11709_v14 = vadd.f32 %v4438_v23, %v11580_v57 }
 0x374   : > { %v11711_v58 = vpop.f32.mrf.mxu0  ;;  %v8447_v51 = vpop.f32.mrf.mxu1 }
 0x375   : > { %12335 = vst [vmem:[#allocation30_spill] sm:$0xff] %v11709_v14  ;;  %12336 = vst [vmem:[#allocation31_spill] sm:$0xff] %v11711_v58  ;;  %v11714_v13 = vadd.f32 %v8447_v51, %v11583_v19 }
 0x376   : > { %v11716_v8 = vpop.f32.mrf.mxu0  ;;  %v4448_v1 = vpop.f32.mrf.mxu1 }
 0x377   : > { %12337 = vst [vmem:[#allocation76_spill] sm:$0xff] %v11714_v13  ;;  %12338 = vst [vmem:[#allocation81_spill] sm:$0xff] %v11716_v8  ;;  %v11719_v39 = vadd.f32 %v4448_v1, %v11586_v30 }
 0x378   : > { %v11721_v29 = vpop.f32.mrf.mxu0  ;;  %v8450_v48 = vpop.f32.mrf.mxu1 }
 0x379   : > { %12339 = vst [vmem:[#allocation5_spill] sm:$0xff] %v11719_v39  ;;  %12340 = vst [vmem:[#allocation6_spill] sm:$0xff] %v11721_v29  ;;  %v11724_v9 = vadd.f32 %v8450_v48, %v11589_v35 }
 0x37a   : > { %v11726_v57 = vpop.f32.mrf.mxu0  ;;  %v4458_v38 = vpop.f32.mrf.mxu1 }
 0x37b   : > { %12341 = vst [vmem:[#allocation33_spill] sm:$0xff] %v11724_v9  ;;  %12342 = vst [vmem:[#allocation36_spill] sm:$0xff] %v11726_v57  ;;  %v11729_v20 = vadd.f32 %v4458_v38, %v11592_v33 }
 0x37c   : > { %v11731_v19 = vpop.f32.mrf.mxu0  ;;  %v8453_v0 = vpop.f32.mrf.mxu1 }
 0x37d   : > { %12343 = vst [vmem:[#allocation84_spill] sm:$0xff] %v11729_v20  ;;  %12344 = vst [vmem:[#allocation77_spill] sm:$0xff] %v11731_v19  ;;  %v11734_v11 = vadd.f32 %v8453_v0, %v11596_v45 }
 0x37e   : > { %v11736_v30 = vpop.f32.mrf.mxu0  ;;  %v4468_v23 = vpop.f32.mrf.mxu1 }
 0x37f   : > { %12345 = vst [vmem:[#allocation7_spill] sm:$0xff] %v11734_v11  ;;  %12346 = vst [vmem:[#allocation8_spill] sm:$0xff] %v11736_v30  ;;  %v11739_v51 = vadd.f32 %v4468_v23, %v11600_v32 }
 0x380   : > { %v11741_v35 = vpop.f32.mrf.mxu0  ;;  %v8456_v1 = vpop.f32.mrf.mxu1 }
 0x381   : > { %12347 = vst [vmem:[#allocation11_spill] sm:$0xff] %v11739_v51  ;;  %12348 = vst [vmem:[#allocation12_spill] sm:$0xff] %v11741_v35  ;;  %v11744_v48 = vadd.f32 %v8456_v1, %v11603_v36 }
 0x382   : > { %v11746_v33 = vpop.f32.mrf.mxu0  ;;  %v4478_v38 = vpop.f32.mrf.mxu1 }
 0x383   : > { %12349 = vst [vmem:[#allocation34_spill] sm:$0xff] %v11744_v48  ;;  %12350 = vst [vmem:[#allocation35_spill] sm:$0xff] %v11746_v33  ;;  %v11749_v20 = vadd.f32 %v4478_v38, %v11606_v55 }
 0x384   : > { %v11751_v45 = vpop.f32.mrf.mxu0  ;;  %v8459_v0 = vpop.f32.mrf.mxu1 }
 0x385   : > { %12351 = vst [vmem:[#allocation79_spill] sm:$0xff] %v11749_v20  ;;  %12352 = vst [vmem:[#allocation37_spill] sm:$0xff] %v11751_v45  ;;  %v11754_v11 = vadd.f32 %v8459_v0, %v11609_v5 }
 0x386   : > { %v11756_v32 = vpop.f32.mrf.mxu0  ;;  %v4488_v23 = vpop.f32.mrf.mxu1 }
 0x387   : > { %12353 = vst [vmem:[#allocation40_spill] sm:$0xff] %v11754_v11  ;;  %12354 = vst [vmem:[#allocation80_spill] sm:$0xff] %v11756_v32  ;;  %v11759_v51 = vadd.f32 %v4488_v23, %v11611_v40 }
 0x388   : > { %v11761_v36 = vpop.f32.mrf.mxu0  ;;  %v8462_v1 = vpop.f32.mrf.mxu1 }
 0x389   : > { %12355 = vst [vmem:[#allocation89_spill] sm:$0xff] %v11759_v51  ;;  %12356 = vst [vmem:[#allocation13_spill] sm:$0xff] %v11761_v36  ;;  %v11764_v48 = vadd.f32 %v8462_v1, %v11616_v15 }
 0x38a   : > { %v11766_v55 = vpop.f32.mrf.mxu0  ;;  %v4498_v38 = vpop.f32.mrf.mxu1 }
 0x38b   : > { %12357 = vst [vmem:[#allocation14_spill] sm:$0xff] %v11764_v48  ;;  %12358 = vst [vmem:[#allocation15_spill] sm:$0xff] %v11766_v55  ;;  %v11769_v20 = vadd.f32 %v4498_v38, %v11621_v18 }
 0x38c   : > { %v11771_v5 = vpop.f32.mrf.mxu0  ;;  %v8577_v0 = vpop.f32.mrf.mxu1 }
 0x38d   : > { %12359 = vst [vmem:[#allocation38_spill] sm:$0xff] %v11769_v20  ;;  %12360 = vst [vmem:[#allocation39_spill] sm:$0xff] %v11771_v5 }
 0x38e   : > { %v11773_v11 = vpop.f32.mrf.mxu0  ;;  %v4961_v32 = vpop.f32.mrf.mxu1 }
 0x38f   : > { %12361 = vst [vmem:[#allocation82_spill] sm:$0xff] %v11773_v11 }
 0x390   : > { %v11775_v40 = vpop.f32.mrf.mxu0  ;;  %v8580_v23 = vpop.f32.mrf.mxu1 }
 0x391   : > { %12362 = vst [vmem:[#allocation92_spill] sm:$0xff] %v11775_v40 }
 0x392   : > { %v8657_v51 = vpop.f32.mrf.mxu0  ;;  %v4971_v36 = vpop.f32.mrf.mxu1 }
 0x394   : > { %v5267_v45 = vpop.f32.mrf.mxu0  ;;  %v11777_v15 = vpop.f32.mrf.mxu1 }
 0x396   : > { %v8660_v1 = vpop.f32.mrf.mxu0  ;;  %v11779_v48 = vpop.f32.mrf.mxu1 }
 0x398   : > { %v11781_v55 = vpop.f32.mrf.mxu0  ;;  %v11783_v18 = vpop.f32.mrf.mxu1 }
 0x39a   : > { %v11785_v38 = vpop.f32.mrf.mxu0  ;;  %v11787_v20 = vpop.f32.mrf.mxu1 }
 0x39c   : > { %v11789_v11 = vpop.f32.mrf.mxu1  ;;  %v11791_v40 = vpop.f32.mrf.mxu0 }
 0x39e   : > { %v11793_v5 = vpop.f32.mrf.mxu1  ;;  %v11797_v35 = vpop.f32.mrf.mxu0 }
 0x3a0   : > { %v11795_v33 = vpop.f32.mrf.mxu1  ;;  %v11803_v19 = vpop.f32.mrf.mxu0 }
 0x3a2   : > { %v11799_v30 = vpop.f32.mrf.mxu1  ;;  %v11809_v13 = vpop.f32.mrf.mxu0 }
 0x3a4   : > { %v11801_v9 = vpop.f32.mrf.mxu1  ;;  %v11815_v8 = vpop.f32.mrf.mxu0 }
 0x3a6   : > { %v11805_v39 = vpop.f32.mrf.mxu1  ;;  %v11821_v47 = vpop.f32.mrf.mxu0 }
 0x3a7   : > { %12363 = vst [vmem:[#allocation41_spill] sm:$0xff] %v11805_v39 }
 0x3a8   : > { %v11807_v57 = vpop.f32.mrf.mxu1  ;;  %v11827_v28 = vpop.f32.mrf.mxu0 }
 0x3a9   : > { %12364 = vst [vmem:[#allocation44_spill] sm:$0xff] %v11807_v57 }
 0x3aa   : > { %v11811_v29 = vpop.f32.mrf.mxu1 }
 0x3ab   : > { %12365 = vst [vmem:[#allocation96_spill] sm:$0xff] %v11811_v29  ;;  %v11833_v29 = vpop.f32.mrf.mxu0 }
 0x3ac   : > { %v11813_v14 = vpop.f32.mrf.mxu1 }
 0x3ad   : > { %12366 = vst [vmem:[#allocation83_spill] sm:$0xff] %v11813_v14 }
 0x3ae   : > { %v11817_v21 = vpop.f32.mrf.mxu1 }
 0x3af   : > { %12367 = vst [vmem:[#allocation16_spill] sm:$0xff] %v11817_v21  ;;  %v11839_v21 = vpop.f32.mrf.mxu0 }
 0x3b0   : > { %v11819_v58 = vpop.f32.mrf.mxu1  ;;  %12375 = vst [vmem:[#allocation18_spill] sm:$0xff] %v11839_v21 }
 0x3b1   : > { %12368 = vst [vmem:[#allocation17_spill] sm:$0xff] %v11819_v58 }
 0x3b2   : > { %v11823_v10 = vpop.f32.mrf.mxu1 }
 0x3b3   : > { %12369 = vst [vmem:[#allocation42_spill] sm:$0xff] %v11823_v10  ;;  %v11845_v10 = vpop.f32.mrf.mxu0 }
 0x3b4   : > { %v11825_v52 = vpop.f32.mrf.mxu1  ;;  %12378 = vst [vmem:[#allocation47_spill] sm:$0xff] %v11845_v10 }
 0x3b5   : > { %12370 = vst [vmem:[#allocation43_spill] sm:$0xff] %v11825_v52 }
 0x3b6   : > { %v11829_v57 = vpop.f32.mrf.mxu1 }
 0x3b7   : > { %12371 = vst [vmem:[#allocation85_spill] sm:$0xff] %v11829_v57  ;;  %v11851_v57 = vpop.f32.mrf.mxu0 }
 0x3b8   : > { %v11831_v54 = vpop.f32.mrf.mxu1  ;;  %12381 = vst [vmem:[#allocation52_spill] sm:$0xff] %v11851_v57 }
 0x3b9   : > { %12372 = vst [vmem:[#allocation45_spill] sm:$0xff] %v11831_v54  ;;  %v11861_v21 = vpop.f32.mrf.mxu0 }
 0x3ba   : > { %v11835_v14 = vpop.f32.mrf.mxu1 }
 0x3bb   : > { %12373 = vst [vmem:[#allocation48_spill] sm:$0xff] %v11835_v14  ;;  %v4814_v14 = vadd.f32 %v11626_v25, %v11614_v37  ;;  %v11870_v37 = vld [vmem:[%s12111_s4] ss:$0 sm:$0xff] }
 0x3bc   : > { %v11837_v39 = vpop.f32.mrf.mxu1 }
 0x3bd   : > { %12374 = vst [vmem:[#allocation86_spill] sm:$0xff] %v11837_v39 }
 0x3be   : > { %v11841_v58 = vpop.f32.mrf.mxu1 }
 0x3bf   : > { %12376 = vst [vmem:[#allocation19_spill] sm:$0xff] %v11841_v58  ;;  %v4813_v58 = vadd.f32 %v11631_v22, %v11619_v42  ;;  %v4815_v42 = vadd.f32 %v11641_v59, %v11629_v53  ;;  %v4817_v53 = vadd.f32 %v11651_v50, %v11639_v34  ;;  %v6446_v50 = vld [vmem:[%s8941_s12 + $0x39] sm:$0xff] }
 0x3c0   : > { %v11843_v31 = vpop.f32.mrf.mxu1 }
 0x3c1   : > { %12377 = vst [vmem:[#allocation46_spill] sm:$0xff] %v11843_v31  ;;  %v5121_v31 = vadd.f32 %v8577_v0, %v4814_v14  ;;  %v11874_v14 = vpop.f32.mrf.mxu0  ;;  %v5124_v34 = vadd.f32 %v11779_v48, %v4817_v53 }
 0x3c2   : > { %v11847_v52 = vpop.f32.mrf.mxu1 }
 0x3c3   : > { %12379 = vst [vmem:[#allocation87_spill] sm:$0xff] %v11847_v52  ;;  %v5427_v52 = vadd.f32 %v8657_v51, %v5121_v31  ;;  %v5122_v51 = vadd.f32 %v4971_v36, %v4815_v42  ;;  %v4820_v36 = vadd.f32 %v11656_v61, %v11644_v41  ;;  %v4819_v41 = vadd.f32 %v11661_v7, %v11649_v60 }
 0x3c4   : > { %v11849_v43 = vpop.f32.mrf.mxu1  ;;  %v5430_v61 = vadd.f32 %v11791_v40, %v5124_v34  ;;  %v6448_v40 = vld [vmem:[%s8941_s12 + $0x51] sm:$0xff] }
 0x3c5   : > { %12380 = vst [vmem:[#allocation49_spill] sm:$0xff] %v11849_v43  ;;  %v4816_v43 = vadd.f32 %v11636_v6, %v11624_v63  ;;  %v4818_v63 = vadd.f32 %v11646_v56, %v11634_v4  ;;  %v6444_v6 = vld [vmem:[%s8941_s12 + $0x21] sm:$0xff]  ;;  %v5127_v48 = vadd.f32 %v11783_v18, %v4820_v36  ;;  %v5126_v7 = vadd.f32 %v11787_v20, %v4819_v41 }
 0x3c6   : > { %v11853_v54 = vpop.f32.mrf.mxu1  ;;  %v4824_v36 = vadd.f32 %v11676_v49, %v11664_v17 }
 0x3c7   : > { %12382 = vst [vmem:[#allocation88_spill] sm:$0xff] %v11853_v54  ;;  %v5120_v54 = vadd.f32 %v4961_v32, %v4813_v58  ;;  %v5123_v22 = vadd.f32 %v8580_v23, %v4816_v43  ;;  %v5125_v59 = vadd.f32 %v11777_v15, %v4818_v63  ;;  %v6443_v43 = vld [vmem:[%s8941_s12 + $0x19] sm:$0xff]  ;;  %v5433_v60 = vadd.f32 %v11797_v35, %v5127_v48  ;;  %v6447_v35 = vld [vmem:[%s8941_s12 + $0x49] sm:$0xff] }
 0x3c8   : > { %v11857_v39 = vpop.f32.mrf.mxu1  ;;  %v5131_v49 = vadd.f32 %v11795_v33, %v4824_v36  ;;  %v4826_v48 = vadd.f32 %v11686_v12, %v11674_v3 }
 0x3c9   : > { %v5426_v25 = vadd.f32 %v5267_v45, %v5120_v54  ;;  %v5429_v58 = vadd.f32 %v8660_v1, %v5123_v22  ;;  %v5431_v23 = vadd.f32 %v11785_v38, %v5125_v59  ;;  %v6445_v38 = vld [vmem:[%s8941_s12 + $0x31] sm:$0xff] }
 0x3ca   : > { %v11863_v10 = vpop.f32.mrf.mxu1  ;;  %v5133_v12 = vadd.f32 %v11801_v9, %v4826_v48  ;;  %v6454_v9 = vld [vmem:[%s8941_s12 + $0x99] sm:$0xff] }
 0x3cb   : > { %12383 = vst [vmem:[#allocation20_spill] sm:$0xff] %v11863_v10 }
 0x3cc   : > { %v8737_v57 = vpop.f32.mrf.mxu1 }
 0x3cd   : > { %v5733_v0 = vadd.f32 %v8737_v57, %v5427_v52  ;;  %v5428_v52 = vadd.f32 %v11781_v55, %v5122_v51  ;;  %v11886_v57 = vpop.f32.mrf.mxu0 }
 0x3ce   : > { %v5573_v31 = vpop.f32.mrf.mxu1 }
 0x3cf   : > { %v5804_v32 = vadd.f32 %v11870_v37, %v5733_v0  ;;  %v5732_v10 = vadd.f32 %v5573_v31, %v5426_v25  ;;  %v11905_v22 = vpop.f32.mrf.mxu0 }
 0x3d0   : > { %v8740_v54 = vpop.f32.mrf.mxu1 }
 0x3d1   : > { %v5836_v4 = vadd.f32 %v6444_v6, %v5804_v32  ;;  %v5803_v56 = vadd.f32 %v11870_v37, %v5732_v10  ;;  %v5735_v45 = vadd.f32 %v8740_v54, %v5429_v58  ;;  %v4822_v58 = vadd.f32 %v11666_v62, %v11654_v26  ;;  %v11921_v20 = vpop.f32.mrf.mxu0 }
 0x3d2   : > { %v5583_v55 = vpop.f32.mrf.mxu1  ;;  %v5432_v26 = vadd.f32 %v11803_v19, %v5126_v7  ;;  %v6450_v19 = vld [vmem:[%s8941_s12 + $0x69] sm:$0xff] }
 0x3d3   : > { %v5868_v15 = vmax.f32 %v5836_v4, 0.0  ;;  %v5835_v1 = vadd.f32 %v6443_v43, %v5803_v56  ;;  %v5806_v10 = vadd.f32 %v11870_v37, %v5735_v45  ;;  %v5734_v42 = vadd.f32 %v5583_v55, %v5428_v52 }
 0x3d4   : > { %v8743_v25 = vpop.f32.mrf.mxu1  ;;  %v4821_v43 = vadd.f32 %v11671_v24, %v11659_v2  ;;  %v5129_v62 = vadd.f32 %v11789_v11, %v4822_v58 }
 0x3d5   : > { %5900 = vst [vmem:[%s11896_s6 + $0x8] sm:$0xff] %v5868_v15  ;;  %v5867_v0 = vmax.f32 %v5835_v1, 0.0  ;;  %v5838_v63 = vadd.f32 %v6446_v50, %v5806_v10  ;;  %v5805_v6 = vadd.f32 %v11870_v37, %v5734_v42  ;;  %v5737_v31 = vadd.f32 %v8743_v25, %v5431_v23 }
 0x3d6   : > { %v5593_v18 = vpop.f32.mrf.mxu1  ;;  %v5435_v2 = vadd.f32 %v11809_v13, %v5129_v62  ;;  %v5128_v24 = vadd.f32 %v11793_v5, %v4821_v43  ;;  %v4823_v15 = vadd.f32 %v11681_v44, %v11669_v27  ;;  %v6449_v13 = vld [vmem:[%s8941_s12 + $0x61] sm:$0xff]  ;;  %v11937_v5 = vpop.f32.mrf.mxu0  ;;  %v5437_v27 = vadd.f32 %v11821_v47, %v5131_v49  ;;  %v6451_v47 = vld [vmem:[%s8941_s12 + $0x79] sm:$0xff] }
 0x3d7   : > { %5899 = vst [vmem:[%s11896_s6] sm:$0xff] %v5867_v0  ;;  %v5870_v51 = vmax.f32 %v5838_v63, 0.0  ;;  %v5837_v32 = vadd.f32 %v6445_v38, %v5805_v6  ;;  %v5808_v53 = vadd.f32 %v11870_v37, %v5737_v31  ;;  %v5736_v59 = vadd.f32 %v5593_v18, %v5430_v61  ;;  %v12384_v18 = vld [vmem:[#allocation29_spill] sm:$0xff] }
 0x3d8   : > { %v8746_v54 = vpop.f32.mrf.mxu1  ;;  %v5434_v17 = vadd.f32 %v11815_v8, %v5128_v24  ;;  %v5130_v44 = vadd.f32 %v11799_v30, %v4823_v15  ;;  %v6452_v8 = vld [vmem:[%s8941_s12 + $0x81] sm:$0xff]  ;;  %v4825_v6 = vadd.f32 %v11691_v46, %v11679_v16  ;;  %v11953_v30 = vpop.f32.mrf.mxu0  ;;  %v5439_v16 = vadd.f32 %v11833_v29, %v5133_v12  ;;  %v6453_v29 = vld [vmem:[%s8941_s12 + $0x91] sm:$0xff] }
 0x3d9   : > { %5902 = vst [vmem:[%s11896_s6 + $0x18] sm:$0xff] %v5870_v51  ;;  %v5869_v52 = vmax.f32 %v5837_v32, 0.0  ;;  %v5840_v4 = vadd.f32 %v6448_v40, %v5808_v53  ;;  %v5807_v56 = vadd.f32 %v11870_v37, %v5736_v59  ;;  %v5739_v45 = vadd.f32 %v8746_v54, %v5433_v60  ;;  %v12385_v51 = vld [vmem:[#allocation78_spill] sm:$0xff]  ;;  %v12386_v46 = vld [vmem:[#allocation41_spill] sm:$0xff]  ;;  %v12388_v54 = vld [vmem:[#allocation4_spill] sm:$0xff] }
 0x3da   : > { %v5603_v11 = vpop.f32.mrf.mxu1  ;;  %v5436_v3 = vadd.f32 %v11827_v28, %v5130_v44  ;;  %v4828_v32 = vadd.f32 %v12385_v51, %v12384_v18  ;;  %v5132_v28 = vadd.f32 %v12386_v46, %v4825_v6  ;;  %v11969_v24 = vpop.f32.mrf.mxu0  ;;  %v12395_v44 = vld [vmem:[#allocation3_spill] sm:$0xff] }
 0x3db   : > { %5901 = vst [vmem:[%s11896_s6 + $0x10] sm:$0xff] %v5869_v52  ;;  %v5872_v23 = vmax.f32 %v5840_v4, 0.0  ;;  %v5839_v34 = vadd.f32 %v6447_v35, %v5807_v56  ;;  %v5810_v50 = vadd.f32 %v11870_v37, %v5739_v45  ;;  %v5738_v55 = vadd.f32 %v5603_v11, %v5432_v26  ;;  %v12387_v35 = vld [vmem:[#allocation32_spill] sm:$0xff]  ;;  %v12389_v4 = vld [vmem:[#allocation18_spill] sm:$0xff] }
 0x3dc   : > { %v8749_v1 = vpop.f32.mrf.mxu1  ;;  %v4827_v52 = vadd.f32 %v12388_v54, %v12387_v35  ;;  %v5438_v56 = vadd.f32 %v12389_v4, %v5132_v28  ;;  %v12390_v45 = vld [vmem:[#allocation44_spill] sm:$0xff]  ;;  %v6455_v6 = vld [vmem:[%s8941_s12 + $0xa9] sm:$0xff]  ;;  %v11985_v12 = vpop.f32.mrf.mxu0 }
 0x3dd   : > { %5904 = vst [vmem:[%s11896_s6 + $0x28] sm:$0xff] %v5872_v23  ;;  %v5871_v10 = vmax.f32 %v5839_v34, 0.0  ;;  %v5842_v42 = vadd.f32 %v6450_v19, %v5810_v50  ;;  %v5809_v41 = vadd.f32 %v11870_v37, %v5738_v55  ;;  %v5741_v61 = vadd.f32 %v8749_v1, %v5435_v2  ;;  %v12391_v50 = vld [vmem:[#allocation75_spill] sm:$0xff]  ;;  %v12392_v55 = vld [vmem:[#allocation10_spill] sm:$0xff] }
 0x3de   : > { %v5613_v33 = vpop.f32.mrf.mxu1  ;;  %v5135_v36 = vadd.f32 %v12390_v45, %v4828_v32  ;;  %v4830_v15 = vadd.f32 %v12392_v55, %v12391_v50  ;;  %v12401_v32 = vld [vmem:[#allocation16_spill] sm:$0xff]  ;;  %v6458_v46 = vld [vmem:[%s8941_s12 + $0xc9] sm:$0xff]  ;;  %v12001_v45 = vpop.f32.mrf.mxu0 }
 0x3df   : > { %5903 = vst [vmem:[%s11896_s6 + $0x20] sm:$0xff] %v5871_v10  ;;  %v5874_v38 = vmax.f32 %v5842_v42, 0.0  ;;  %v5841_v25 = vadd.f32 %v6449_v13, %v5809_v41  ;;  %v5812_v0 = vadd.f32 %v11870_v37, %v5741_v61  ;;  %v5740_v63 = vadd.f32 %v5613_v33, %v5434_v17  ;;  %v12393_v17 = vld [vmem:[#allocation47_spill] sm:$0xff]  ;;  %v12394_v13 = vld [vmem:[#allocation96_spill] sm:$0xff] }
 0x3e0   : > { %v8752_v31 = vpop.f32.mrf.mxu1  ;;  %v5441_v49 = vadd.f32 %v12393_v17, %v5135_v36  ;;  %v5134_v1 = vadd.f32 %v12394_v13, %v4827_v52  ;;  %v6456_v10 = vld [vmem:[%s8941_s12 + $0xb1] sm:$0xff]  ;;  %v12404_v52 = vld [vmem:[#allocation17_spill] sm:$0xff] }
 0x3e1   : > { %5906 = vst [vmem:[%s11896_s6 + $0x38] sm:$0xff] %v5874_v38  ;;  %v5873_v58 = vmax.f32 %v5841_v25, 0.0  ;;  %v5844_v60 = vadd.f32 %v6452_v8, %v5812_v0  ;;  %v5811_v7 = vadd.f32 %v11870_v37, %v5740_v63  ;;  %v5743_v40 = vadd.f32 %v8752_v31, %v5437_v27  ;;  %v12396_v8 = vld [vmem:[#allocation31_spill] sm:$0xff]  ;;  %v12397_v38 = vld [vmem:[#allocation52_spill] sm:$0xff] }
 0x3e2   : > { %v5623_v53 = vpop.f32.mrf.mxu1  ;;  %v4829_v33 = vadd.f32 %v12396_v8, %v12395_v44  ;;  %v5440_v25 = vadd.f32 %v12397_v38, %v5134_v1  ;;  %v12398_v0 = vld [vmem:[#allocation83_spill] sm:$0xff] }
 0x3e3   : > { %5905 = vst [vmem:[%s11896_s6 + $0x30] sm:$0xff] %v5873_v58  ;;  %v5876_v59 = vmax.f32 %v5844_v60, 0.0  ;;  %v5843_v43 = vadd.f32 %v6451_v47, %v5811_v7  ;;  %v5814_v26 = vadd.f32 %v11870_v37, %v5743_v40  ;;  %v5742_v62 = vadd.f32 %v5623_v53, %v5436_v3  ;;  %v12399_v7 = vld [vmem:[#allocation9_spill] sm:$0xff] }
 0x3e4   : > { %v8755_v2 = vpop.f32.mrf.mxu1  ;;  %v5137_v63 = vadd.f32 %v12398_v0, %v4830_v15  ;;  %v12400_v40 = vld [vmem:[#allocation81_spill] sm:$0xff] }
 0x3e5   : > { %5908 = vst [vmem:[%s11896_s6 + $0x48] sm:$0xff] %v5876_v59  ;;  %v5875_v19 = vmax.f32 %v5843_v43, 0.0  ;;  %v5846_v11 = vadd.f32 %v6454_v9, %v5814_v26  ;;  %v5813_v23 = vadd.f32 %v11870_v37, %v5742_v62  ;;  %v5745_v34 = vadd.f32 %v8755_v2, %v5439_v16  ;;  %v12402_v26 = vld [vmem:[#allocation30_spill] sm:$0xff] }
 0x3e6   : > { %v5633_v42 = vpop.f32.mrf.mxu1  ;;  %v4832_v18 = vadd.f32 %v12400_v40, %v12399_v7  ;;  %v5443_v51 = vadd.f32 %v11861_v21, %v5137_v63  ;;  %v5136_v16 = vadd.f32 %v12401_v32, %v4829_v33  ;;  %v12403_v62 = vld [vmem:[#allocation6_spill] sm:$0xff]  ;;  %v12017_v33 = vpop.f32.mrf.mxu0 }
 0x3e7   : > { %5907 = vst [vmem:[%s11896_s6 + $0x40] sm:$0xff] %v5875_v19  ;;  %v5878_v41 = vmax.f32 %v5846_v11, 0.0  ;;  %v5845_v61 = vadd.f32 %v6453_v29, %v5813_v23  ;;  %v5816_v48 = vadd.f32 %v11870_v37, %v5745_v34  ;;  %v5744_v27 = vadd.f32 %v5633_v42, %v5438_v56  ;;  %v6457_v21 = vld [vmem:[%s8941_s12 + $0xc1] sm:$0xff]  ;;  %v12405_v11 = vld [vmem:[#allocation76_spill] sm:$0xff] }
 0x3e8   : > { %v8758_v3 = vpop.f32.mrf.mxu1  ;;  %v4831_v35 = vadd.f32 %v12403_v62, %v12402_v26  ;;  %v5442_v54 = vadd.f32 %v11874_v14, %v5136_v16  ;;  %v5139_v4 = vadd.f32 %v12404_v52, %v4832_v18  ;;  %v12406_v23 = vld [vmem:[#allocation36_spill] sm:$0xff]  ;;  %v12407_v14 = vld [vmem:[#allocation42_spill] sm:$0xff]  ;;  %v12408_v42 = vld [vmem:[#allocation5_spill] sm:$0xff]  ;;  %v5397_v26 = vpop.f32.mrf.mxu0 }
 0x3e9   : > { %5910 = vst [vmem:[%s11896_s6 + $0x58] sm:$0xff] %v5878_v41  ;;  %v5877_v47 = vmax.f32 %v5845_v61, 0.0  ;;  %v5848_v31 = vadd.f32 %v6456_v10, %v5816_v48  ;;  %v5815_v58 = vadd.f32 %v11870_v37, %v5744_v27  ;;  %v5747_v60 = vadd.f32 %v8758_v3, %v5441_v49  ;;  %v6460_v15 = vld [vmem:[%s8941_s12 + $0xe1] sm:$0xff]  ;;  %v12410_v27 = vld [vmem:[#allocation43_spill] sm:$0xff]  ;;  %v12412_v3 = vld [vmem:[#allocation8_spill] sm:$0xff] }
 0x3ea   : > { %v5643_v28 = vpop.f32.mrf.mxu1  ;;  %v4834_v34 = vadd.f32 %v12406_v23, %v12405_v11  ;;  %v5445_v50 = vadd.f32 %v11886_v57, %v5139_v4  ;;  %v5138_v55 = vadd.f32 %v12407_v14, %v4831_v35  ;;  %v12409_v41 = vld [vmem:[#allocation77_spill] sm:$0xff]  ;;  %v12414_v16 = vld [vmem:[#allocation84_spill] sm:$0xff]  ;;  %v12417_v4 = vld [vmem:[#allocation7_spill] sm:$0xff] }
 0x3eb   : > { %5909 = vst [vmem:[%s11896_s6 + $0x50] sm:$0xff] %v5877_v47  ;;  %v5880_v9 = vmax.f32 %v5848_v31, 0.0  ;;  %v5847_v53 = vadd.f32 %v6455_v6, %v5815_v58  ;;  %v5818_v59 = vadd.f32 %v11870_v37, %v5747_v60  ;;  %v5746_v43 = vadd.f32 %v5643_v28, %v5440_v25  ;;  %v6459_v57 = vld [vmem:[%s8941_s12 + $0xd9] sm:$0xff]  ;;  %v12420_v14 = vld [vmem:[#allocation11_spill] sm:$0xff] }
 0x3ec   : > { %v8761_v56 = vpop.f32.mrf.mxu1  ;;  %v4833_v61 = vadd.f32 %v12409_v41, %v12408_v42  ;;  %v5444_v48 = vadd.f32 %v11905_v22, %v5138_v55  ;;  %v5141_v44 = vadd.f32 %v12410_v27, %v4834_v34  ;;  %v12411_v6 = vld [vmem:[#allocation33_spill] sm:$0xff]  ;;  %v12423_v27 = vld [vmem:[#allocation34_spill] sm:$0xff] }
 0x3ed   : > { %5912 = vst [vmem:[%s11896_s6 + $0x68] sm:$0xff] %v5880_v9  ;;  %v5879_v36 = vmax.f32 %v5847_v53, 0.0  ;;  %v5850_v29 = vadd.f32 %v6458_v46, %v5818_v59  ;;  %v5817_v2 = vadd.f32 %v11870_v37, %v5746_v43  ;;  %v5749_v19 = vadd.f32 %v8761_v56, %v5443_v51  ;;  %v12413_v22 = vld [vmem:[#allocation85_spill] sm:$0xff]  ;;  %v12415_v46 = vld [vmem:[#allocation12_spill] sm:$0xff] }
 0x3ee   : > { %v5653_v17 = vpop.f32.mrf.mxu1  ;;  %v4836_v47 = vadd.f32 %v12412_v3, %v12411_v6  ;;  %v5447_v31 = vadd.f32 %v11921_v20, %v5141_v44  ;;  %v5140_v58 = vadd.f32 %v12413_v22, %v4833_v61  ;;  %v6462_v60 = vld [vmem:[%s8941_s12 + $0xf9] sm:$0xff]  ;;  %v4835_v28 = vadd.f32 %v12415_v46, %v12414_v16  ;;  %v6461_v20 = vld [vmem:[%s8941_s12 + $0xf1] sm:$0xff] }
 0x3ef   : > { %5911 = vst [vmem:[%s11896_s6 + $0x60] sm:$0xff] %v5879_v36  ;;  %v5882_v49 = vmax.f32 %v5850_v29, 0.0  ;;  %v5849_v13 = vadd.f32 %v6457_v21, %v5817_v2  ;;  %v5820_v1 = vadd.f32 %v11870_v37, %v5749_v19  ;;  %v5748_v10 = vadd.f32 %v5653_v17, %v5442_v54  ;;  %v12416_v53 = vld [vmem:[#allocation45_spill] sm:$0xff]  ;;  %v12418_v21 = vld [vmem:[#allocation35_spill] sm:$0xff]  ;;  %v12419_v29 = vld [vmem:[#allocation48_spill] sm:$0xff] }
 0x3f0   : > { %v8764_v8 = vpop.f32.mrf.mxu1  ;;  %v5446_v9 = vadd.f32 %v11937_v5, %v5140_v58  ;;  %v5143_v59 = vadd.f32 %v12416_v53, %v4836_v47  ;;  %v4838_v56 = vadd.f32 %v12418_v21, %v12417_v4  ;;  %v5142_v5 = vadd.f32 %v12419_v29, %v4835_v28  ;;  %v6464_v2 = vld [vmem:[%s8941_s12 + $0x111] sm:$0xff]  ;;  %v12421_v55 = vld [vmem:[#allocation37_spill] sm:$0xff] }
 0x3f1   : > { %5914 = vst [vmem:[%s11896_s6 + $0x78] sm:$0xff] %v5882_v49  ;;  %v5881_v38 = vmax.f32 %v5849_v13, 0.0  ;;  %v5852_v25 = vadd.f32 %v6460_v15, %v5820_v1  ;;  %v5819_v0 = vadd.f32 %v11870_v37, %v5748_v10  ;;  %v5751_v63 = vadd.f32 %v8764_v8, %v5445_v50  ;;  %v12422_v49 = vld [vmem:[#allocation86_spill] sm:$0xff]  ;;  %v8699_v10 = vpop.f32.mrf.mxu0  ;;  %v12424_v44 = vld [vmem:[#allocation80_spill] sm:$0xff]  ;;  %v12427_v22 = vld [vmem:[#allocation13_spill] sm:$0xff] }
 0x3f2   : > { %v5663_v7 = vpop.f32.mrf.mxu1  ;;  %v5449_v36 = vadd.f32 %v11953_v30, %v5143_v59  ;;  %v4837_v15 = vadd.f32 %v12421_v55, %v12420_v14  ;;  %v5448_v17 = vadd.f32 %v11969_v24, %v5142_v5  ;;  %v5145_v13 = vadd.f32 %v12422_v49, %v4838_v56  ;;  %v6463_v30 = vld [vmem:[%s8941_s12 + $0x109] sm:$0xff]  ;;  %v12432_v56 = vld [vmem:[#allocation89_spill] sm:$0xff] }
 0x3f3   : > { %5913 = vst [vmem:[%s11896_s6 + $0x70] sm:$0xff] %v5881_v38  ;;  %v5884_v40 = vmax.f32 %v5852_v25, 0.0  ;;  %v5851_v18 = vadd.f32 %v6459_v57, %v5819_v0  ;;  %v5822_v51 = vadd.f32 %v11870_v37, %v5751_v63  ;;  %v5750_v32 = vadd.f32 %v5663_v7, %v5444_v48  ;;  %v12425_v38 = vld [vmem:[#allocation19_spill] sm:$0xff]  ;;  %v12428_v7 = vld [vmem:[#allocation46_spill] sm:$0xff] }
 0x3f4   : > { %v8767_v43 = vpop.f32.mrf.mxu1  ;;  %v4840_v57 = vadd.f32 %v12424_v44, %v12423_v27  ;;  %v5451_v8 = vadd.f32 %v11985_v12, %v5145_v13  ;;  %v5144_v24 = vadd.f32 %v12425_v38, %v4837_v15  ;;  %v6466_v25 = vld [vmem:[%s8941_s12 + $0x129] sm:$0xff]  ;;  %v6465_v12 = vld [vmem:[%s8941_s12 + $0x121] sm:$0xff] }
 0x3f5   : > { %5916 = vst [vmem:[%s11896_s6 + $0x88] sm:$0xff] %v5884_v40  ;;  %v5883_v62 = vmax.f32 %v5851_v18, 0.0  ;;  %v5854_v35 = vadd.f32 %v6462_v60, %v5822_v51  ;;  %v5821_v54 = vadd.f32 %v11870_v37, %v5750_v32  ;;  %v5753_v52 = vadd.f32 %v8767_v43, %v5447_v31  ;;  %v12426_v31 = vld [vmem:[#allocation79_spill] sm:$0xff]  ;;  %v5407_v51 = vpop.f32.mrf.mxu0  ;;  %v12435_v15 = vld [vmem:[#allocation14_spill] sm:$0xff] }
 0x3f6   : > { %v5673_v19 = vpop.f32.mrf.mxu1  ;;  %v4839_v58 = vadd.f32 %v12427_v22, %v12426_v31  ;;  %v5450_v60 = vadd.f32 %v12001_v45, %v5144_v24  ;;  %v5147_v40 = vadd.f32 %v12428_v7, %v4840_v57  ;;  %v12430_v53 = vld [vmem:[#allocation15_spill] sm:$0xff]  ;;  %v12438_v44 = vld [vmem:[#allocation38_spill] sm:$0xff]  ;;  %v12439_v57 = vld [vmem:[#allocation92_spill] sm:$0xff] }
 0x3f7   : > { %5915 = vst [vmem:[%s11896_s6 + $0x80] sm:$0xff] %v5883_v62  ;;  %v5886_v11 = vmax.f32 %v5854_v35, 0.0  ;;  %v5853_v23 = vadd.f32 %v6461_v20, %v5821_v54  ;;  %v5824_v34 = vadd.f32 %v11870_v37, %v5753_v52  ;;  %v5752_v50 = vadd.f32 %v5673_v19, %v5446_v9  ;;  %v12429_v9 = vld [vmem:[#allocation40_spill] sm:$0xff]  ;;  %v12431_v43 = vld [vmem:[#allocation87_spill] sm:$0xff]  ;;  %v6468_v62 = vld [vmem:[%s8941_s12 + $0x141] sm:$0xff] }
 0x3f8   : > { %v8770_v1 = vpop.f32.mrf.mxu1  ;;  %v4842_v59 = vadd.f32 %v12430_v53, %v12429_v9  ;;  %v5453_v20 = vadd.f32 %v12017_v33, %v5147_v40  ;;  %v5146_v45 = vadd.f32 %v12431_v43, %v4839_v58  ;;  %v12440_v31 = vld [vmem:[#allocation20_spill] sm:$0xff] }
 0x3f9   : > { %5918 = vst [vmem:[%s11896_s6 + $0x98] sm:$0xff] %v5886_v11  ;;  %v5885_v42 = vmax.f32 %v5853_v23, 0.0  ;;  %v5856_v41 = vadd.f32 %v6464_v2, %v5824_v34  ;;  %v5823_v61 = vadd.f32 %v11870_v37, %v5752_v50  ;;  %v5755_v48 = vadd.f32 %v8770_v1, %v5449_v36  ;;  %v12433_v36 = vld [vmem:[#allocation39_spill] sm:$0xff]  ;;  %v12434_v2 = vld [vmem:[#allocation49_spill] sm:$0xff]  ;;  %v8702_v23 = vpop.f32.mrf.mxu0 }
 0x3fa   : > { %v5683_v0 = vpop.f32.mrf.mxu1  ;;  %v4841_v29 = vadd.f32 %v12433_v36, %v12432_v56  ;;  %v5452_v5 = vadd.f32 %v5397_v26, %v5146_v45  ;;  %v5149_v19 = vadd.f32 %v12434_v2, %v4842_v59  ;;  %v6467_v11 = vld [vmem:[%s8941_s12 + $0x139] sm:$0xff]  ;;  %v6474_v59 = vld [vmem:[%s8941_s12 + $0x189] sm:$0xff] }
 0x3fb   : > { %5917 = vst [vmem:[%s11896_s6 + $0x90] sm:$0xff] %v5885_v42  ;;  %v5888_v63 = vmax.f32 %v5856_v41, 0.0  ;;  %v5855_v6 = vadd.f32 %v6463_v30, %v5823_v61  ;;  %v5826_v3 = vadd.f32 %v11870_v37, %v5755_v48  ;;  %v5754_v47 = vadd.f32 %v5683_v0, %v5448_v17  ;;  %v12436_v17 = vld [vmem:[#allocation82_spill] sm:$0xff]  ;;  %v12437_v30 = vld [vmem:[#allocation88_spill] sm:$0xff]  ;;  %v5417_v0 = vpop.f32.mrf.mxu0 }
 0x3fc   : > { %v8773_v18 = vpop.f32.mrf.mxu1  ;;  %v4844_v49 = vadd.f32 %v12436_v17, %v12435_v15  ;;  %v5455_v13 = vadd.f32 %v8699_v10, %v5149_v19  ;;  %v5148_v1 = vadd.f32 %v12437_v30, %v4841_v29  ;;  %v6470_v26 = vld [vmem:[%s8941_s12 + $0x159] sm:$0xff] }
 0x3fd   : > { %5920 = vst [vmem:[%s11896_s6 + $0xa8] sm:$0xff] %v5888_v63  ;;  %v5887_v32 = vmax.f32 %v5855_v6, 0.0  ;;  %v5858_v16 = vadd.f32 %v6466_v25, %v5826_v3  ;;  %v5825_v46 = vadd.f32 %v11870_v37, %v5754_v47  ;;  %v5757_v28 = vadd.f32 %v8773_v18, %v5451_v8  ;;  %v6469_v25 = vld [vmem:[%s8941_s12 + $0x151] sm:$0xff] }
 0x3fe   : > { %v5693_v35 = vpop.f32.mrf.mxu1  ;;  %v4843_v8 = vadd.f32 %v12439_v57, %v12438_v44  ;;  %v5454_v38 = vadd.f32 %v5407_v51, %v5148_v1  ;;  %v5151_v24 = vadd.f32 %v11857_v39, %v4844_v49 }
 0x3ff   : > { %5919 = vst [vmem:[%s11896_s6 + $0xa0] sm:$0xff] %v5887_v32  ;;  %v5890_v54 = vmax.f32 %v5858_v16, 0.0  ;;  %v5857_v52 = vadd.f32 %v6465_v12, %v5825_v46  ;;  %v5828_v4 = vadd.f32 %v11870_v37, %v5757_v28  ;;  %v5756_v21 = vadd.f32 %v5693_v35, %v5450_v60  ;;  %v6472_v60 = vld [vmem:[%s8941_s12 + $0x171] sm:$0xff]  ;;  %v6471_v32 = vld [vmem:[%s8941_s12 + $0x169] sm:$0xff] }
 0x400   : > { %v8776_v33 = vpop.f32.mrf.mxu1  ;;  %v5150_v22 = vadd.f32 %v12440_v31, %v4843_v8  ;;  %v5457_v58 = vadd.f32 %v8702_v23, %v5151_v24 }
 0x401   : > { %5922 = vst [vmem:[%s11896_s6 + $0xb8] sm:$0xff] %v5890_v54  ;;  %v5889_v34 = vmax.f32 %v5857_v52, 0.0  ;;  %v5860_v50 = vadd.f32 %v6468_v62, %v5828_v4  ;;  %v5827_v14 = vadd.f32 %v11870_v37, %v5756_v21  ;;  %v5759_v55 = vadd.f32 %v8776_v33, %v5453_v20  ;;  %v6473_v54 = vld [vmem:[%s8941_s12 + $0x181] sm:$0xff] }
 0x402   : > { %v5703_v42 = vpop.f32.mrf.mxu1  ;;  %v5456_v51 = vadd.f32 %v5417_v0, %v5150_v22 }
 0x403   : > { %5921 = vst [vmem:[%s11896_s6 + $0xb0] sm:$0xff] %v5889_v34  ;;  %v5892_v41 = vmax.f32 %v5860_v50, 0.0  ;;  %v5859_v61 = vadd.f32 %v6467_v11, %v5827_v14  ;;  %v5830_v48 = vadd.f32 %v11870_v37, %v5759_v55  ;;  %v5758_v27 = vadd.f32 %v5703_v42, %v5452_v5 }
 0x404   : > { %v8779_v10 = vpop.f32.mrf.mxu1 }
 0x405   : > { %5924 = vst [vmem:[%s11896_s6 + $0xc8] sm:$0xff] %v5892_v41  ;;  %v5891_v63 = vmax.f32 %v5859_v61, 0.0  ;;  %v5862_v6 = vadd.f32 %v6470_v26, %v5830_v48  ;;  %v5829_v3 = vadd.f32 %v11870_v37, %v5758_v27  ;;  %v5761_v47 = vadd.f32 %v8779_v10, %v5455_v13 }
 0x406   : > { %v5713_v7 = vpop.f32.mrf.mxu1 }
 0x407   : > { %5923 = vst [vmem:[%s11896_s6 + $0xc0] sm:$0xff] %v5891_v63  ;;  %v5894_v39 = vmax.f32 %v5862_v6, 0.0  ;;  %v5861_v40 = vadd.f32 %v6469_v25, %v5829_v3  ;;  %v5832_v12 = vadd.f32 %v11870_v37, %v5761_v47  ;;  %v5760_v18 = vadd.f32 %v5713_v7, %v5454_v38 }
 0x408   : > { %v8782_v16 = vpop.f32.mrf.mxu1 }
 0x409   : > { %5926 = vst [vmem:[%s11896_s6 + $0xd8] sm:$0xff] %v5894_v39  ;;  %v5893_v46 = vmax.f32 %v5861_v40, 0.0  ;;  %v5864_v28 = vadd.f32 %v6472_v60, %v5832_v12  ;;  %v5831_v9 = vadd.f32 %v11870_v37, %v5760_v18  ;;  %v5763_v53 = vadd.f32 %v8782_v16, %v5457_v58 }
 0x40a   : > { %v5723_v20 = vpop.f32.mrf.mxu1 }
 0x40b   : > { %5925 = vst [vmem:[%s11896_s6 + $0xd0] sm:$0xff] %v5893_v46  ;;  %v5896_v43 = vmax.f32 %v5864_v28, 0.0  ;;  %v5863_v45 = vadd.f32 %v6471_v32, %v5831_v9  ;;  %v5834_v62 = vadd.f32 %v11870_v37, %v5763_v53  ;;  %v5762_v35 = vadd.f32 %v5723_v20, %v5456_v51 }
 0x40d   : > { %5928 = vst [vmem:[%s11896_s6 + $0xe8] sm:$0xff] %v5896_v43  ;;  %v5895_v52 = vmax.f32 %v5863_v45, 0.0  ;;  %v5866_v4 = vadd.f32 %v6474_v59, %v5834_v62  ;;  %v5833_v21 = vadd.f32 %v11870_v37, %v5762_v35 }
 0x40f   : > { %5927 = vst [vmem:[%s11896_s6 + $0xe0] sm:$0xff] %v5895_v52  ;;  %v5898_v56 = vmax.f32 %v5866_v4, 0.0  ;;  %v5865_v36 = vadd.f32 %v6473_v54, %v5833_v21 }
 0x411   : > { %5930 = vst [vmem:[%s11896_s6 + $0xf8] sm:$0xff] %v5898_v56  ;;  %v5897_v29 = vmax.f32 %v5865_v36, 0.0 }
 0x413   : > { %5929 = vst [vmem:[%s11896_s6 + $0xf0] sm:$0xff] %v5897_v29 }
 0x414 PF: > { %s15_s18 = sadd.s32 1, %s8800_s18  }
 0x415   : > { %p12_p4 = scmp.ge.s32.totalorder %s15_s18, 4  }
 0x417   :  { %14 = sbr.rel (!%p12_p4) target bundleno = 1 (0x1), region = 90 }

</bundles_post_ra>
